<compile_context>
chip_gen: v7x
topology: tpu7x:2x2x1
jax: 0.10.0
libtpu: 0.0.40
codegen_flags: <defaults>
</compile_context>

<pallas_src>
import jax
import jax.numpy as jnp
from jax.experimental import pallas as pl
from jax.experimental.pallas import tpu as pltpu

KSIZE = 7
PAD = KSIZE // 2


def _make_kernel(W, HW, C, NB):
    """Builds the kernel for static width W, flattened size HW, channels C, batch block NB."""
    OFF = PAD * (W + 1)          # zero border length of the flattened padded pooled maps
    K2 = KSIZE * KSIZE
    inv_c = 1.0 / C

    def kernel(w_ref, b_ref, mask_ref, x_ref, out_ref, pad_ref):
        # w_ref   : (2*K*K,) f32 SMEM  [K*K avg-channel taps, then K*K max-channel taps]
        # b_ref   : (1,)     f32 SMEM
        # mask_ref: (K, HW)  f32 VMEM  per-dj column-validity masks
        # x_ref   : (NB, C, HW) VMEM   native dtype
        # out_ref : (NB, C, HW) VMEM   native dtype
        # pad_ref : (2, NB, HW + 2*OFF) f32 VMEM scratch (flattened padded pooled maps)

        # Zero only the two borders; the interior is fully overwritten below.
        pad_ref[:, :, pl.ds(0, OFF)] = jnp.zeros((2, NB, OFF), jnp.float32)
        pad_ref[:, :, pl.ds(OFF + HW, OFF)] = jnp.zeros((2, NB, OFF), jnp.float32)

        # Channel pooling, one image (C, HW) at a time; pooled rows are written
        # straight into the pad scratch so the conv sees (NB, HW) maps with NB
        # on the sublane axis (full vreg occupancy).
        mxu_mean = (C >= 8) and (jnp.dtype(x_ref.dtype).itemsize < 4)
        if mxu_mean:
            ones_row = jnp.ones((1, C), dtype=x_ref.dtype)
        for b in range(NB):
            xb = x_ref[b]                                     # (C, HW), native dtype
            if mxu_mean:
                # Exact: bf16 products accumulated in f32 on the idle MXU.
                avg_b = jnp.dot(ones_row, xb,
                                preferred_element_type=jnp.float32) * inv_c
            else:
                # f32 inputs: keep the sum on the VPU (exact f32 accumulation).
                avg_b = jnp.sum(xb, axis=0, keepdims=True,
                                dtype=jnp.float32) * inv_c    # (1, HW)
            max_b = jnp.max(xb, axis=0, keepdims=True).astype(jnp.float32)
            pad_ref[0, pl.ds(b, 1), pl.ds(OFF, HW)] = avg_b
            pad_ref[1, pl.ds(b, 1), pl.ds(OFF, HW)] = max_b

        padded = pad_ref[...]                                 # (2, NB, L)
        masks = mask_ref[...]                                 # (K, HW)

        # Hoist all SMEM scalar weight reads out of the tap loop.
        wa = [w_ref[t] for t in range(K2)]
        wm = [w_ref[K2 + t] for t in range(K2)]

        # 7x7 conv over the two pooled channels, fully unrolled.
        # Flat offset of tap (di, dj) is di*W + dj; column wrap-around across
        # rows is removed by the per-dj mask (applied once per dj).
        acc = jnp.full((NB, HW), b_ref[0], dtype=jnp.float32)
        for dj in range(KSIZE):
            part = None
            for di in range(KSIZE):
                t = di * KSIZE + dj
                s = di * W + dj
                sl = padded[:, :, s:s + HW]                   # (2, NB, HW): one lane shift
                # sl[0]/sl[1] index the major axis -> free vreg selection.
                contrib = wa[t] * sl[0] + wm[t] * sl[1]       # (NB, HW)
                part = contrib if part is None else part + contrib
            acc = acc + part * masks[dj:dj + 1, :]            # (1,HW) bcast over sublanes

        attn = jax.nn.sigmoid(acc)                            # (NB, HW) f32, EUP

        # Final multiply in the native dtype (no f32 copy of x).
        for b in range(NB):
            a_b = attn[b:b + 1, :].astype(out_ref.dtype)      # (1, HW)
            out_ref[b] = x_ref[b] * a_b                       # (C,HW)*(1,HW)

    return kernel


def _vmem_bytes(nb, C, HW, L, itemsize):
    blk = nb * C * HW * itemsize
    # double-buffered input + output blocks, pad scratch, masks, slack
    return 4 * blk + 2 * nb * L * 4 + KSIZE * HW * 4 + (2 << 20)


def spatial_attention(x, weight, bias):
    """x: (N, C, H, W); weight: (1, 2, K, K); bias: (1,)."""
    N, C, H, W = x.shape
    HW = H * W
    OFF = PAD * (W + 1)
    L = HW + 2 * OFF
    itemsize = jnp.dtype(x.dtype).itemsize

    # Batch blocking: NB images per grid step (fills the 8 sublanes of the
    # conv's pooled-map vregs); halve NB until double-buffered blocks fit a
    # VMEM budget that is safe on every generation (v7x: 64 MiB physical).
    vmem_cap = 48 * 1024 * 1024
    NB = min(8, N)
    while NB > 1 and _vmem_bytes(NB, C, HW, L, itemsize) > vmem_cap:
        NB //= 2
    vmem_limit = int(min(vmem_cap,
                         max(_vmem_bytes(NB, C, HW, L, itemsize), 16 * 1024 * 1024)))
    grid = pl.cdiv(N, NB)

    x_flat = x.reshape(N, C, HW)                       # free view -> lane-major blocks
    w_flat = weight.reshape(-1).astype(jnp.float32)    # (2*K*K,)
    b = bias.astype(jnp.float32)

    # Column-validity mask per dj tap: tap (.., dj) at output column qj reads
    # pooled column qj + dj - PAD, valid iff it lies in [0, W).
    col = jnp.arange(HW, dtype=jnp.int32) % W                     # (HW,)
    dj = jnp.arange(KSIZE, dtype=jnp.int32)[:, None]              # (K, 1)
    shifted = col[None, :] + dj - PAD
    mask = ((shifted >= 0) & (shifted < W)).astype(jnp.float32)   # (K, HW)

    cost = pl.CostEstimate(
        flops=int((3 * C + 4 * KSIZE * KSIZE + 8) * HW * N),
        transcendentals=int(N * HW),
        bytes_accessed=int(2 * N * C * HW * itemsize),
    )

    out_flat = pl.pallas_call(
        _make_kernel(W, HW, C, NB),
        out_shape=jax.ShapeDtypeStruct((N, C, HW), x.dtype),
        grid_spec=pltpu.PrefetchScalarGridSpec(
            num_scalar_prefetch=0,
            grid=(grid,),
            in_specs=[
                pl.BlockSpec(memory_space=pltpu.MemorySpace.SMEM),   # conv weights
                pl.BlockSpec(memory_space=pltpu.MemorySpace.SMEM),   # conv bias
                pl.BlockSpec((KSIZE, HW), lambda n: (0, 0)),         # dj masks (VMEM)
                pl.BlockSpec((NB, C, HW), lambda n: (n, 0, 0)),      # x block
            ],
            out_specs=pl.BlockSpec((NB, C, HW), lambda n: (n, 0, 0)),
            scratch_shapes=[pltpu.VMEM((2, NB, L), jnp.float32)],
        ),
        compiler_params=pltpu.CompilerParams(
            dimension_semantics=("parallel",),
            vmem_limit_bytes=vmem_limit),
        cost_estimate=cost,
    )(w_flat, b, mask, x_flat)
    return out_flat.reshape(N, C, H, W)


def spatial_attention_ref(x, weight, bias):
    avg = jnp.mean(x, axis=1, keepdims=True)
    mx = jnp.max(x, axis=1, keepdims=True)
    xcat = jnp.concatenate([avg, mx], axis=1)
    attn = jax.lax.conv_general_dilated(
        xcat, weight, window_strides=(1, 1),
        padding=[(PAD, PAD), (PAD, PAD)],
        dimension_numbers=("NCHW", "OIHW", "NCHW"))
    attn = attn + bias[None, :, None, None]
    return x * jax.nn.sigmoid(attn)


if __name__ == "__main__":
    key = jax.random.PRNGKey(0)
    kx, kw, kb = jax.random.split(key, 3)

    # batch=8 exercises the NB=8 batch-blocked conv path; shapes stay small.
    N, C, H, W = 8, 8, 16, 16
    x = jax.random.normal(kx, (N, C, H, W), dtype=jnp.float32)
    # Deterministic synthetic conv parameters (shapes from nn.Conv2d(2, 1, 7)).
    weight = jax.random.normal(kw, (1, 2, KSIZE, KSIZE), dtype=jnp.float32) * 0.1
    bias = jax.random.normal(kb, (1,), dtype=jnp.float32) * 0.1

    out = jax.block_until_ready(spatial_attention(x, weight, bias))

    ref = spatial_attention_ref(x, weight, bias)
    assert out.shape == (N, C, H, W)
    assert jnp.allclose(out, ref, atol=1e-5, rtol=1e-5), "mismatch vs reference"

    print("KERNEL_OK")
</pallas_src>

<mosaic_0001>
module attributes {stable_mosaic.version = 11 : i64} {
  func.func @kernel(%arg0: i32, %arg1: memref<98xf32, #tpu.memory_space<smem>>, %arg2: memref<1xf32, #tpu.memory_space<smem>>, %arg3: memref<7x256xf32, #tpu.memory_space<vmem>>, %arg4: memref<8x8x256xf32, #tpu.memory_space<vmem>>, %arg5: memref<8x8x256xf32, #tpu.memory_space<vmem>>, %arg6: memref<2x8x358xf32, #tpu.memory_space<vmem>>) attributes {dimension_semantics = [#tpu.dimension_semantics<parallel>], iteration_bounds = array<i64: 1>, scalar_prefetch = 0 : i64, scratch_operands = 1 : i64, tpu.core_type = #tpu.core_type<tc>, window_params = [{transform_indices = @transform_0, window_bounds = array<i64: 98>}, {transform_indices = @transform_1, window_bounds = array<i64: 1>}, {pipeline_mode = #tpu.pipeline_mode<synchronous>, transform_indices = @transform_2, window_bounds = array<i64: 7, 256>}, {transform_indices = @transform_3, window_bounds = array<i64: 8, 8, 256>}, {transform_indices = @transform_4, window_bounds = array<i64: 8, 8, 256>}]} {
    %cst = arith.constant 0.000000e+00 : f32
    %0 = vector.broadcast %cst : f32 to vector<2x8x51xf32>
    %c0 = arith.constant 0 : index
    %c0_0 = arith.constant 0 : index
    %c0_1 = arith.constant 0 : index
    %1 = vector.load %arg6[%c0, %c0_0, %c0_1] : memref<2x8x358xf32, #tpu.memory_space<vmem>>, vector<2x8x51xf32>
    tpu.vector_store %arg6[%c0, %c0_0, %c0_1], %0 {strides = array<i32>} : memref<2x8x358xf32, #tpu.memory_space<vmem>>, vector<2x8x51xf32>,
    %cst_2 = arith.constant 0.000000e+00 : f32
    %2 = vector.broadcast %cst_2 : f32 to vector<2x8x51xf32>
    %c0_3 = arith.constant 0 : index
    %c0_4 = arith.constant 0 : index
    %c307 = arith.constant 307 : index
    %3 = vector.load %arg6[%c0_3, %c0_4, %c307] : memref<2x8x358xf32, #tpu.memory_space<vmem>>, vector<2x8x51xf32>
    tpu.vector_store %arg6[%c0_3, %c0_4, %c307], %2 {strides = array<i32>} : memref<2x8x358xf32, #tpu.memory_space<vmem>>, vector<2x8x51xf32>,
    %c0_5 = arith.constant 0 : index
    %c0_6 = arith.constant 0 : index
    %c0_7 = arith.constant 0 : index
    %4 = vector.load %arg4[%c0_5, %c0_6, %c0_7] : memref<8x8x256xf32, #tpu.memory_space<vmem>>, vector<1x8x256xf32>
    %5 = vector.shape_cast %4 : vector<1x8x256xf32> to vector<8x256xf32>
    %cst_8 = arith.constant dense<0.000000e+00> : vector<256xf32>
    %6 = vector.multi_reduction <add>, %5, %cst_8 [0] : vector<8x256xf32> to vector<256xf32>
    %7 = vector.shape_cast %6 : vector<256xf32> to vector<1x256xf32>
    %cst_9 = arith.constant 1.250000e-01 : f32
    %8 = vector.broadcast %cst_9 : f32 to vector<1x256xf32>
    %9 = arith.mulf %7, %8 : vector<1x256xf32>
    %cst_10 = arith.constant dense<0xFF800000> : vector<256xf32>
    %10 = vector.multi_reduction <maximumf>, %5, %cst_10 [0] : vector<8x256xf32> to vector<256xf32>
    %11 = vector.shape_cast %10 : vector<256xf32> to vector<1x256xf32>
    %c0_11 = arith.constant 0 : index
    %c0_12 = arith.constant 0 : index
    %c51 = arith.constant 51 : index
    %12 = vector.load %arg6[%c0_11, %c0_12, %c51] : memref<2x8x358xf32, #tpu.memory_space<vmem>>, vector<1x1x256xf32>
    %13 = vector.shape_cast %12 : vector<1x1x256xf32> to vector<1x256xf32>
    %14 = vector.shape_cast %9 : vector<1x256xf32> to vector<1x1x256xf32>
    tpu.vector_store %arg6[%c0_11, %c0_12, %c51], %14 {strides = array<i32>} : memref<2x8x358xf32, #tpu.memory_space<vmem>>, vector<1x1x256xf32>,
    %c1 = arith.constant 1 : index
    %c0_13 = arith.constant 0 : index
    %c51_14 = arith.constant 51 : index
    %15 = vector.load %arg6[%c1, %c0_13, %c51_14] : memref<2x8x358xf32, #tpu.memory_space<vmem>>, vector<1x1x256xf32>
    %16 = vector.shape_cast %15 : vector<1x1x256xf32> to vector<1x256xf32>
    %17 = vector.shape_cast %11 : vector<1x256xf32> to vector<1x1x256xf32>
    tpu.vector_store %arg6[%c1, %c0_13, %c51_14], %17 {strides = array<i32>} : memref<2x8x358xf32, #tpu.memory_space<vmem>>, vector<1x1x256xf32>,
    %c1_15 = arith.constant 1 : index
    %c0_16 = arith.constant 0 : index
    %c0_17 = arith.constant 0 : index
    %18 = vector.load %arg4[%c1_15, %c0_16, %c0_17] : memref<8x8x256xf32, #tpu.memory_space<vmem>>, vector<1x8x256xf32>
    %19 = vector.shape_cast %18 : vector<1x8x256xf32> to vector<8x256xf32>
    %cst_18 = arith.constant dense<0.000000e+00> : vector<256xf32>
    %20 = vector.multi_reduction <add>, %19, %cst_18 [0] : vector<8x256xf32> to vector<256xf32>
    %21 = vector.shape_cast %20 : vector<256xf32> to vector<1x256xf32>
    %cst_19 = arith.constant 1.250000e-01 : f32
    %22 = vector.broadcast %cst_19 : f32 to vector<1x256xf32>
    %23 = arith.mulf %21, %22 : vector<1x256xf32>
    %cst_20 = arith.constant dense<0xFF800000> : vector<256xf32>
    %24 = vector.multi_reduction <maximumf>, %19, %cst_20 [0] : vector<8x256xf32> to vector<256xf32>
    %25 = vector.shape_cast %24 : vector<256xf32> to vector<1x256xf32>
    %c0_21 = arith.constant 0 : index
    %c1_22 = arith.constant 1 : index
    %c51_23 = arith.constant 51 : index
    %26 = vector.load %arg6[%c0_21, %c1_22, %c51_23] : memref<2x8x358xf32, #tpu.memory_space<vmem>>, vector<1x1x256xf32>
    %27 = vector.shape_cast %26 : vector<1x1x256xf32> to vector<1x256xf32>
    %28 = vector.shape_cast %23 : vector<1x256xf32> to vector<1x1x256xf32>
    tpu.vector_store %arg6[%c0_21, %c1_22, %c51_23], %28 {strides = array<i32>} : memref<2x8x358xf32, #tpu.memory_space<vmem>>, vector<1x1x256xf32>,
    %c1_24 = arith.constant 1 : index
    %c1_25 = arith.constant 1 : index
    %c51_26 = arith.constant 51 : index
    %29 = vector.load %arg6[%c1_24, %c1_25, %c51_26] : memref<2x8x358xf32, #tpu.memory_space<vmem>>, vector<1x1x256xf32>
    %30 = vector.shape_cast %29 : vector<1x1x256xf32> to vector<1x256xf32>
    %31 = vector.shape_cast %25 : vector<1x256xf32> to vector<1x1x256xf32>
    tpu.vector_store %arg6[%c1_24, %c1_25, %c51_26], %31 {strides = array<i32>} : memref<2x8x358xf32, #tpu.memory_space<vmem>>, vector<1x1x256xf32>,
    %c2 = arith.constant 2 : index
    %c0_27 = arith.constant 0 : index
    %c0_28 = arith.constant 0 : index
    %32 = vector.load %arg4[%c2, %c0_27, %c0_28] : memref<8x8x256xf32, #tpu.memory_space<vmem>>, vector<1x8x256xf32>
    %33 = vector.shape_cast %32 : vector<1x8x256xf32> to vector<8x256xf32>
    %cst_29 = arith.constant dense<0.000000e+00> : vector<256xf32>
    %34 = vector.multi_reduction <add>, %33, %cst_29 [0] : vector<8x256xf32> to vector<256xf32>
    %35 = vector.shape_cast %34 : vector<256xf32> to vector<1x256xf32>
    %cst_30 = arith.constant 1.250000e-01 : f32
    %36 = vector.broadcast %cst_30 : f32 to vector<1x256xf32>
    %37 = arith.mulf %35, %36 : vector<1x256xf32>
    %cst_31 = arith.constant dense<0xFF800000> : vector<256xf32>
    %38 = vector.multi_reduction <maximumf>, %33, %cst_31 [0] : vector<8x256xf32> to vector<256xf32>
    %39 = vector.shape_cast %38 : vector<256xf32> to vector<1x256xf32>
    %c0_32 = arith.constant 0 : index
    %c2_33 = arith.constant 2 : index
    %c51_34 = arith.constant 51 : index
    %40 = vector.load %arg6[%c0_32, %c2_33, %c51_34] : memref<2x8x358xf32, #tpu.memory_space<vmem>>, vector<1x1x256xf32>
    %41 = vector.shape_cast %40 : vector<1x1x256xf32> to vector<1x256xf32>
    %42 = vector.shape_cast %37 : vector<1x256xf32> to vector<1x1x256xf32>
    tpu.vector_store %arg6[%c0_32, %c2_33, %c51_34], %42 {strides = array<i32>} : memref<2x8x358xf32, #tpu.memory_space<vmem>>, vector<1x1x256xf32>,
    %c1_35 = arith.constant 1 : index
    %c2_36 = arith.constant 2 : index
    %c51_37 = arith.constant 51 : index
    %43 = vector.load %arg6[%c1_35, %c2_36, %c51_37] : memref<2x8x358xf32, #tpu.memory_space<vmem>>, vector<1x1x256xf32>
    %44 = vector.shape_cast %43 : vector<1x1x256xf32> to vector<1x256xf32>
    %45 = vector.shape_cast %39 : vector<1x256xf32> to vector<1x1x256xf32>
    tpu.vector_store %arg6[%c1_35, %c2_36, %c51_37], %45 {strides = array<i32>} : memref<2x8x358xf32, #tpu.memory_space<vmem>>, vector<1x1x256xf32>,
    %c3 = arith.constant 3 : index
    %c0_38 = arith.constant 0 : index
    %c0_39 = arith.constant 0 : index
    %46 = vector.load %arg4[%c3, %c0_38, %c0_39] : memref<8x8x256xf32, #tpu.memory_space<vmem>>, vector<1x8x256xf32>
    %47 = vector.shape_cast %46 : vector<1x8x256xf32> to vector<8x256xf32>
    %cst_40 = arith.constant dense<0.000000e+00> : vector<256xf32>
    %48 = vector.multi_reduction <add>, %47, %cst_40 [0] : vector<8x256xf32> to vector<256xf32>
    %49 = vector.shape_cast %48 : vector<256xf32> to vector<1x256xf32>
    %cst_41 = arith.constant 1.250000e-01 : f32
    %50 = vector.broadcast %cst_41 : f32 to vector<1x256xf32>
    %51 = arith.mulf %49, %50 : vector<1x256xf32>
    %cst_42 = arith.constant dense<0xFF800000> : vector<256xf32>
    %52 = vector.multi_reduction <maximumf>, %47, %cst_42 [0] : vector<8x256xf32> to vector<256xf32>
    %53 = vector.shape_cast %52 : vector<256xf32> to vector<1x256xf32>
    %c0_43 = arith.constant 0 : index
    %c3_44 = arith.constant 3 : index
    %c51_45 = arith.constant 51 : index
    %54 = vector.load %arg6[%c0_43, %c3_44, %c51_45] : memref<2x8x358xf32, #tpu.memory_space<vmem>>, vector<1x1x256xf32>
    %55 = vector.shape_cast %54 : vector<1x1x256xf32> to vector<1x256xf32>
    %56 = vector.shape_cast %51 : vector<1x256xf32> to vector<1x1x256xf32>
    tpu.vector_store %arg6[%c0_43, %c3_44, %c51_45], %56 {strides = array<i32>} : memref<2x8x358xf32, #tpu.memory_space<vmem>>, vector<1x1x256xf32>,
    %c1_46 = arith.constant 1 : index
    %c3_47 = arith.constant 3 : index
    %c51_48 = arith.constant 51 : index
    %57 = vector.load %arg6[%c1_46, %c3_47, %c51_48] : memref<2x8x358xf32, #tpu.memory_space<vmem>>, vector<1x1x256xf32>
    %58 = vector.shape_cast %57 : vector<1x1x256xf32> to vector<1x256xf32>
    %59 = vector.shape_cast %53 : vector<1x256xf32> to vector<1x1x256xf32>
    tpu.vector_store %arg6[%c1_46, %c3_47, %c51_48], %59 {strides = array<i32>} : memref<2x8x358xf32, #tpu.memory_space<vmem>>, vector<1x1x256xf32>,
    %c4 = arith.constant 4 : index
    %c0_49 = arith.constant 0 : index
    %c0_50 = arith.constant 0 : index
    %60 = vector.load %arg4[%c4, %c0_49, %c0_50] : memref<8x8x256xf32, #tpu.memory_space<vmem>>, vector<1x8x256xf32>
    %61 = vector.shape_cast %60 : vector<1x8x256xf32> to vector<8x256xf32>
    %cst_51 = arith.constant dense<0.000000e+00> : vector<256xf32>
    %62 = vector.multi_reduction <add>, %61, %cst_51 [0] : vector<8x256xf32> to vector<256xf32>
    %63 = vector.shape_cast %62 : vector<256xf32> to vector<1x256xf32>
    %cst_52 = arith.constant 1.250000e-01 : f32
    %64 = vector.broadcast %cst_52 : f32 to vector<1x256xf32>
    %65 = arith.mulf %63, %64 : vector<1x256xf32>
    %cst_53 = arith.constant dense<0xFF800000> : vector<256xf32>
    %66 = vector.multi_reduction <maximumf>, %61, %cst_53 [0] : vector<8x256xf32> to vector<256xf32>
    %67 = vector.shape_cast %66 : vector<256xf32> to vector<1x256xf32>
    %c0_54 = arith.constant 0 : index
    %c4_55 = arith.constant 4 : index
    %c51_56 = arith.constant 51 : index
    %68 = vector.load %arg6[%c0_54, %c4_55, %c51_56] : memref<2x8x358xf32, #tpu.memory_space<vmem>>, vector<1x1x256xf32>
    %69 = vector.shape_cast %68 : vector<1x1x256xf32> to vector<1x256xf32>
    %70 = vector.shape_cast %65 : vector<1x256xf32> to vector<1x1x256xf32>
    tpu.vector_store %arg6[%c0_54, %c4_55, %c51_56], %70 {strides = array<i32>} : memref<2x8x358xf32, #tpu.memory_space<vmem>>, vector<1x1x256xf32>,
    %c1_57 = arith.constant 1 : index
    %c4_58 = arith.constant 4 : index
    %c51_59 = arith.constant 51 : index
    %71 = vector.load %arg6[%c1_57, %c4_58, %c51_59] : memref<2x8x358xf32, #tpu.memory_space<vmem>>, vector<1x1x256xf32>
    %72 = vector.shape_cast %71 : vector<1x1x256xf32> to vector<1x256xf32>
    %73 = vector.shape_cast %67 : vector<1x256xf32> to vector<1x1x256xf32>
    tpu.vector_store %arg6[%c1_57, %c4_58, %c51_59], %73 {strides = array<i32>} : memref<2x8x358xf32, #tpu.memory_space<vmem>>, vector<1x1x256xf32>,
    %c5 = arith.constant 5 : index
    %c0_60 = arith.constant 0 : index
    %c0_61 = arith.constant 0 : index
    %74 = vector.load %arg4[%c5, %c0_60, %c0_61] : memref<8x8x256xf32, #tpu.memory_space<vmem>>, vector<1x8x256xf32>
    %75 = vector.shape_cast %74 : vector<1x8x256xf32> to vector<8x256xf32>
    %cst_62 = arith.constant dense<0.000000e+00> : vector<256xf32>
    %76 = vector.multi_reduction <add>, %75, %cst_62 [0] : vector<8x256xf32> to vector<256xf32>
    %77 = vector.shape_cast %76 : vector<256xf32> to vector<1x256xf32>
    %cst_63 = arith.constant 1.250000e-01 : f32
    %78 = vector.broadcast %cst_63 : f32 to vector<1x256xf32>
    %79 = arith.mulf %77, %78 : vector<1x256xf32>
    %cst_64 = arith.constant dense<0xFF800000> : vector<256xf32>
    %80 = vector.multi_reduction <maximumf>, %75, %cst_64 [0] : vector<8x256xf32> to vector<256xf32>
    %81 = vector.shape_cast %80 : vector<256xf32> to vector<1x256xf32>
    %c0_65 = arith.constant 0 : index
    %c5_66 = arith.constant 5 : index
    %c51_67 = arith.constant 51 : index
    %82 = vector.load %arg6[%c0_65, %c5_66, %c51_67] : memref<2x8x358xf32, #tpu.memory_space<vmem>>, vector<1x1x256xf32>
    %83 = vector.shape_cast %82 : vector<1x1x256xf32> to vector<1x256xf32>
    %84 = vector.shape_cast %79 : vector<1x256xf32> to vector<1x1x256xf32>
    tpu.vector_store %arg6[%c0_65, %c5_66, %c51_67], %84 {strides = array<i32>} : memref<2x8x358xf32, #tpu.memory_space<vmem>>, vector<1x1x256xf32>,
    %c1_68 = arith.constant 1 : index
    %c5_69 = arith.constant 5 : index
    %c51_70 = arith.constant 51 : index
    %85 = vector.load %arg6[%c1_68, %c5_69, %c51_70] : memref<2x8x358xf32, #tpu.memory_space<vmem>>, vector<1x1x256xf32>
    %86 = vector.shape_cast %85 : vector<1x1x256xf32> to vector<1x256xf32>
    %87 = vector.shape_cast %81 : vector<1x256xf32> to vector<1x1x256xf32>
    tpu.vector_store %arg6[%c1_68, %c5_69, %c51_70], %87 {strides = array<i32>} : memref<2x8x358xf32, #tpu.memory_space<vmem>>, vector<1x1x256xf32>,
    %c6 = arith.constant 6 : index
    %c0_71 = arith.constant 0 : index
    %c0_72 = arith.constant 0 : index
    %88 = vector.load %arg4[%c6, %c0_71, %c0_72] : memref<8x8x256xf32, #tpu.memory_space<vmem>>, vector<1x8x256xf32>
    %89 = vector.shape_cast %88 : vector<1x8x256xf32> to vector<8x256xf32>
    %cst_73 = arith.constant dense<0.000000e+00> : vector<256xf32>
    %90 = vector.multi_reduction <add>, %89, %cst_73 [0] : vector<8x256xf32> to vector<256xf32>
    %91 = vector.shape_cast %90 : vector<256xf32> to vector<1x256xf32>
    %cst_74 = arith.constant 1.250000e-01 : f32
    %92 = vector.broadcast %cst_74 : f32 to vector<1x256xf32>
    %93 = arith.mulf %91, %92 : vector<1x256xf32>
    %cst_75 = arith.constant dense<0xFF800000> : vector<256xf32>
    %94 = vector.multi_reduction <maximumf>, %89, %cst_75 [0] : vector<8x256xf32> to vector<256xf32>
    %95 = vector.shape_cast %94 : vector<256xf32> to vector<1x256xf32>
    %c0_76 = arith.constant 0 : index
    %c6_77 = arith.constant 6 : index
    %c51_78 = arith.constant 51 : index
    %96 = vector.load %arg6[%c0_76, %c6_77, %c51_78] : memref<2x8x358xf32, #tpu.memory_space<vmem>>, vector<1x1x256xf32>
    %97 = vector.shape_cast %96 : vector<1x1x256xf32> to vector<1x256xf32>
    %98 = vector.shape_cast %93 : vector<1x256xf32> to vector<1x1x256xf32>
    tpu.vector_store %arg6[%c0_76, %c6_77, %c51_78], %98 {strides = array<i32>} : memref<2x8x358xf32, #tpu.memory_space<vmem>>, vector<1x1x256xf32>,
    %c1_79 = arith.constant 1 : index
    %c6_80 = arith.constant 6 : index
    %c51_81 = arith.constant 51 : index
    %99 = vector.load %arg6[%c1_79, %c6_80, %c51_81] : memref<2x8x358xf32, #tpu.memory_space<vmem>>, vector<1x1x256xf32>
    %100 = vector.shape_cast %99 : vector<1x1x256xf32> to vector<1x256xf32>
    %101 = vector.shape_cast %95 : vector<1x256xf32> to vector<1x1x256xf32>
    tpu.vector_store %arg6[%c1_79, %c6_80, %c51_81], %101 {strides = array<i32>} : memref<2x8x358xf32, #tpu.memory_space<vmem>>, vector<1x1x256xf32>,
    %c7 = arith.constant 7 : index
    %c0_82 = arith.constant 0 : index
    %c0_83 = arith.constant 0 : index
    %102 = vector.load %arg4[%c7, %c0_82, %c0_83] : memref<8x8x256xf32, #tpu.memory_space<vmem>>, vector<1x8x256xf32>
    %103 = vector.shape_cast %102 : vector<1x8x256xf32> to vector<8x256xf32>
    %cst_84 = arith.constant dense<0.000000e+00> : vector<256xf32>
    %104 = vector.multi_reduction <add>, %103, %cst_84 [0] : vector<8x256xf32> to vector<256xf32>
    %105 = vector.shape_cast %104 : vector<256xf32> to vector<1x256xf32>
    %cst_85 = arith.constant 1.250000e-01 : f32
    %106 = vector.broadcast %cst_85 : f32 to vector<1x256xf32>
    %107 = arith.mulf %105, %106 : vector<1x256xf32>
    %cst_86 = arith.constant dense<0xFF800000> : vector<256xf32>
    %108 = vector.multi_reduction <maximumf>, %103, %cst_86 [0] : vector<8x256xf32> to vector<256xf32>
    %109 = vector.shape_cast %108 : vector<256xf32> to vector<1x256xf32>
    %c0_87 = arith.constant 0 : index
    %c7_88 = arith.constant 7 : index
    %c51_89 = arith.constant 51 : index
    %110 = vector.load %arg6[%c0_87, %c7_88, %c51_89] : memref<2x8x358xf32, #tpu.memory_space<vmem>>, vector<1x1x256xf32>
    %111 = vector.shape_cast %110 : vector<1x1x256xf32> to vector<1x256xf32>
    %112 = vector.shape_cast %107 : vector<1x256xf32> to vector<1x1x256xf32>
    tpu.vector_store %arg6[%c0_87, %c7_88, %c51_89], %112 {strides = array<i32>} : memref<2x8x358xf32, #tpu.memory_space<vmem>>, vector<1x1x256xf32>,
    %c1_90 = arith.constant 1 : index
    %c7_91 = arith.constant 7 : index
    %c51_92 = arith.constant 51 : index
    %113 = vector.load %arg6[%c1_90, %c7_91, %c51_92] : memref<2x8x358xf32, #tpu.memory_space<vmem>>, vector<1x1x256xf32>
    %114 = vector.shape_cast %113 : vector<1x1x256xf32> to vector<1x256xf32>
    %115 = vector.shape_cast %109 : vector<1x256xf32> to vector<1x1x256xf32>
    tpu.vector_store %arg6[%c1_90, %c7_91, %c51_92], %115 {strides = array<i32>} : memref<2x8x358xf32, #tpu.memory_space<vmem>>, vector<1x1x256xf32>,
    %c0_93 = arith.constant 0 : index
    %c0_94 = arith.constant 0 : index
    %c0_95 = arith.constant 0 : index
    %116 = vector.load %arg6[%c0_93, %c0_94, %c0_95] : memref<2x8x358xf32, #tpu.memory_space<vmem>>, vector<2x8x358xf32>
    %c0_96 = arith.constant 0 : index
    %c0_97 = arith.constant 0 : index
    %117 = vector.load %arg3[%c0_96, %c0_97] : memref<7x256xf32, #tpu.memory_space<vmem>>, vector<7x256xf32>
    %c0_98 = arith.constant 0 : index
    %118 = memref.load %arg1[%c0_98] : memref<98xf32, #tpu.memory_space<smem>>
    %c1_99 = arith.constant 1 : index
    %119 = memref.load %arg1[%c1_99] : memref<98xf32, #tpu.memory_space<smem>>
    %c2_100 = arith.constant 2 : index
    %120 = memref.load %arg1[%c2_100] : memref<98xf32, #tpu.memory_space<smem>>
    %c3_101 = arith.constant 3 : index
    %121 = memref.load %arg1[%c3_101] : memref<98xf32, #tpu.memory_space<smem>>
    %c4_102 = arith.constant 4 : index
    %122 = memref.load %arg1[%c4_102] : memref<98xf32, #tpu.memory_space<smem>>
    %c5_103 = arith.constant 5 : index
    %123 = memref.load %arg1[%c5_103] : memref<98xf32, #tpu.memory_space<smem>>
    %c6_104 = arith.constant 6 : index
    %124 = memref.load %arg1[%c6_104] : memref<98xf32, #tpu.memory_space<smem>>
    %c7_105 = arith.constant 7 : index
    %125 = memref.load %arg1[%c7_105] : memref<98xf32, #tpu.memory_space<smem>>
    %c8 = arith.constant 8 : index
    %126 = memref.load %arg1[%c8] : memref<98xf32, #tpu.memory_space<smem>>
    %c9 = arith.constant 9 : index
    %127 = memref.load %arg1[%c9] : memref<98xf32, #tpu.memory_space<smem>>
    %c10 = arith.constant 10 : index
    %128 = memref.load %arg1[%c10] : memref<98xf32, #tpu.memory_space<smem>>
    %c11 = arith.constant 11 : index
    %129 = memref.load %arg1[%c11] : memref<98xf32, #tpu.memory_space<smem>>
    %c12 = arith.constant 12 : index
    %130 = memref.load %arg1[%c12] : memref<98xf32, #tpu.memory_space<smem>>
    %c13 = arith.constant 13 : index
    %131 = memref.load %arg1[%c13] : memref<98xf32, #tpu.memory_space<smem>>
    %c14 = arith.constant 14 : index
    %132 = memref.load %arg1[%c14] : memref<98xf32, #tpu.memory_space<smem>>
    %c15 = arith.constant 15 : index
    %133 = memref.load %arg1[%c15] : memref<98xf32, #tpu.memory_space<smem>>
    %c16 = arith.constant 16 : index
    %134 = memref.load %arg1[%c16] : memref<98xf32, #tpu.memory_space<smem>>
    %c17 = arith.constant 17 : index
    %135 = memref.load %arg1[%c17] : memref<98xf32, #tpu.memory_space<smem>>
    %c18 = arith.constant 18 : index
    %136 = memref.load %arg1[%c18] : memref<98xf32, #tpu.memory_space<smem>>
    %c19 = arith.constant 19 : index
    %137 = memref.load %arg1[%c19] : memref<98xf32, #tpu.memory_space<smem>>
    %c20 = arith.constant 20 : index
    %138 = memref.load %arg1[%c20] : memref<98xf32, #tpu.memory_space<smem>>
    %c21 = arith.constant 21 : index
    %139 = memref.load %arg1[%c21] : memref<98xf32, #tpu.memory_space<smem>>
    %c22 = arith.constant 22 : index
    %140 = memref.load %arg1[%c22] : memref<98xf32, #tpu.memory_space<smem>>
    %c23 = arith.constant 23 : index
    %141 = memref.load %arg1[%c23] : memref<98xf32, #tpu.memory_space<smem>>
    %c24 = arith.constant 24 : index
    %142 = memref.load %arg1[%c24] : memref<98xf32, #tpu.memory_space<smem>>
    %c25 = arith.constant 25 : index
    %143 = memref.load %arg1[%c25] : memref<98xf32, #tpu.memory_space<smem>>
    %c26 = arith.constant 26 : index
    %144 = memref.load %arg1[%c26] : memref<98xf32, #tpu.memory_space<smem>>
    %c27 = arith.constant 27 : index
    %145 = memref.load %arg1[%c27] : memref<98xf32, #tpu.memory_space<smem>>
    %c28 = arith.constant 28 : index
    %146 = memref.load %arg1[%c28] : memref<98xf32, #tpu.memory_space<smem>>
    %c29 = arith.constant 29 : index
    %147 = memref.load %arg1[%c29] : memref<98xf32, #tpu.memory_space<smem>>
    %c30 = arith.constant 30 : index
    %148 = memref.load %arg1[%c30] : memref<98xf32, #tpu.memory_space<smem>>
    %c31 = arith.constant 31 : index
    %149 = memref.load %arg1[%c31] : memref<98xf32, #tpu.memory_space<smem>>
    %c32 = arith.constant 32 : index
    %150 = memref.load %arg1[%c32] : memref<98xf32, #tpu.memory_space<smem>>
    %c33 = arith.constant 33 : index
    %151 = memref.load %arg1[%c33] : memref<98xf32, #tpu.memory_space<smem>>
    %c34 = arith.constant 34 : index
    %152 = memref.load %arg1[%c34] : memref<98xf32, #tpu.memory_space<smem>>
    %c35 = arith.constant 35 : index
    %153 = memref.load %arg1[%c35] : memref<98xf32, #tpu.memory_space<smem>>
    %c36 = arith.constant 36 : index
    %154 = memref.load %arg1[%c36] : memref<98xf32, #tpu.memory_space<smem>>
    %c37 = arith.constant 37 : index
    %155 = memref.load %arg1[%c37] : memref<98xf32, #tpu.memory_space<smem>>
    %c38 = arith.constant 38 : index
    %156 = memref.load %arg1[%c38] : memref<98xf32, #tpu.memory_space<smem>>
    %c39 = arith.constant 39 : index
    %157 = memref.load %arg1[%c39] : memref<98xf32, #tpu.memory_space<smem>>
    %c40 = arith.constant 40 : index
    %158 = memref.load %arg1[%c40] : memref<98xf32, #tpu.memory_space<smem>>
    %c41 = arith.constant 41 : index
    %159 = memref.load %arg1[%c41] : memref<98xf32, #tpu.memory_space<smem>>
    %c42 = arith.constant 42 : index
    %160 = memref.load %arg1[%c42] : memref<98xf32, #tpu.memory_space<smem>>
    %c43 = arith.constant 43 : index
    %161 = memref.load %arg1[%c43] : memref<98xf32, #tpu.memory_space<smem>>
    %c44 = arith.constant 44 : index
    %162 = memref.load %arg1[%c44] : memref<98xf32, #tpu.memory_space<smem>>
    %c45 = arith.constant 45 : index
    %163 = memref.load %arg1[%c45] : memref<98xf32, #tpu.memory_space<smem>>
    %c46 = arith.constant 46 : index
    %164 = memref.load %arg1[%c46] : memref<98xf32, #tpu.memory_space<smem>>
    %c47 = arith.constant 47 : index
    %165 = memref.load %arg1[%c47] : memref<98xf32, #tpu.memory_space<smem>>
    %c48 = arith.constant 48 : index
    %166 = memref.load %arg1[%c48] : memref<98xf32, #tpu.memory_space<smem>>
    %c49 = arith.constant 49 : index
    %167 = memref.load %arg1[%c49] : memref<98xf32, #tpu.memory_space<smem>>
    %c50 = arith.constant 50 : index
    %168 = memref.load %arg1[%c50] : memref<98xf32, #tpu.memory_space<smem>>
    %c51_106 = arith.constant 51 : index
    %169 = memref.load %arg1[%c51_106] : memref<98xf32, #tpu.memory_space<smem>>
    %c52 = arith.constant 52 : index
    %170 = memref.load %arg1[%c52] : memref<98xf32, #tpu.memory_space<smem>>
    %c53 = arith.constant 53 : index
    %171 = memref.load %arg1[%c53] : memref<98xf32, #tpu.memory_space<smem>>
    %c54 = arith.constant 54 : index
    %172 = memref.load %arg1[%c54] : memref<98xf32, #tpu.memory_space<smem>>
    %c55 = arith.constant 55 : index
    %173 = memref.load %arg1[%c55] : memref<98xf32, #tpu.memory_space<smem>>
    %c56 = arith.constant 56 : index
    %174 = memref.load %arg1[%c56] : memref<98xf32, #tpu.memory_space<smem>>
    %c57 = arith.constant 57 : index
    %175 = memref.load %arg1[%c57] : memref<98xf32, #tpu.memory_space<smem>>
    %c58 = arith.constant 58 : index
    %176 = memref.load %arg1[%c58] : memref<98xf32, #tpu.memory_space<smem>>
    %c59 = arith.constant 59 : index
    %177 = memref.load %arg1[%c59] : memref<98xf32, #tpu.memory_space<smem>>
    %c60 = arith.constant 60 : index
    %178 = memref.load %arg1[%c60] : memref<98xf32, #tpu.memory_space<smem>>
    %c61 = arith.constant 61 : index
    %179 = memref.load %arg1[%c61] : memref<98xf32, #tpu.memory_space<smem>>
    %c62 = arith.constant 62 : index
    %180 = memref.load %arg1[%c62] : memref<98xf32, #tpu.memory_space<smem>>
    %c63 = arith.constant 63 : index
    %181 = memref.load %arg1[%c63] : memref<98xf32, #tpu.memory_space<smem>>
    %c64 = arith.constant 64 : index
    %182 = memref.load %arg1[%c64] : memref<98xf32, #tpu.memory_space<smem>>
    %c65 = arith.constant 65 : index
    %183 = memref.load %arg1[%c65] : memref<98xf32, #tpu.memory_space<smem>>
    %c66 = arith.constant 66 : index
    %184 = memref.load %arg1[%c66] : memref<98xf32, #tpu.memory_space<smem>>
    %c67 = arith.constant 67 : index
    %185 = memref.load %arg1[%c67] : memref<98xf32, #tpu.memory_space<smem>>
    %c68 = arith.constant 68 : index
    %186 = memref.load %arg1[%c68] : memref<98xf32, #tpu.memory_space<smem>>
    %c69 = arith.constant 69 : index
    %187 = memref.load %arg1[%c69] : memref<98xf32, #tpu.memory_space<smem>>
    %c70 = arith.constant 70 : index
    %188 = memref.load %arg1[%c70] : memref<98xf32, #tpu.memory_space<smem>>
    %c71 = arith.constant 71 : index
    %189 = memref.load %arg1[%c71] : memref<98xf32, #tpu.memory_space<smem>>
    %c72 = arith.constant 72 : index
    %190 = memref.load %arg1[%c72] : memref<98xf32, #tpu.memory_space<smem>>
    %c73 = arith.constant 73 : index
    %191 = memref.load %arg1[%c73] : memref<98xf32, #tpu.memory_space<smem>>
    %c74 = arith.constant 74 : index
    %192 = memref.load %arg1[%c74] : memref<98xf32, #tpu.memory_space<smem>>
    %c75 = arith.constant 75 : index
    %193 = memref.load %arg1[%c75] : memref<98xf32, #tpu.memory_space<smem>>
    %c76 = arith.constant 76 : index
    %194 = memref.load %arg1[%c76] : memref<98xf32, #tpu.memory_space<smem>>
    %c77 = arith.constant 77 : index
    %195 = memref.load %arg1[%c77] : memref<98xf32, #tpu.memory_space<smem>>
    %c78 = arith.constant 78 : index
    %196 = memref.load %arg1[%c78] : memref<98xf32, #tpu.memory_space<smem>>
    %c79 = arith.constant 79 : index
    %197 = memref.load %arg1[%c79] : memref<98xf32, #tpu.memory_space<smem>>
    %c80 = arith.constant 80 : index
    %198 = memref.load %arg1[%c80] : memref<98xf32, #tpu.memory_space<smem>>
    %c81 = arith.constant 81 : index
    %199 = memref.load %arg1[%c81] : memref<98xf32, #tpu.memory_space<smem>>
    %c82 = arith.constant 82 : index
    %200 = memref.load %arg1[%c82] : memref<98xf32, #tpu.memory_space<smem>>
    %c83 = arith.constant 83 : index
    %201 = memref.load %arg1[%c83] : memref<98xf32, #tpu.memory_space<smem>>
    %c84 = arith.constant 84 : index
    %202 = memref.load %arg1[%c84] : memref<98xf32, #tpu.memory_space<smem>>
    %c85 = arith.constant 85 : index
    %203 = memref.load %arg1[%c85] : memref<98xf32, #tpu.memory_space<smem>>
    %c86 = arith.constant 86 : index
    %204 = memref.load %arg1[%c86] : memref<98xf32, #tpu.memory_space<smem>>
    %c87 = arith.constant 87 : index
    %205 = memref.load %arg1[%c87] : memref<98xf32, #tpu.memory_space<smem>>
    %c88 = arith.constant 88 : index
    %206 = memref.load %arg1[%c88] : memref<98xf32, #tpu.memory_space<smem>>
    %c89 = arith.constant 89 : index
    %207 = memref.load %arg1[%c89] : memref<98xf32, #tpu.memory_space<smem>>
    %c90 = arith.constant 90 : index
    %208 = memref.load %arg1[%c90] : memref<98xf32, #tpu.memory_space<smem>>
    %c91 = arith.constant 91 : index
    %209 = memref.load %arg1[%c91] : memref<98xf32, #tpu.memory_space<smem>>
    %c92 = arith.constant 92 : index
    %210 = memref.load %arg1[%c92] : memref<98xf32, #tpu.memory_space<smem>>
    %c93 = arith.constant 93 : index
    %211 = memref.load %arg1[%c93] : memref<98xf32, #tpu.memory_space<smem>>
    %c94 = arith.constant 94 : index
    %212 = memref.load %arg1[%c94] : memref<98xf32, #tpu.memory_space<smem>>
    %c95 = arith.constant 95 : index
    %213 = memref.load %arg1[%c95] : memref<98xf32, #tpu.memory_space<smem>>
    %c96 = arith.constant 96 : index
    %214 = memref.load %arg1[%c96] : memref<98xf32, #tpu.memory_space<smem>>
    %c97 = arith.constant 97 : index
    %215 = memref.load %arg1[%c97] : memref<98xf32, #tpu.memory_space<smem>>
    %c0_107 = arith.constant 0 : index
    %216 = memref.load %arg2[%c0_107] : memref<1xf32, #tpu.memory_space<smem>>
    %217 = vector.broadcast %216 : f32 to vector<8x256xf32>
    %218 = vector.extract_strided_slice %116 {offsets = [0, 0, 0], sizes = [2, 8, 256], strides = [1, 1, 1]} : vector<2x8x358xf32> to vector<2x8x256xf32>
    %219 = vector.extract_strided_slice %218 {offsets = [0, 0, 0], sizes = [1, 8, 256], strides = [1, 1, 1]} : vector<2x8x256xf32> to vector<1x8x256xf32>
    %220 = vector.shape_cast %219 : vector<1x8x256xf32> to vector<8x256xf32>
    %221 = vector.broadcast %118 : f32 to vector<8x256xf32>
    %222 = arith.mulf %221, %220 : vector<8x256xf32>
    %223 = vector.extract_strided_slice %218 {offsets = [1, 0, 0], sizes = [1, 8, 256], strides = [1, 1, 1]} : vector<2x8x256xf32> to vector<1x8x256xf32>
    %224 = vector.shape_cast %223 : vector<1x8x256xf32> to vector<8x256xf32>
    %225 = vector.broadcast %167 : f32 to vector<8x256xf32>
    %226 = arith.mulf %225, %224 : vector<8x256xf32>
    %227 = arith.addf %222, %226 : vector<8x256xf32>
    %228 = vector.extract_strided_slice %116 {offsets = [0, 0, 16], sizes = [2, 8, 256], strides = [1, 1, 1]} : vector<2x8x358xf32> to vector<2x8x256xf32>
    %229 = vector.extract_strided_slice %228 {offsets = [0, 0, 0], sizes = [1, 8, 256], strides = [1, 1, 1]} : vector<2x8x256xf32> to vector<1x8x256xf32>
    %230 = vector.shape_cast %229 : vector<1x8x256xf32> to vector<8x256xf32>
    %231 = vector.broadcast %125 : f32 to vector<8x256xf32>
    %232 = arith.mulf %231, %230 : vector<8x256xf32>
    %233 = vector.extract_strided_slice %228 {offsets = [1, 0, 0], sizes = [1, 8, 256], strides = [1, 1, 1]} : vector<2x8x256xf32> to vector<1x8x256xf32>
    %234 = vector.shape_cast %233 : vector<1x8x256xf32> to vector<8x256xf32>
    %235 = vector.broadcast %174 : f32 to vector<8x256xf32>
    %236 = arith.mulf %235, %234 : vector<8x256xf32>
    %237 = arith.addf %232, %236 : vector<8x256xf32>
    %238 = arith.addf %227, %237 : vector<8x256xf32>
    %239 = vector.extract_strided_slice %116 {offsets = [0, 0, 32], sizes = [2, 8, 256], strides = [1, 1, 1]} : vector<2x8x358xf32> to vector<2x8x256xf32>
    %240 = vector.extract_strided_slice %239 {offsets = [0, 0, 0], sizes = [1, 8, 256], strides = [1, 1, 1]} : vector<2x8x256xf32> to vector<1x8x256xf32>
    %241 = vector.shape_cast %240 : vector<1x8x256xf32> to vector<8x256xf32>
    %242 = vector.broadcast %132 : f32 to vector<8x256xf32>
    %243 = arith.mulf %242, %241 : vector<8x256xf32>
    %244 = vector.extract_strided_slice %239 {offsets = [1, 0, 0], sizes = [1, 8, 256], strides = [1, 1, 1]} : vector<2x8x256xf32> to vector<1x8x256xf32>
    %245 = vector.shape_cast %244 : vector<1x8x256xf32> to vector<8x256xf32>
    %246 = vector.broadcast %181 : f32 to vector<8x256xf32>
    %247 = arith.mulf %246, %245 : vector<8x256xf32>
    %248 = arith.addf %243, %247 : vector<8x256xf32>
    %249 = arith.addf %238, %248 : vector<8x256xf32>
    %250 = vector.extract_strided_slice %116 {offsets = [0, 0, 48], sizes = [2, 8, 256], strides = [1, 1, 1]} : vector<2x8x358xf32> to vector<2x8x256xf32>
    %251 = vector.extract_strided_slice %250 {offsets = [0, 0, 0], sizes = [1, 8, 256], strides = [1, 1, 1]} : vector<2x8x256xf32> to vector<1x8x256xf32>
    %252 = vector.shape_cast %251 : vector<1x8x256xf32> to vector<8x256xf32>
    %253 = vector.broadcast %139 : f32 to vector<8x256xf32>
    %254 = arith.mulf %253, %252 : vector<8x256xf32>
    %255 = vector.extract_strided_slice %250 {offsets = [1, 0, 0], sizes = [1, 8, 256], strides = [1, 1, 1]} : vector<2x8x256xf32> to vector<1x8x256xf32>
    %256 = vector.shape_cast %255 : vector<1x8x256xf32> to vector<8x256xf32>
    %257 = vector.broadcast %188 : f32 to vector<8x256xf32>
    %258 = arith.mulf %257, %256 : vector<8x256xf32>
    %259 = arith.addf %254, %258 : vector<8x256xf32>
    %260 = arith.addf %249, %259 : vector<8x256xf32>
    %261 = vector.extract_strided_slice %116 {offsets = [0, 0, 64], sizes = [2, 8, 256], strides = [1, 1, 1]} : vector<2x8x358xf32> to vector<2x8x256xf32>
    %262 = vector.extract_strided_slice %261 {offsets = [0, 0, 0], sizes = [1, 8, 256], strides = [1, 1, 1]} : vector<2x8x256xf32> to vector<1x8x256xf32>
    %263 = vector.shape_cast %262 : vector<1x8x256xf32> to vector<8x256xf32>
    %264 = vector.broadcast %146 : f32 to vector<8x256xf32>
    %265 = arith.mulf %264, %263 : vector<8x256xf32>
    %266 = vector.extract_strided_slice %261 {offsets = [1, 0, 0], sizes = [1, 8, 256], strides = [1, 1, 1]} : vector<2x8x256xf32> to vector<1x8x256xf32>
    %267 = vector.shape_cast %266 : vector<1x8x256xf32> to vector<8x256xf32>
    %268 = vector.broadcast %195 : f32 to vector<8x256xf32>
    %269 = arith.mulf %268, %267 : vector<8x256xf32>
    %270 = arith.addf %265, %269 : vector<8x256xf32>
    %271 = arith.addf %260, %270 : vector<8x256xf32>
    %272 = vector.extract_strided_slice %116 {offsets = [0, 0, 80], sizes = [2, 8, 256], strides = [1, 1, 1]} : vector<2x8x358xf32> to vector<2x8x256xf32>
    %273 = vector.extract_strided_slice %272 {offsets = [0, 0, 0], sizes = [1, 8, 256], strides = [1, 1, 1]} : vector<2x8x256xf32> to vector<1x8x256xf32>
    %274 = vector.shape_cast %273 : vector<1x8x256xf32> to vector<8x256xf32>
    %275 = vector.broadcast %153 : f32 to vector<8x256xf32>
    %276 = arith.mulf %275, %274 : vector<8x256xf32>
    %277 = vector.extract_strided_slice %272 {offsets = [1, 0, 0], sizes = [1, 8, 256], strides = [1, 1, 1]} : vector<2x8x256xf32> to vector<1x8x256xf32>
    %278 = vector.shape_cast %277 : vector<1x8x256xf32> to vector<8x256xf32>
    %279 = vector.broadcast %202 : f32 to vector<8x256xf32>
    %280 = arith.mulf %279, %278 : vector<8x256xf32>
    %281 = arith.addf %276, %280 : vector<8x256xf32>
    %282 = arith.addf %271, %281 : vector<8x256xf32>
    %283 = vector.extract_strided_slice %116 {offsets = [0, 0, 96], sizes = [2, 8, 256], strides = [1, 1, 1]} : vector<2x8x358xf32> to vector<2x8x256xf32>
    %284 = vector.extract_strided_slice %283 {offsets = [0, 0, 0], sizes = [1, 8, 256], strides = [1, 1, 1]} : vector<2x8x256xf32> to vector<1x8x256xf32>
    %285 = vector.shape_cast %284 : vector<1x8x256xf32> to vector<8x256xf32>
    %286 = vector.broadcast %160 : f32 to vector<8x256xf32>
    %287 = arith.mulf %286, %285 : vector<8x256xf32>
    %288 = vector.extract_strided_slice %283 {offsets = [1, 0, 0], sizes = [1, 8, 256], strides = [1, 1, 1]} : vector<2x8x256xf32> to vector<1x8x256xf32>
    %289 = vector.shape_cast %288 : vector<1x8x256xf32> to vector<8x256xf32>
    %290 = vector.broadcast %209 : f32 to vector<8x256xf32>
    %291 = arith.mulf %290, %289 : vector<8x256xf32>
    %292 = arith.addf %287, %291 : vector<8x256xf32>
    %293 = arith.addf %282, %292 : vector<8x256xf32>
    %294 = vector.extract_strided_slice %117 {offsets = [0, 0], sizes = [1, 256], strides = [1, 1]} : vector<7x256xf32> to vector<1x256xf32>
    %295 = vector.broadcast %294 : vector<1x256xf32> to vector<8x256xf32>
    %296 = arith.mulf %293, %295 : vector<8x256xf32>
    %297 = arith.addf %217, %296 : vector<8x256xf32>
    %298 = vector.extract_strided_slice %116 {offsets = [0, 0, 1], sizes = [2, 8, 256], strides = [1, 1, 1]} : vector<2x8x358xf32> to vector<2x8x256xf32>
    %299 = vector.extract_strided_slice %298 {offsets = [0, 0, 0], sizes = [1, 8, 256], strides = [1, 1, 1]} : vector<2x8x256xf32> to vector<1x8x256xf32>
    %300 = vector.shape_cast %299 : vector<1x8x256xf32> to vector<8x256xf32>
    %301 = vector.broadcast %119 : f32 to vector<8x256xf32>
    %302 = arith.mulf %301, %300 : vector<8x256xf32>
    %303 = vector.extract_strided_slice %298 {offsets = [1, 0, 0], sizes = [1, 8, 256], strides = [1, 1, 1]} : vector<2x8x256xf32> to vector<1x8x256xf32>
    %304 = vector.shape_cast %303 : vector<1x8x256xf32> to vector<8x256xf32>
    %305 = vector.broadcast %168 : f32 to vector<8x256xf32>
    %306 = arith.mulf %305, %304 : vector<8x256xf32>
    %307 = arith.addf %302, %306 : vector<8x256xf32>
    %308 = vector.extract_strided_slice %116 {offsets = [0, 0, 17], sizes = [2, 8, 256], strides = [1, 1, 1]} : vector<2x8x358xf32> to vector<2x8x256xf32>
    %309 = vector.extract_strided_slice %308 {offsets = [0, 0, 0], sizes = [1, 8, 256], strides = [1, 1, 1]} : vector<2x8x256xf32> to vector<1x8x256xf32>
    %310 = vector.shape_cast %309 : vector<1x8x256xf32> to vector<8x256xf32>
    %311 = vector.broadcast %126 : f32 to vector<8x256xf32>
    %312 = arith.mulf %311, %310 : vector<8x256xf32>
    %313 = vector.extract_strided_slice %308 {offsets = [1, 0, 0], sizes = [1, 8, 256], strides = [1, 1, 1]} : vector<2x8x256xf32> to vector<1x8x256xf32>
    %314 = vector.shape_cast %313 : vector<1x8x256xf32> to vector<8x256xf32>
    %315 = vector.broadcast %175 : f32 to vector<8x256xf32>
    %316 = arith.mulf %315, %314 : vector<8x256xf32>
    %317 = arith.addf %312, %316 : vector<8x256xf32>
    %318 = arith.addf %307, %317 : vector<8x256xf32>
    %319 = vector.extract_strided_slice %116 {offsets = [0, 0, 33], sizes = [2, 8, 256], strides = [1, 1, 1]} : vector<2x8x358xf32> to vector<2x8x256xf32>
    %320 = vector.extract_strided_slice %319 {offsets = [0, 0, 0], sizes = [1, 8, 256], strides = [1, 1, 1]} : vector<2x8x256xf32> to vector<1x8x256xf32>
    %321 = vector.shape_cast %320 : vector<1x8x256xf32> to vector<8x256xf32>
    %322 = vector.broadcast %133 : f32 to vector<8x256xf32>
    %323 = arith.mulf %322, %321 : vector<8x256xf32>
    %324 = vector.extract_strided_slice %319 {offsets = [1, 0, 0], sizes = [1, 8, 256], strides = [1, 1, 1]} : vector<2x8x256xf32> to vector<1x8x256xf32>
    %325 = vector.shape_cast %324 : vector<1x8x256xf32> to vector<8x256xf32>
    %326 = vector.broadcast %182 : f32 to vector<8x256xf32>
    %327 = arith.mulf %326, %325 : vector<8x256xf32>
    %328 = arith.addf %323, %327 : vector<8x256xf32>
    %329 = arith.addf %318, %328 : vector<8x256xf32>
    %330 = vector.extract_strided_slice %116 {offsets = [0, 0, 49], sizes = [2, 8, 256], strides = [1, 1, 1]} : vector<2x8x358xf32> to vector<2x8x256xf32>
    %331 = vector.extract_strided_slice %330 {offsets = [0, 0, 0], sizes = [1, 8, 256], strides = [1, 1, 1]} : vector<2x8x256xf32> to vector<1x8x256xf32>
    %332 = vector.shape_cast %331 : vector<1x8x256xf32> to vector<8x256xf32>
    %333 = vector.broadcast %140 : f32 to vector<8x256xf32>
    %334 = arith.mulf %333, %332 : vector<8x256xf32>
    %335 = vector.extract_strided_slice %330 {offsets = [1, 0, 0], sizes = [1, 8, 256], strides = [1, 1, 1]} : vector<2x8x256xf32> to vector<1x8x256xf32>
    %336 = vector.shape_cast %335 : vector<1x8x256xf32> to vector<8x256xf32>
    %337 = vector.broadcast %189 : f32 to vector<8x256xf32>
    %338 = arith.mulf %337, %336 : vector<8x256xf32>
    %339 = arith.addf %334, %338 : vector<8x256xf32>
    %340 = arith.addf %329, %339 : vector<8x256xf32>
    %341 = vector.extract_strided_slice %116 {offsets = [0, 0, 65], sizes = [2, 8, 256], strides = [1, 1, 1]} : vector<2x8x358xf32> to vector<2x8x256xf32>
    %342 = vector.extract_strided_slice %341 {offsets = [0, 0, 0], sizes = [1, 8, 256], strides = [1, 1, 1]} : vector<2x8x256xf32> to vector<1x8x256xf32>
    %343 = vector.shape_cast %342 : vector<1x8x256xf32> to vector<8x256xf32>
    %344 = vector.broadcast %147 : f32 to vector<8x256xf32>
    %345 = arith.mulf %344, %343 : vector<8x256xf32>
    %346 = vector.extract_strided_slice %341 {offsets = [1, 0, 0], sizes = [1, 8, 256], strides = [1, 1, 1]} : vector<2x8x256xf32> to vector<1x8x256xf32>
    %347 = vector.shape_cast %346 : vector<1x8x256xf32> to vector<8x256xf32>
    %348 = vector.broadcast %196 : f32 to vector<8x256xf32>
    %349 = arith.mulf %348, %347 : vector<8x256xf32>
    %350 = arith.addf %345, %349 : vector<8x256xf32>
    %351 = arith.addf %340, %350 : vector<8x256xf32>
    %352 = vector.extract_strided_slice %116 {offsets = [0, 0, 81], sizes = [2, 8, 256], strides = [1, 1, 1]} : vector<2x8x358xf32> to vector<2x8x256xf32>
    %353 = vector.extract_strided_slice %352 {offsets = [0, 0, 0], sizes = [1, 8, 256], strides = [1, 1, 1]} : vector<2x8x256xf32> to vector<1x8x256xf32>
    %354 = vector.shape_cast %353 : vector<1x8x256xf32> to vector<8x256xf32>
    %355 = vector.broadcast %154 : f32 to vector<8x256xf32>
    %356 = arith.mulf %355, %354 : vector<8x256xf32>
    %357 = vector.extract_strided_slice %352 {offsets = [1, 0, 0], sizes = [1, 8, 256], strides = [1, 1, 1]} : vector<2x8x256xf32> to vector<1x8x256xf32>
    %358 = vector.shape_cast %357 : vector<1x8x256xf32> to vector<8x256xf32>
    %359 = vector.broadcast %203 : f32 to vector<8x256xf32>
    %360 = arith.mulf %359, %358 : vector<8x256xf32>
    %361 = arith.addf %356, %360 : vector<8x256xf32>
    %362 = arith.addf %351, %361 : vector<8x256xf32>
    %363 = vector.extract_strided_slice %116 {offsets = [0, 0, 97], sizes = [2, 8, 256], strides = [1, 1, 1]} : vector<2x8x358xf32> to vector<2x8x256xf32>
    %364 = vector.extract_strided_slice %363 {offsets = [0, 0, 0], sizes = [1, 8, 256], strides = [1, 1, 1]} : vector<2x8x256xf32> to vector<1x8x256xf32>
    %365 = vector.shape_cast %364 : vector<1x8x256xf32> to vector<8x256xf32>
    %366 = vector.broadcast %161 : f32 to vector<8x256xf32>
    %367 = arith.mulf %366, %365 : vector<8x256xf32>
    %368 = vector.extract_strided_slice %363 {offsets = [1, 0, 0], sizes = [1, 8, 256], strides = [1, 1, 1]} : vector<2x8x256xf32> to vector<1x8x256xf32>
    %369 = vector.shape_cast %368 : vector<1x8x256xf32> to vector<8x256xf32>
    %370 = vector.broadcast %210 : f32 to vector<8x256xf32>
    %371 = arith.mulf %370, %369 : vector<8x256xf32>
    %372 = arith.addf %367, %371 : vector<8x256xf32>
    %373 = arith.addf %362, %372 : vector<8x256xf32>
    %374 = vector.extract_strided_slice %117 {offsets = [1, 0], sizes = [1, 256], strides = [1, 1]} : vector<7x256xf32> to vector<1x256xf32>
    %375 = vector.broadcast %374 : vector<1x256xf32> to vector<8x256xf32>
    %376 = arith.mulf %373, %375 : vector<8x256xf32>
    %377 = arith.addf %297, %376 : vector<8x256xf32>
    %378 = vector.extract_strided_slice %116 {offsets = [0, 0, 2], sizes = [2, 8, 256], strides = [1, 1, 1]} : vector<2x8x358xf32> to vector<2x8x256xf32>
    %379 = vector.extract_strided_slice %378 {offsets = [0, 0, 0], sizes = [1, 8, 256], strides = [1, 1, 1]} : vector<2x8x256xf32> to vector<1x8x256xf32>
    %380 = vector.shape_cast %379 : vector<1x8x256xf32> to vector<8x256xf32>
    %381 = vector.broadcast %120 : f32 to vector<8x256xf32>
    %382 = arith.mulf %381, %380 : vector<8x256xf32>
    %383 = vector.extract_strided_slice %378 {offsets = [1, 0, 0], sizes = [1, 8, 256], strides = [1, 1, 1]} : vector<2x8x256xf32> to vector<1x8x256xf32>
    %384 = vector.shape_cast %383 : vector<1x8x256xf32> to vector<8x256xf32>
    %385 = vector.broadcast %169 : f32 to vector<8x256xf32>
    %386 = arith.mulf %385, %384 : vector<8x256xf32>
    %387 = arith.addf %382, %386 : vector<8x256xf32>
    %388 = vector.extract_strided_slice %116 {offsets = [0, 0, 18], sizes = [2, 8, 256], strides = [1, 1, 1]} : vector<2x8x358xf32> to vector<2x8x256xf32>
    %389 = vector.extract_strided_slice %388 {offsets = [0, 0, 0], sizes = [1, 8, 256], strides = [1, 1, 1]} : vector<2x8x256xf32> to vector<1x8x256xf32>
    %390 = vector.shape_cast %389 : vector<1x8x256xf32> to vector<8x256xf32>
    %391 = vector.broadcast %127 : f32 to vector<8x256xf32>
    %392 = arith.mulf %391, %390 : vector<8x256xf32>
    %393 = vector.extract_strided_slice %388 {offsets = [1, 0, 0], sizes = [1, 8, 256], strides = [1, 1, 1]} : vector<2x8x256xf32> to vector<1x8x256xf32>
    %394 = vector.shape_cast %393 : vector<1x8x256xf32> to vector<8x256xf32>
    %395 = vector.broadcast %176 : f32 to vector<8x256xf32>
    %396 = arith.mulf %395, %394 : vector<8x256xf32>
    %397 = arith.addf %392, %396 : vector<8x256xf32>
    %398 = arith.addf %387, %397 : vector<8x256xf32>
    %399 = vector.extract_strided_slice %116 {offsets = [0, 0, 34], sizes = [2, 8, 256], strides = [1, 1, 1]} : vector<2x8x358xf32> to vector<2x8x256xf32>
    %400 = vector.extract_strided_slice %399 {offsets = [0, 0, 0], sizes = [1, 8, 256], strides = [1, 1, 1]} : vector<2x8x256xf32> to vector<1x8x256xf32>
    %401 = vector.shape_cast %400 : vector<1x8x256xf32> to vector<8x256xf32>
    %402 = vector.broadcast %134 : f32 to vector<8x256xf32>
    %403 = arith.mulf %402, %401 : vector<8x256xf32>
    %404 = vector.extract_strided_slice %399 {offsets = [1, 0, 0], sizes = [1, 8, 256], strides = [1, 1, 1]} : vector<2x8x256xf32> to vector<1x8x256xf32>
    %405 = vector.shape_cast %404 : vector<1x8x256xf32> to vector<8x256xf32>
    %406 = vector.broadcast %183 : f32 to vector<8x256xf32>
    %407 = arith.mulf %406, %405 : vector<8x256xf32>
    %408 = arith.addf %403, %407 : vector<8x256xf32>
    %409 = arith.addf %398, %408 : vector<8x256xf32>
    %410 = vector.extract_strided_slice %116 {offsets = [0, 0, 50], sizes = [2, 8, 256], strides = [1, 1, 1]} : vector<2x8x358xf32> to vector<2x8x256xf32>
    %411 = vector.extract_strided_slice %410 {offsets = [0, 0, 0], sizes = [1, 8, 256], strides = [1, 1, 1]} : vector<2x8x256xf32> to vector<1x8x256xf32>
    %412 = vector.shape_cast %411 : vector<1x8x256xf32> to vector<8x256xf32>
    %413 = vector.broadcast %141 : f32 to vector<8x256xf32>
    %414 = arith.mulf %413, %412 : vector<8x256xf32>
    %415 = vector.extract_strided_slice %410 {offsets = [1, 0, 0], sizes = [1, 8, 256], strides = [1, 1, 1]} : vector<2x8x256xf32> to vector<1x8x256xf32>
    %416 = vector.shape_cast %415 : vector<1x8x256xf32> to vector<8x256xf32>
    %417 = vector.broadcast %190 : f32 to vector<8x256xf32>
    %418 = arith.mulf %417, %416 : vector<8x256xf32>
    %419 = arith.addf %414, %418 : vector<8x256xf32>
    %420 = arith.addf %409, %419 : vector<8x256xf32>
    %421 = vector.extract_strided_slice %116 {offsets = [0, 0, 66], sizes = [2, 8, 256], strides = [1, 1, 1]} : vector<2x8x358xf32> to vector<2x8x256xf32>
    %422 = vector.extract_strided_slice %421 {offsets = [0, 0, 0], sizes = [1, 8, 256], strides = [1, 1, 1]} : vector<2x8x256xf32> to vector<1x8x256xf32>
    %423 = vector.shape_cast %422 : vector<1x8x256xf32> to vector<8x256xf32>
    %424 = vector.broadcast %148 : f32 to vector<8x256xf32>
    %425 = arith.mulf %424, %423 : vector<8x256xf32>
    %426 = vector.extract_strided_slice %421 {offsets = [1, 0, 0], sizes = [1, 8, 256], strides = [1, 1, 1]} : vector<2x8x256xf32> to vector<1x8x256xf32>
    %427 = vector.shape_cast %426 : vector<1x8x256xf32> to vector<8x256xf32>
    %428 = vector.broadcast %197 : f32 to vector<8x256xf32>
    %429 = arith.mulf %428, %427 : vector<8x256xf32>
    %430 = arith.addf %425, %429 : vector<8x256xf32>
    %431 = arith.addf %420, %430 : vector<8x256xf32>
    %432 = vector.extract_strided_slice %116 {offsets = [0, 0, 82], sizes = [2, 8, 256], strides = [1, 1, 1]} : vector<2x8x358xf32> to vector<2x8x256xf32>
    %433 = vector.extract_strided_slice %432 {offsets = [0, 0, 0], sizes = [1, 8, 256], strides = [1, 1, 1]} : vector<2x8x256xf32> to vector<1x8x256xf32>
    %434 = vector.shape_cast %433 : vector<1x8x256xf32> to vector<8x256xf32>
    %435 = vector.broadcast %155 : f32 to vector<8x256xf32>
    %436 = arith.mulf %435, %434 : vector<8x256xf32>
    %437 = vector.extract_strided_slice %432 {offsets = [1, 0, 0], sizes = [1, 8, 256], strides = [1, 1, 1]} : vector<2x8x256xf32> to vector<1x8x256xf32>
    %438 = vector.shape_cast %437 : vector<1x8x256xf32> to vector<8x256xf32>
    %439 = vector.broadcast %204 : f32 to vector<8x256xf32>
    %440 = arith.mulf %439, %438 : vector<8x256xf32>
    %441 = arith.addf %436, %440 : vector<8x256xf32>
    %442 = arith.addf %431, %441 : vector<8x256xf32>
    %443 = vector.extract_strided_slice %116 {offsets = [0, 0, 98], sizes = [2, 8, 256], strides = [1, 1, 1]} : vector<2x8x358xf32> to vector<2x8x256xf32>
    %444 = vector.extract_strided_slice %443 {offsets = [0, 0, 0], sizes = [1, 8, 256], strides = [1, 1, 1]} : vector<2x8x256xf32> to vector<1x8x256xf32>
    %445 = vector.shape_cast %444 : vector<1x8x256xf32> to vector<8x256xf32>
    %446 = vector.broadcast %162 : f32 to vector<8x256xf32>
    %447 = arith.mulf %446, %445 : vector<8x256xf32>
    %448 = vector.extract_strided_slice %443 {offsets = [1, 0, 0], sizes = [1, 8, 256], strides = [1, 1, 1]} : vector<2x8x256xf32> to vector<1x8x256xf32>
    %449 = vector.shape_cast %448 : vector<1x8x256xf32> to vector<8x256xf32>
    %450 = vector.broadcast %211 : f32 to vector<8x256xf32>
    %451 = arith.mulf %450, %449 : vector<8x256xf32>
    %452 = arith.addf %447, %451 : vector<8x256xf32>
    %453 = arith.addf %442, %452 : vector<8x256xf32>
    %454 = vector.extract_strided_slice %117 {offsets = [2, 0], sizes = [1, 256], strides = [1, 1]} : vector<7x256xf32> to vector<1x256xf32>
    %455 = vector.broadcast %454 : vector<1x256xf32> to vector<8x256xf32>
    %456 = arith.mulf %453, %455 : vector<8x256xf32>
    %457 = arith.addf %377, %456 : vector<8x256xf32>
    %458 = vector.extract_strided_slice %116 {offsets = [0, 0, 3], sizes = [2, 8, 256], strides = [1, 1, 1]} : vector<2x8x358xf32> to vector<2x8x256xf32>
    %459 = vector.extract_strided_slice %458 {offsets = [0, 0, 0], sizes = [1, 8, 256], strides = [1, 1, 1]} : vector<2x8x256xf32> to vector<1x8x256xf32>
    %460 = vector.shape_cast %459 : vector<1x8x256xf32> to vector<8x256xf32>
    %461 = vector.broadcast %121 : f32 to vector<8x256xf32>
    %462 = arith.mulf %461, %460 : vector<8x256xf32>
    %463 = vector.extract_strided_slice %458 {offsets = [1, 0, 0], sizes = [1, 8, 256], strides = [1, 1, 1]} : vector<2x8x256xf32> to vector<1x8x256xf32>
    %464 = vector.shape_cast %463 : vector<1x8x256xf32> to vector<8x256xf32>
    %465 = vector.broadcast %170 : f32 to vector<8x256xf32>
    %466 = arith.mulf %465, %464 : vector<8x256xf32>
    %467 = arith.addf %462, %466 : vector<8x256xf32>
    %468 = vector.extract_strided_slice %116 {offsets = [0, 0, 19], sizes = [2, 8, 256], strides = [1, 1, 1]} : vector<2x8x358xf32> to vector<2x8x256xf32>
    %469 = vector.extract_strided_slice %468 {offsets = [0, 0, 0], sizes = [1, 8, 256], strides = [1, 1, 1]} : vector<2x8x256xf32> to vector<1x8x256xf32>
    %470 = vector.shape_cast %469 : vector<1x8x256xf32> to vector<8x256xf32>
    %471 = vector.broadcast %128 : f32 to vector<8x256xf32>
    %472 = arith.mulf %471, %470 : vector<8x256xf32>
    %473 = vector.extract_strided_slice %468 {offsets = [1, 0, 0], sizes = [1, 8, 256], strides = [1, 1, 1]} : vector<2x8x256xf32> to vector<1x8x256xf32>
    %474 = vector.shape_cast %473 : vector<1x8x256xf32> to vector<8x256xf32>
    %475 = vector.broadcast %177 : f32 to vector<8x256xf32>
    %476 = arith.mulf %475, %474 : vector<8x256xf32>
    %477 = arith.addf %472, %476 : vector<8x256xf32>
    %478 = arith.addf %467, %477 : vector<8x256xf32>
    %479 = vector.extract_strided_slice %116 {offsets = [0, 0, 35], sizes = [2, 8, 256], strides = [1, 1, 1]} : vector<2x8x358xf32> to vector<2x8x256xf32>
    %480 = vector.extract_strided_slice %479 {offsets = [0, 0, 0], sizes = [1, 8, 256], strides = [1, 1, 1]} : vector<2x8x256xf32> to vector<1x8x256xf32>
    %481 = vector.shape_cast %480 : vector<1x8x256xf32> to vector<8x256xf32>
    %482 = vector.broadcast %135 : f32 to vector<8x256xf32>
    %483 = arith.mulf %482, %481 : vector<8x256xf32>
    %484 = vector.extract_strided_slice %479 {offsets = [1, 0, 0], sizes = [1, 8, 256], strides = [1, 1, 1]} : vector<2x8x256xf32> to vector<1x8x256xf32>
    %485 = vector.shape_cast %484 : vector<1x8x256xf32> to vector<8x256xf32>
    %486 = vector.broadcast %184 : f32 to vector<8x256xf32>
    %487 = arith.mulf %486, %485 : vector<8x256xf32>
    %488 = arith.addf %483, %487 : vector<8x256xf32>
    %489 = arith.addf %478, %488 : vector<8x256xf32>
    %490 = vector.extract_strided_slice %116 {offsets = [0, 0, 51], sizes = [2, 8, 256], strides = [1, 1, 1]} : vector<2x8x358xf32> to vector<2x8x256xf32>
    %491 = vector.extract_strided_slice %490 {offsets = [0, 0, 0], sizes = [1, 8, 256], strides = [1, 1, 1]} : vector<2x8x256xf32> to vector<1x8x256xf32>
    %492 = vector.shape_cast %491 : vector<1x8x256xf32> to vector<8x256xf32>
    %493 = vector.broadcast %142 : f32 to vector<8x256xf32>
    %494 = arith.mulf %493, %492 : vector<8x256xf32>
    %495 = vector.extract_strided_slice %490 {offsets = [1, 0, 0], sizes = [1, 8, 256], strides = [1, 1, 1]} : vector<2x8x256xf32> to vector<1x8x256xf32>
    %496 = vector.shape_cast %495 : vector<1x8x256xf32> to vector<8x256xf32>
    %497 = vector.broadcast %191 : f32 to vector<8x256xf32>
    %498 = arith.mulf %497, %496 : vector<8x256xf32>
    %499 = arith.addf %494, %498 : vector<8x256xf32>
    %500 = arith.addf %489, %499 : vector<8x256xf32>
    %501 = vector.extract_strided_slice %116 {offsets = [0, 0, 67], sizes = [2, 8, 256], strides = [1, 1, 1]} : vector<2x8x358xf32> to vector<2x8x256xf32>
    %502 = vector.extract_strided_slice %501 {offsets = [0, 0, 0], sizes = [1, 8, 256], strides = [1, 1, 1]} : vector<2x8x256xf32> to vector<1x8x256xf32>
    %503 = vector.shape_cast %502 : vector<1x8x256xf32> to vector<8x256xf32>
    %504 = vector.broadcast %149 : f32 to vector<8x256xf32>
    %505 = arith.mulf %504, %503 : vector<8x256xf32>
    %506 = vector.extract_strided_slice %501 {offsets = [1, 0, 0], sizes = [1, 8, 256], strides = [1, 1, 1]} : vector<2x8x256xf32> to vector<1x8x256xf32>
    %507 = vector.shape_cast %506 : vector<1x8x256xf32> to vector<8x256xf32>
    %508 = vector.broadcast %198 : f32 to vector<8x256xf32>
    %509 = arith.mulf %508, %507 : vector<8x256xf32>
    %510 = arith.addf %505, %509 : vector<8x256xf32>
    %511 = arith.addf %500, %510 : vector<8x256xf32>
    %512 = vector.extract_strided_slice %116 {offsets = [0, 0, 83], sizes = [2, 8, 256], strides = [1, 1, 1]} : vector<2x8x358xf32> to vector<2x8x256xf32>
    %513 = vector.extract_strided_slice %512 {offsets = [0, 0, 0], sizes = [1, 8, 256], strides = [1, 1, 1]} : vector<2x8x256xf32> to vector<1x8x256xf32>
    %514 = vector.shape_cast %513 : vector<1x8x256xf32> to vector<8x256xf32>
    %515 = vector.broadcast %156 : f32 to vector<8x256xf32>
    %516 = arith.mulf %515, %514 : vector<8x256xf32>
    %517 = vector.extract_strided_slice %512 {offsets = [1, 0, 0], sizes = [1, 8, 256], strides = [1, 1, 1]} : vector<2x8x256xf32> to vector<1x8x256xf32>
    %518 = vector.shape_cast %517 : vector<1x8x256xf32> to vector<8x256xf32>
    %519 = vector.broadcast %205 : f32 to vector<8x256xf32>
    %520 = arith.mulf %519, %518 : vector<8x256xf32>
    %521 = arith.addf %516, %520 : vector<8x256xf32>
    %522 = arith.addf %511, %521 : vector<8x256xf32>
    %523 = vector.extract_strided_slice %116 {offsets = [0, 0, 99], sizes = [2, 8, 256], strides = [1, 1, 1]} : vector<2x8x358xf32> to vector<2x8x256xf32>
    %524 = vector.extract_strided_slice %523 {offsets = [0, 0, 0], sizes = [1, 8, 256], strides = [1, 1, 1]} : vector<2x8x256xf32> to vector<1x8x256xf32>
    %525 = vector.shape_cast %524 : vector<1x8x256xf32> to vector<8x256xf32>
    %526 = vector.broadcast %163 : f32 to vector<8x256xf32>
    %527 = arith.mulf %526, %525 : vector<8x256xf32>
    %528 = vector.extract_strided_slice %523 {offsets = [1, 0, 0], sizes = [1, 8, 256], strides = [1, 1, 1]} : vector<2x8x256xf32> to vector<1x8x256xf32>
    %529 = vector.shape_cast %528 : vector<1x8x256xf32> to vector<8x256xf32>
    %530 = vector.broadcast %212 : f32 to vector<8x256xf32>
    %531 = arith.mulf %530, %529 : vector<8x256xf32>
    %532 = arith.addf %527, %531 : vector<8x256xf32>
    %533 = arith.addf %522, %532 : vector<8x256xf32>
    %534 = vector.extract_strided_slice %117 {offsets = [3, 0], sizes = [1, 256], strides = [1, 1]} : vector<7x256xf32> to vector<1x256xf32>
    %535 = vector.broadcast %534 : vector<1x256xf32> to vector<8x256xf32>
    %536 = arith.mulf %533, %535 : vector<8x256xf32>
    %537 = arith.addf %457, %536 : vector<8x256xf32>
    %538 = vector.extract_strided_slice %116 {offsets = [0, 0, 4], sizes = [2, 8, 256], strides = [1, 1, 1]} : vector<2x8x358xf32> to vector<2x8x256xf32>
    %539 = vector.extract_strided_slice %538 {offsets = [0, 0, 0], sizes = [1, 8, 256], strides = [1, 1, 1]} : vector<2x8x256xf32> to vector<1x8x256xf32>
    %540 = vector.shape_cast %539 : vector<1x8x256xf32> to vector<8x256xf32>
    %541 = vector.broadcast %122 : f32 to vector<8x256xf32>
    %542 = arith.mulf %541, %540 : vector<8x256xf32>
    %543 = vector.extract_strided_slice %538 {offsets = [1, 0, 0], sizes = [1, 8, 256], strides = [1, 1, 1]} : vector<2x8x256xf32> to vector<1x8x256xf32>
    %544 = vector.shape_cast %543 : vector<1x8x256xf32> to vector<8x256xf32>
    %545 = vector.broadcast %171 : f32 to vector<8x256xf32>
    %546 = arith.mulf %545, %544 : vector<8x256xf32>
    %547 = arith.addf %542, %546 : vector<8x256xf32>
    %548 = vector.extract_strided_slice %116 {offsets = [0, 0, 20], sizes = [2, 8, 256], strides = [1, 1, 1]} : vector<2x8x358xf32> to vector<2x8x256xf32>
    %549 = vector.extract_strided_slice %548 {offsets = [0, 0, 0], sizes = [1, 8, 256], strides = [1, 1, 1]} : vector<2x8x256xf32> to vector<1x8x256xf32>
    %550 = vector.shape_cast %549 : vector<1x8x256xf32> to vector<8x256xf32>
    %551 = vector.broadcast %129 : f32 to vector<8x256xf32>
    %552 = arith.mulf %551, %550 : vector<8x256xf32>
    %553 = vector.extract_strided_slice %548 {offsets = [1, 0, 0], sizes = [1, 8, 256], strides = [1, 1, 1]} : vector<2x8x256xf32> to vector<1x8x256xf32>
    %554 = vector.shape_cast %553 : vector<1x8x256xf32> to vector<8x256xf32>
    %555 = vector.broadcast %178 : f32 to vector<8x256xf32>
    %556 = arith.mulf %555, %554 : vector<8x256xf32>
    %557 = arith.addf %552, %556 : vector<8x256xf32>
    %558 = arith.addf %547, %557 : vector<8x256xf32>
    %559 = vector.extract_strided_slice %116 {offsets = [0, 0, 36], sizes = [2, 8, 256], strides = [1, 1, 1]} : vector<2x8x358xf32> to vector<2x8x256xf32>
    %560 = vector.extract_strided_slice %559 {offsets = [0, 0, 0], sizes = [1, 8, 256], strides = [1, 1, 1]} : vector<2x8x256xf32> to vector<1x8x256xf32>
    %561 = vector.shape_cast %560 : vector<1x8x256xf32> to vector<8x256xf32>
    %562 = vector.broadcast %136 : f32 to vector<8x256xf32>
    %563 = arith.mulf %562, %561 : vector<8x256xf32>
    %564 = vector.extract_strided_slice %559 {offsets = [1, 0, 0], sizes = [1, 8, 256], strides = [1, 1, 1]} : vector<2x8x256xf32> to vector<1x8x256xf32>
    %565 = vector.shape_cast %564 : vector<1x8x256xf32> to vector<8x256xf32>
    %566 = vector.broadcast %185 : f32 to vector<8x256xf32>
    %567 = arith.mulf %566, %565 : vector<8x256xf32>
    %568 = arith.addf %563, %567 : vector<8x256xf32>
    %569 = arith.addf %558, %568 : vector<8x256xf32>
    %570 = vector.extract_strided_slice %116 {offsets = [0, 0, 52], sizes = [2, 8, 256], strides = [1, 1, 1]} : vector<2x8x358xf32> to vector<2x8x256xf32>
    %571 = vector.extract_strided_slice %570 {offsets = [0, 0, 0], sizes = [1, 8, 256], strides = [1, 1, 1]} : vector<2x8x256xf32> to vector<1x8x256xf32>
    %572 = vector.shape_cast %571 : vector<1x8x256xf32> to vector<8x256xf32>
    %573 = vector.broadcast %143 : f32 to vector<8x256xf32>
    %574 = arith.mulf %573, %572 : vector<8x256xf32>
    %575 = vector.extract_strided_slice %570 {offsets = [1, 0, 0], sizes = [1, 8, 256], strides = [1, 1, 1]} : vector<2x8x256xf32> to vector<1x8x256xf32>
    %576 = vector.shape_cast %575 : vector<1x8x256xf32> to vector<8x256xf32>
    %577 = vector.broadcast %192 : f32 to vector<8x256xf32>
    %578 = arith.mulf %577, %576 : vector<8x256xf32>
    %579 = arith.addf %574, %578 : vector<8x256xf32>
    %580 = arith.addf %569, %579 : vector<8x256xf32>
    %581 = vector.extract_strided_slice %116 {offsets = [0, 0, 68], sizes = [2, 8, 256], strides = [1, 1, 1]} : vector<2x8x358xf32> to vector<2x8x256xf32>
    %582 = vector.extract_strided_slice %581 {offsets = [0, 0, 0], sizes = [1, 8, 256], strides = [1, 1, 1]} : vector<2x8x256xf32> to vector<1x8x256xf32>
    %583 = vector.shape_cast %582 : vector<1x8x256xf32> to vector<8x256xf32>
    %584 = vector.broadcast %150 : f32 to vector<8x256xf32>
    %585 = arith.mulf %584, %583 : vector<8x256xf32>
    %586 = vector.extract_strided_slice %581 {offsets = [1, 0, 0], sizes = [1, 8, 256], strides = [1, 1, 1]} : vector<2x8x256xf32> to vector<1x8x256xf32>
    %587 = vector.shape_cast %586 : vector<1x8x256xf32> to vector<8x256xf32>
    %588 = vector.broadcast %199 : f32 to vector<8x256xf32>
    %589 = arith.mulf %588, %587 : vector<8x256xf32>
    %590 = arith.addf %585, %589 : vector<8x256xf32>
    %591 = arith.addf %580, %590 : vector<8x256xf32>
    %592 = vector.extract_strided_slice %116 {offsets = [0, 0, 84], sizes = [2, 8, 256], strides = [1, 1, 1]} : vector<2x8x358xf32> to vector<2x8x256xf32>
    %593 = vector.extract_strided_slice %592 {offsets = [0, 0, 0], sizes = [1, 8, 256], strides = [1, 1, 1]} : vector<2x8x256xf32> to vector<1x8x256xf32>
    %594 = vector.shape_cast %593 : vector<1x8x256xf32> to vector<8x256xf32>
    %595 = vector.broadcast %157 : f32 to vector<8x256xf32>
    %596 = arith.mulf %595, %594 : vector<8x256xf32>
    %597 = vector.extract_strided_slice %592 {offsets = [1, 0, 0], sizes = [1, 8, 256], strides = [1, 1, 1]} : vector<2x8x256xf32> to vector<1x8x256xf32>
    %598 = vector.shape_cast %597 : vector<1x8x256xf32> to vector<8x256xf32>
    %599 = vector.broadcast %206 : f32 to vector<8x256xf32>
    %600 = arith.mulf %599, %598 : vector<8x256xf32>
    %601 = arith.addf %596, %600 : vector<8x256xf32>
    %602 = arith.addf %591, %601 : vector<8x256xf32>
    %603 = vector.extract_strided_slice %116 {offsets = [0, 0, 100], sizes = [2, 8, 256], strides = [1, 1, 1]} : vector<2x8x358xf32> to vector<2x8x256xf32>
    %604 = vector.extract_strided_slice %603 {offsets = [0, 0, 0], sizes = [1, 8, 256], strides = [1, 1, 1]} : vector<2x8x256xf32> to vector<1x8x256xf32>
    %605 = vector.shape_cast %604 : vector<1x8x256xf32> to vector<8x256xf32>
    %606 = vector.broadcast %164 : f32 to vector<8x256xf32>
    %607 = arith.mulf %606, %605 : vector<8x256xf32>
    %608 = vector.extract_strided_slice %603 {offsets = [1, 0, 0], sizes = [1, 8, 256], strides = [1, 1, 1]} : vector<2x8x256xf32> to vector<1x8x256xf32>
    %609 = vector.shape_cast %608 : vector<1x8x256xf32> to vector<8x256xf32>
    %610 = vector.broadcast %213 : f32 to vector<8x256xf32>
    %611 = arith.mulf %610, %609 : vector<8x256xf32>
    %612 = arith.addf %607, %611 : vector<8x256xf32>
    %613 = arith.addf %602, %612 : vector<8x256xf32>
    %614 = vector.extract_strided_slice %117 {offsets = [4, 0], sizes = [1, 256], strides = [1, 1]} : vector<7x256xf32> to vector<1x256xf32>
    %615 = vector.broadcast %614 : vector<1x256xf32> to vector<8x256xf32>
    %616 = arith.mulf %613, %615 : vector<8x256xf32>
    %617 = arith.addf %537, %616 : vector<8x256xf32>
    %618 = vector.extract_strided_slice %116 {offsets = [0, 0, 5], sizes = [2, 8, 256], strides = [1, 1, 1]} : vector<2x8x358xf32> to vector<2x8x256xf32>
    %619 = vector.extract_strided_slice %618 {offsets = [0, 0, 0], sizes = [1, 8, 256], strides = [1, 1, 1]} : vector<2x8x256xf32> to vector<1x8x256xf32>
    %620 = vector.shape_cast %619 : vector<1x8x256xf32> to vector<8x256xf32>
    %621 = vector.broadcast %123 : f32 to vector<8x256xf32>
    %622 = arith.mulf %621, %620 : vector<8x256xf32>
    %623 = vector.extract_strided_slice %618 {offsets = [1, 0, 0], sizes = [1, 8, 256], strides = [1, 1, 1]} : vector<2x8x256xf32> to vector<1x8x256xf32>
    %624 = vector.shape_cast %623 : vector<1x8x256xf32> to vector<8x256xf32>
    %625 = vector.broadcast %172 : f32 to vector<8x256xf32>
    %626 = arith.mulf %625, %624 : vector<8x256xf32>
    %627 = arith.addf %622, %626 : vector<8x256xf32>
    %628 = vector.extract_strided_slice %116 {offsets = [0, 0, 21], sizes = [2, 8, 256], strides = [1, 1, 1]} : vector<2x8x358xf32> to vector<2x8x256xf32>
    %629 = vector.extract_strided_slice %628 {offsets = [0, 0, 0], sizes = [1, 8, 256], strides = [1, 1, 1]} : vector<2x8x256xf32> to vector<1x8x256xf32>
    %630 = vector.shape_cast %629 : vector<1x8x256xf32> to vector<8x256xf32>
    %631 = vector.broadcast %130 : f32 to vector<8x256xf32>
    %632 = arith.mulf %631, %630 : vector<8x256xf32>
    %633 = vector.extract_strided_slice %628 {offsets = [1, 0, 0], sizes = [1, 8, 256], strides = [1, 1, 1]} : vector<2x8x256xf32> to vector<1x8x256xf32>
    %634 = vector.shape_cast %633 : vector<1x8x256xf32> to vector<8x256xf32>
    %635 = vector.broadcast %179 : f32 to vector<8x256xf32>
    %636 = arith.mulf %635, %634 : vector<8x256xf32>
    %637 = arith.addf %632, %636 : vector<8x256xf32>
    %638 = arith.addf %627, %637 : vector<8x256xf32>
    %639 = vector.extract_strided_slice %116 {offsets = [0, 0, 37], sizes = [2, 8, 256], strides = [1, 1, 1]} : vector<2x8x358xf32> to vector<2x8x256xf32>
    %640 = vector.extract_strided_slice %639 {offsets = [0, 0, 0], sizes = [1, 8, 256], strides = [1, 1, 1]} : vector<2x8x256xf32> to vector<1x8x256xf32>
    %641 = vector.shape_cast %640 : vector<1x8x256xf32> to vector<8x256xf32>
    %642 = vector.broadcast %137 : f32 to vector<8x256xf32>
    %643 = arith.mulf %642, %641 : vector<8x256xf32>
    %644 = vector.extract_strided_slice %639 {offsets = [1, 0, 0], sizes = [1, 8, 256], strides = [1, 1, 1]} : vector<2x8x256xf32> to vector<1x8x256xf32>
    %645 = vector.shape_cast %644 : vector<1x8x256xf32> to vector<8x256xf32>
    %646 = vector.broadcast %186 : f32 to vector<8x256xf32>
    %647 = arith.mulf %646, %645 : vector<8x256xf32>
    %648 = arith.addf %643, %647 : vector<8x256xf32>
    %649 = arith.addf %638, %648 : vector<8x256xf32>
    %650 = vector.extract_strided_slice %116 {offsets = [0, 0, 53], sizes = [2, 8, 256], strides = [1, 1, 1]} : vector<2x8x358xf32> to vector<2x8x256xf32>
    %651 = vector.extract_strided_slice %650 {offsets = [0, 0, 0], sizes = [1, 8, 256], strides = [1, 1, 1]} : vector<2x8x256xf32> to vector<1x8x256xf32>
    %652 = vector.shape_cast %651 : vector<1x8x256xf32> to vector<8x256xf32>
    %653 = vector.broadcast %144 : f32 to vector<8x256xf32>
    %654 = arith.mulf %653, %652 : vector<8x256xf32>
    %655 = vector.extract_strided_slice %650 {offsets = [1, 0, 0], sizes = [1, 8, 256], strides = [1, 1, 1]} : vector<2x8x256xf32> to vector<1x8x256xf32>
    %656 = vector.shape_cast %655 : vector<1x8x256xf32> to vector<8x256xf32>
    %657 = vector.broadcast %193 : f32 to vector<8x256xf32>
    %658 = arith.mulf %657, %656 : vector<8x256xf32>
    %659 = arith.addf %654, %658 : vector<8x256xf32>
    %660 = arith.addf %649, %659 : vector<8x256xf32>
    %661 = vector.extract_strided_slice %116 {offsets = [0, 0, 69], sizes = [2, 8, 256], strides = [1, 1, 1]} : vector<2x8x358xf32> to vector<2x8x256xf32>
    %662 = vector.extract_strided_slice %661 {offsets = [0, 0, 0], sizes = [1, 8, 256], strides = [1, 1, 1]} : vector<2x8x256xf32> to vector<1x8x256xf32>
    %663 = vector.shape_cast %662 : vector<1x8x256xf32> to vector<8x256xf32>
    %664 = vector.broadcast %151 : f32 to vector<8x256xf32>
    %665 = arith.mulf %664, %663 : vector<8x256xf32>
    %666 = vector.extract_strided_slice %661 {offsets = [1, 0, 0], sizes = [1, 8, 256], strides = [1, 1, 1]} : vector<2x8x256xf32> to vector<1x8x256xf32>
    %667 = vector.shape_cast %666 : vector<1x8x256xf32> to vector<8x256xf32>
    %668 = vector.broadcast %200 : f32 to vector<8x256xf32>
    %669 = arith.mulf %668, %667 : vector<8x256xf32>
    %670 = arith.addf %665, %669 : vector<8x256xf32>
    %671 = arith.addf %660, %670 : vector<8x256xf32>
    %672 = vector.extract_strided_slice %116 {offsets = [0, 0, 85], sizes = [2, 8, 256], strides = [1, 1, 1]} : vector<2x8x358xf32> to vector<2x8x256xf32>
    %673 = vector.extract_strided_slice %672 {offsets = [0, 0, 0], sizes = [1, 8, 256], strides = [1, 1, 1]} : vector<2x8x256xf32> to vector<1x8x256xf32>
    %674 = vector.shape_cast %673 : vector<1x8x256xf32> to vector<8x256xf32>
    %675 = vector.broadcast %158 : f32 to vector<8x256xf32>
    %676 = arith.mulf %675, %674 : vector<8x256xf32>
    %677 = vector.extract_strided_slice %672 {offsets = [1, 0, 0], sizes = [1, 8, 256], strides = [1, 1, 1]} : vector<2x8x256xf32> to vector<1x8x256xf32>
    %678 = vector.shape_cast %677 : vector<1x8x256xf32> to vector<8x256xf32>
    %679 = vector.broadcast %207 : f32 to vector<8x256xf32>
    %680 = arith.mulf %679, %678 : vector<8x256xf32>
    %681 = arith.addf %676, %680 : vector<8x256xf32>
    %682 = arith.addf %671, %681 : vector<8x256xf32>
    %683 = vector.extract_strided_slice %116 {offsets = [0, 0, 101], sizes = [2, 8, 256], strides = [1, 1, 1]} : vector<2x8x358xf32> to vector<2x8x256xf32>
    %684 = vector.extract_strided_slice %683 {offsets = [0, 0, 0], sizes = [1, 8, 256], strides = [1, 1, 1]} : vector<2x8x256xf32> to vector<1x8x256xf32>
    %685 = vector.shape_cast %684 : vector<1x8x256xf32> to vector<8x256xf32>
    %686 = vector.broadcast %165 : f32 to vector<8x256xf32>
    %687 = arith.mulf %686, %685 : vector<8x256xf32>
    %688 = vector.extract_strided_slice %683 {offsets = [1, 0, 0], sizes = [1, 8, 256], strides = [1, 1, 1]} : vector<2x8x256xf32> to vector<1x8x256xf32>
    %689 = vector.shape_cast %688 : vector<1x8x256xf32> to vector<8x256xf32>
    %690 = vector.broadcast %214 : f32 to vector<8x256xf32>
    %691 = arith.mulf %690, %689 : vector<8x256xf32>
    %692 = arith.addf %687, %691 : vector<8x256xf32>
    %693 = arith.addf %682, %692 : vector<8x256xf32>
    %694 = vector.extract_strided_slice %117 {offsets = [5, 0], sizes = [1, 256], strides = [1, 1]} : vector<7x256xf32> to vector<1x256xf32>
    %695 = vector.broadcast %694 : vector<1x256xf32> to vector<8x256xf32>
    %696 = arith.mulf %693, %695 : vector<8x256xf32>
    %697 = arith.addf %617, %696 : vector<8x256xf32>
    %698 = vector.extract_strided_slice %116 {offsets = [0, 0, 6], sizes = [2, 8, 256], strides = [1, 1, 1]} : vector<2x8x358xf32> to vector<2x8x256xf32>
    %699 = vector.extract_strided_slice %698 {offsets = [0, 0, 0], sizes = [1, 8, 256], strides = [1, 1, 1]} : vector<2x8x256xf32> to vector<1x8x256xf32>
    %700 = vector.shape_cast %699 : vector<1x8x256xf32> to vector<8x256xf32>
    %701 = vector.broadcast %124 : f32 to vector<8x256xf32>
    %702 = arith.mulf %701, %700 : vector<8x256xf32>
    %703 = vector.extract_strided_slice %698 {offsets = [1, 0, 0], sizes = [1, 8, 256], strides = [1, 1, 1]} : vector<2x8x256xf32> to vector<1x8x256xf32>
    %704 = vector.shape_cast %703 : vector<1x8x256xf32> to vector<8x256xf32>
    %705 = vector.broadcast %173 : f32 to vector<8x256xf32>
    %706 = arith.mulf %705, %704 : vector<8x256xf32>
    %707 = arith.addf %702, %706 : vector<8x256xf32>
    %708 = vector.extract_strided_slice %116 {offsets = [0, 0, 22], sizes = [2, 8, 256], strides = [1, 1, 1]} : vector<2x8x358xf32> to vector<2x8x256xf32>
    %709 = vector.extract_strided_slice %708 {offsets = [0, 0, 0], sizes = [1, 8, 256], strides = [1, 1, 1]} : vector<2x8x256xf32> to vector<1x8x256xf32>
    %710 = vector.shape_cast %709 : vector<1x8x256xf32> to vector<8x256xf32>
    %711 = vector.broadcast %131 : f32 to vector<8x256xf32>
    %712 = arith.mulf %711, %710 : vector<8x256xf32>
    %713 = vector.extract_strided_slice %708 {offsets = [1, 0, 0], sizes = [1, 8, 256], strides = [1, 1, 1]} : vector<2x8x256xf32> to vector<1x8x256xf32>
    %714 = vector.shape_cast %713 : vector<1x8x256xf32> to vector<8x256xf32>
    %715 = vector.broadcast %180 : f32 to vector<8x256xf32>
    %716 = arith.mulf %715, %714 : vector<8x256xf32>
    %717 = arith.addf %712, %716 : vector<8x256xf32>
    %718 = arith.addf %707, %717 : vector<8x256xf32>
    %719 = vector.extract_strided_slice %116 {offsets = [0, 0, 38], sizes = [2, 8, 256], strides = [1, 1, 1]} : vector<2x8x358xf32> to vector<2x8x256xf32>
    %720 = vector.extract_strided_slice %719 {offsets = [0, 0, 0], sizes = [1, 8, 256], strides = [1, 1, 1]} : vector<2x8x256xf32> to vector<1x8x256xf32>
    %721 = vector.shape_cast %720 : vector<1x8x256xf32> to vector<8x256xf32>
    %722 = vector.broadcast %138 : f32 to vector<8x256xf32>
    %723 = arith.mulf %722, %721 : vector<8x256xf32>
    %724 = vector.extract_strided_slice %719 {offsets = [1, 0, 0], sizes = [1, 8, 256], strides = [1, 1, 1]} : vector<2x8x256xf32> to vector<1x8x256xf32>
    %725 = vector.shape_cast %724 : vector<1x8x256xf32> to vector<8x256xf32>
    %726 = vector.broadcast %187 : f32 to vector<8x256xf32>
    %727 = arith.mulf %726, %725 : vector<8x256xf32>
    %728 = arith.addf %723, %727 : vector<8x256xf32>
    %729 = arith.addf %718, %728 : vector<8x256xf32>
    %730 = vector.extract_strided_slice %116 {offsets = [0, 0, 54], sizes = [2, 8, 256], strides = [1, 1, 1]} : vector<2x8x358xf32> to vector<2x8x256xf32>
    %731 = vector.extract_strided_slice %730 {offsets = [0, 0, 0], sizes = [1, 8, 256], strides = [1, 1, 1]} : vector<2x8x256xf32> to vector<1x8x256xf32>
    %732 = vector.shape_cast %731 : vector<1x8x256xf32> to vector<8x256xf32>
    %733 = vector.broadcast %145 : f32 to vector<8x256xf32>
    %734 = arith.mulf %733, %732 : vector<8x256xf32>
    %735 = vector.extract_strided_slice %730 {offsets = [1, 0, 0], sizes = [1, 8, 256], strides = [1, 1, 1]} : vector<2x8x256xf32> to vector<1x8x256xf32>
    %736 = vector.shape_cast %735 : vector<1x8x256xf32> to vector<8x256xf32>
    %737 = vector.broadcast %194 : f32 to vector<8x256xf32>
    %738 = arith.mulf %737, %736 : vector<8x256xf32>
    %739 = arith.addf %734, %738 : vector<8x256xf32>
    %740 = arith.addf %729, %739 : vector<8x256xf32>
    %741 = vector.extract_strided_slice %116 {offsets = [0, 0, 70], sizes = [2, 8, 256], strides = [1, 1, 1]} : vector<2x8x358xf32> to vector<2x8x256xf32>
    %742 = vector.extract_strided_slice %741 {offsets = [0, 0, 0], sizes = [1, 8, 256], strides = [1, 1, 1]} : vector<2x8x256xf32> to vector<1x8x256xf32>
    %743 = vector.shape_cast %742 : vector<1x8x256xf32> to vector<8x256xf32>
    %744 = vector.broadcast %152 : f32 to vector<8x256xf32>
    %745 = arith.mulf %744, %743 : vector<8x256xf32>
    %746 = vector.extract_strided_slice %741 {offsets = [1, 0, 0], sizes = [1, 8, 256], strides = [1, 1, 1]} : vector<2x8x256xf32> to vector<1x8x256xf32>
    %747 = vector.shape_cast %746 : vector<1x8x256xf32> to vector<8x256xf32>
    %748 = vector.broadcast %201 : f32 to vector<8x256xf32>
    %749 = arith.mulf %748, %747 : vector<8x256xf32>
    %750 = arith.addf %745, %749 : vector<8x256xf32>
    %751 = arith.addf %740, %750 : vector<8x256xf32>
    %752 = vector.extract_strided_slice %116 {offsets = [0, 0, 86], sizes = [2, 8, 256], strides = [1, 1, 1]} : vector<2x8x358xf32> to vector<2x8x256xf32>
    %753 = vector.extract_strided_slice %752 {offsets = [0, 0, 0], sizes = [1, 8, 256], strides = [1, 1, 1]} : vector<2x8x256xf32> to vector<1x8x256xf32>
    %754 = vector.shape_cast %753 : vector<1x8x256xf32> to vector<8x256xf32>
    %755 = vector.broadcast %159 : f32 to vector<8x256xf32>
    %756 = arith.mulf %755, %754 : vector<8x256xf32>
    %757 = vector.extract_strided_slice %752 {offsets = [1, 0, 0], sizes = [1, 8, 256], strides = [1, 1, 1]} : vector<2x8x256xf32> to vector<1x8x256xf32>
    %758 = vector.shape_cast %757 : vector<1x8x256xf32> to vector<8x256xf32>
    %759 = vector.broadcast %208 : f32 to vector<8x256xf32>
    %760 = arith.mulf %759, %758 : vector<8x256xf32>
    %761 = arith.addf %756, %760 : vector<8x256xf32>
    %762 = arith.addf %751, %761 : vector<8x256xf32>
    %763 = vector.extract_strided_slice %116 {offsets = [0, 0, 102], sizes = [2, 8, 256], strides = [1, 1, 1]} : vector<2x8x358xf32> to vector<2x8x256xf32>
    %764 = vector.extract_strided_slice %763 {offsets = [0, 0, 0], sizes = [1, 8, 256], strides = [1, 1, 1]} : vector<2x8x256xf32> to vector<1x8x256xf32>
    %765 = vector.shape_cast %764 : vector<1x8x256xf32> to vector<8x256xf32>
    %766 = vector.broadcast %166 : f32 to vector<8x256xf32>
    %767 = arith.mulf %766, %765 : vector<8x256xf32>
    %768 = vector.extract_strided_slice %763 {offsets = [1, 0, 0], sizes = [1, 8, 256], strides = [1, 1, 1]} : vector<2x8x256xf32> to vector<1x8x256xf32>
    %769 = vector.shape_cast %768 : vector<1x8x256xf32> to vector<8x256xf32>
    %770 = vector.broadcast %215 : f32 to vector<8x256xf32>
    %771 = arith.mulf %770, %769 : vector<8x256xf32>
    %772 = arith.addf %767, %771 : vector<8x256xf32>
    %773 = arith.addf %762, %772 : vector<8x256xf32>
    %774 = vector.extract_strided_slice %117 {offsets = [6, 0], sizes = [1, 256], strides = [1, 1]} : vector<7x256xf32> to vector<1x256xf32>
    %775 = vector.broadcast %774 : vector<1x256xf32> to vector<8x256xf32>
    %776 = arith.mulf %773, %775 : vector<8x256xf32>
    %777 = arith.addf %697, %776 : vector<8x256xf32>
    %778 = arith.negf %777 : vector<8x256xf32>
    %779 = math.exp %778 : vector<8x256xf32>
    %cst_108 = arith.constant 1.000000e+00 : f32
    %780 = vector.broadcast %cst_108 : f32 to vector<8x256xf32>
    %781 = arith.addf %780, %779 : vector<8x256xf32>
    %782 = arith.divf %780, %781 : vector<8x256xf32>
    %783 = vector.extract_strided_slice %782 {offsets = [0, 0], sizes = [1, 256], strides = [1, 1]} : vector<8x256xf32> to vector<1x256xf32>
    %c0_109 = arith.constant 0 : index
    %c0_110 = arith.constant 0 : index
    %c0_111 = arith.constant 0 : index
    %784 = vector.load %arg4[%c0_109, %c0_110, %c0_111] : memref<8x8x256xf32, #tpu.memory_space<vmem>>, vector<1x8x256xf32>
    %785 = vector.shape_cast %784 : vector<1x8x256xf32> to vector<8x256xf32>
    %786 = vector.broadcast %783 : vector<1x256xf32> to vector<8x256xf32>
    %787 = arith.mulf %785, %786 : vector<8x256xf32>
    %c0_112 = arith.constant 0 : index
    %c0_113 = arith.constant 0 : index
    %c0_114 = arith.constant 0 : index
    %788 = vector.load %arg5[%c0_112, %c0_113, %c0_114] : memref<8x8x256xf32, #tpu.memory_space<vmem>>, vector<1x8x256xf32>
    %789 = vector.shape_cast %788 : vector<1x8x256xf32> to vector<8x256xf32>
    %790 = vector.shape_cast %787 : vector<8x256xf32> to vector<1x8x256xf32>
    tpu.vector_store %arg5[%c0_112, %c0_113, %c0_114], %790 {strides = array<i32>} : memref<8x8x256xf32, #tpu.memory_space<vmem>>, vector<1x8x256xf32>,
    %791 = vector.extract_strided_slice %782 {offsets = [1, 0], sizes = [1, 256], strides = [1, 1]} : vector<8x256xf32> to vector<1x256xf32>
    %c1_115 = arith.constant 1 : index
    %c0_116 = arith.constant 0 : index
    %c0_117 = arith.constant 0 : index
    %792 = vector.load %arg4[%c1_115, %c0_116, %c0_117] : memref<8x8x256xf32, #tpu.memory_space<vmem>>, vector<1x8x256xf32>
    %793 = vector.shape_cast %792 : vector<1x8x256xf32> to vector<8x256xf32>
    %794 = vector.broadcast %791 : vector<1x256xf32> to vector<8x256xf32>
    %795 = arith.mulf %793, %794 : vector<8x256xf32>
    %c1_118 = arith.constant 1 : index
    %c0_119 = arith.constant 0 : index
    %c0_120 = arith.constant 0 : index
    %796 = vector.load %arg5[%c1_118, %c0_119, %c0_120] : memref<8x8x256xf32, #tpu.memory_space<vmem>>, vector<1x8x256xf32>
    %797 = vector.shape_cast %796 : vector<1x8x256xf32> to vector<8x256xf32>
    %798 = vector.shape_cast %795 : vector<8x256xf32> to vector<1x8x256xf32>
    tpu.vector_store %arg5[%c1_118, %c0_119, %c0_120], %798 {strides = array<i32>} : memref<8x8x256xf32, #tpu.memory_space<vmem>>, vector<1x8x256xf32>,
    %799 = vector.extract_strided_slice %782 {offsets = [2, 0], sizes = [1, 256], strides = [1, 1]} : vector<8x256xf32> to vector<1x256xf32>
    %c2_121 = arith.constant 2 : index
    %c0_122 = arith.constant 0 : index
    %c0_123 = arith.constant 0 : index
    %800 = vector.load %arg4[%c2_121, %c0_122, %c0_123] : memref<8x8x256xf32, #tpu.memory_space<vmem>>, vector<1x8x256xf32>
    %801 = vector.shape_cast %800 : vector<1x8x256xf32> to vector<8x256xf32>
    %802 = vector.broadcast %799 : vector<1x256xf32> to vector<8x256xf32>
    %803 = arith.mulf %801, %802 : vector<8x256xf32>
    %c2_124 = arith.constant 2 : index
    %c0_125 = arith.constant 0 : index
    %c0_126 = arith.constant 0 : index
    %804 = vector.load %arg5[%c2_124, %c0_125, %c0_126] : memref<8x8x256xf32, #tpu.memory_space<vmem>>, vector<1x8x256xf32>
    %805 = vector.shape_cast %804 : vector<1x8x256xf32> to vector<8x256xf32>
    %806 = vector.shape_cast %803 : vector<8x256xf32> to vector<1x8x256xf32>
    tpu.vector_store %arg5[%c2_124, %c0_125, %c0_126], %806 {strides = array<i32>} : memref<8x8x256xf32, #tpu.memory_space<vmem>>, vector<1x8x256xf32>,
    %807 = vector.extract_strided_slice %782 {offsets = [3, 0], sizes = [1, 256], strides = [1, 1]} : vector<8x256xf32> to vector<1x256xf32>
    %c3_127 = arith.constant 3 : index
    %c0_128 = arith.constant 0 : index
    %c0_129 = arith.constant 0 : index
    %808 = vector.load %arg4[%c3_127, %c0_128, %c0_129] : memref<8x8x256xf32, #tpu.memory_space<vmem>>, vector<1x8x256xf32>
    %809 = vector.shape_cast %808 : vector<1x8x256xf32> to vector<8x256xf32>
    %810 = vector.broadcast %807 : vector<1x256xf32> to vector<8x256xf32>
    %811 = arith.mulf %809, %810 : vector<8x256xf32>
    %c3_130 = arith.constant 3 : index
    %c0_131 = arith.constant 0 : index
    %c0_132 = arith.constant 0 : index
    %812 = vector.load %arg5[%c3_130, %c0_131, %c0_132] : memref<8x8x256xf32, #tpu.memory_space<vmem>>, vector<1x8x256xf32>
    %813 = vector.shape_cast %812 : vector<1x8x256xf32> to vector<8x256xf32>
    %814 = vector.shape_cast %811 : vector<8x256xf32> to vector<1x8x256xf32>
    tpu.vector_store %arg5[%c3_130, %c0_131, %c0_132], %814 {strides = array<i32>} : memref<8x8x256xf32, #tpu.memory_space<vmem>>, vector<1x8x256xf32>,
    %815 = vector.extract_strided_slice %782 {offsets = [4, 0], sizes = [1, 256], strides = [1, 1]} : vector<8x256xf32> to vector<1x256xf32>
    %c4_133 = arith.constant 4 : index
    %c0_134 = arith.constant 0 : index
    %c0_135 = arith.constant 0 : index
    %816 = vector.load %arg4[%c4_133, %c0_134, %c0_135] : memref<8x8x256xf32, #tpu.memory_space<vmem>>, vector<1x8x256xf32>
    %817 = vector.shape_cast %816 : vector<1x8x256xf32> to vector<8x256xf32>
    %818 = vector.broadcast %815 : vector<1x256xf32> to vector<8x256xf32>
    %819 = arith.mulf %817, %818 : vector<8x256xf32>
    %c4_136 = arith.constant 4 : index
    %c0_137 = arith.constant 0 : index
    %c0_138 = arith.constant 0 : index
    %820 = vector.load %arg5[%c4_136, %c0_137, %c0_138] : memref<8x8x256xf32, #tpu.memory_space<vmem>>, vector<1x8x256xf32>
    %821 = vector.shape_cast %820 : vector<1x8x256xf32> to vector<8x256xf32>
    %822 = vector.shape_cast %819 : vector<8x256xf32> to vector<1x8x256xf32>
    tpu.vector_store %arg5[%c4_136, %c0_137, %c0_138], %822 {strides = array<i32>} : memref<8x8x256xf32, #tpu.memory_space<vmem>>, vector<1x8x256xf32>,
    %823 = vector.extract_strided_slice %782 {offsets = [5, 0], sizes = [1, 256], strides = [1, 1]} : vector<8x256xf32> to vector<1x256xf32>
    %c5_139 = arith.constant 5 : index
    %c0_140 = arith.constant 0 : index
    %c0_141 = arith.constant 0 : index
    %824 = vector.load %arg4[%c5_139, %c0_140, %c0_141] : memref<8x8x256xf32, #tpu.memory_space<vmem>>, vector<1x8x256xf32>
    %825 = vector.shape_cast %824 : vector<1x8x256xf32> to vector<8x256xf32>
    %826 = vector.broadcast %823 : vector<1x256xf32> to vector<8x256xf32>
    %827 = arith.mulf %825, %826 : vector<8x256xf32>
    %c5_142 = arith.constant 5 : index
    %c0_143 = arith.constant 0 : index
    %c0_144 = arith.constant 0 : index
    %828 = vector.load %arg5[%c5_142, %c0_143, %c0_144] : memref<8x8x256xf32, #tpu.memory_space<vmem>>, vector<1x8x256xf32>
    %829 = vector.shape_cast %828 : vector<1x8x256xf32> to vector<8x256xf32>
    %830 = vector.shape_cast %827 : vector<8x256xf32> to vector<1x8x256xf32>
    tpu.vector_store %arg5[%c5_142, %c0_143, %c0_144], %830 {strides = array<i32>} : memref<8x8x256xf32, #tpu.memory_space<vmem>>, vector<1x8x256xf32>,
    %831 = vector.extract_strided_slice %782 {offsets = [6, 0], sizes = [1, 256], strides = [1, 1]} : vector<8x256xf32> to vector<1x256xf32>
    %c6_145 = arith.constant 6 : index
    %c0_146 = arith.constant 0 : index
    %c0_147 = arith.constant 0 : index
    %832 = vector.load %arg4[%c6_145, %c0_146, %c0_147] : memref<8x8x256xf32, #tpu.memory_space<vmem>>, vector<1x8x256xf32>
    %833 = vector.shape_cast %832 : vector<1x8x256xf32> to vector<8x256xf32>
    %834 = vector.broadcast %831 : vector<1x256xf32> to vector<8x256xf32>
    %835 = arith.mulf %833, %834 : vector<8x256xf32>
    %c6_148 = arith.constant 6 : index
    %c0_149 = arith.constant 0 : index
    %c0_150 = arith.constant 0 : index
    %836 = vector.load %arg5[%c6_148, %c0_149, %c0_150] : memref<8x8x256xf32, #tpu.memory_space<vmem>>, vector<1x8x256xf32>
    %837 = vector.shape_cast %836 : vector<1x8x256xf32> to vector<8x256xf32>
    %838 = vector.shape_cast %835 : vector<8x256xf32> to vector<1x8x256xf32>
    tpu.vector_store %arg5[%c6_148, %c0_149, %c0_150], %838 {strides = array<i32>} : memref<8x8x256xf32, #tpu.memory_space<vmem>>, vector<1x8x256xf32>,
    %839 = vector.extract_strided_slice %782 {offsets = [7, 0], sizes = [1, 256], strides = [1, 1]} : vector<8x256xf32> to vector<1x256xf32>
    %c7_151 = arith.constant 7 : index
    %c0_152 = arith.constant 0 : index
    %c0_153 = arith.constant 0 : index
    %840 = vector.load %arg4[%c7_151, %c0_152, %c0_153] : memref<8x8x256xf32, #tpu.memory_space<vmem>>, vector<1x8x256xf32>
    %841 = vector.shape_cast %840 : vector<1x8x256xf32> to vector<8x256xf32>
    %842 = vector.broadcast %839 : vector<1x256xf32> to vector<8x256xf32>
    %843 = arith.mulf %841, %842 : vector<8x256xf32>
    %c7_154 = arith.constant 7 : index
    %c0_155 = arith.constant 0 : index
    %c0_156 = arith.constant 0 : index
    %844 = vector.load %arg5[%c7_154, %c0_155, %c0_156] : memref<8x8x256xf32, #tpu.memory_space<vmem>>, vector<1x8x256xf32>
    %845 = vector.shape_cast %844 : vector<1x8x256xf32> to vector<8x256xf32>
    %846 = vector.shape_cast %843 : vector<8x256xf32> to vector<1x8x256xf32>
    tpu.vector_store %arg5[%c7_154, %c0_155, %c0_156], %846 {strides = array<i32>} : memref<8x8x256xf32, #tpu.memory_space<vmem>>, vector<1x8x256xf32>,
    return
  }
  func.func @transform_0(%arg0: i32) -> i32 {
    %c0_i32 = arith.constant 0 : i32
    %c0_i32_0 = arith.constant 0 : i32
    return %c0_i32 : i32
  }
  func.func @transform_1(%arg0: i32) -> i32 {
    %c0_i32 = arith.constant 0 : i32
    %c0_i32_0 = arith.constant 0 : i32
    return %c0_i32 : i32
  }
  func.func @transform_2(%arg0: i32) -> (i32, i32) {
    %c0_i32 = arith.constant 0 : i32
    %c0_i32_0 = arith.constant 0 : i32
    %c0_i32_1 = arith.constant 0 : i32
    return %c0_i32, %c0_i32_0 : i32, i32
  }
  func.func @transform_3(%arg0: i32) -> (i32, i32, i32) {
    %c0_i32 = arith.constant 0 : i32
    %c0_i32_0 = arith.constant 0 : i32
    %c0_i32_1 = arith.constant 0 : i32
    return %arg0, %c0_i32, %c0_i32_0 : i32, i32, i32
  }
  func.func @transform_4(%arg0: i32) -> (i32, i32, i32) {
    %c0_i32 = arith.constant 0 : i32
    %c0_i32_0 = arith.constant 0 : i32
    %c0_i32_1 = arith.constant 0 : i32
    return %arg0, %c0_i32, %c0_i32_0 : i32, i32, i32
  }
}

</mosaic_0001>

<bundles_post_ra>
// kernel: tpu_custom_call.1
= control target key start
LH: loop header
LB: loop body
LE: loop exit
PB: predicated region body
PF: predicated region fallthrough
CT: control target
= control target key end

     0   :  { %10 = vsyncpa [#allocation7], 0  ;;  %s3979_s0 = inlined_call_operand.vmem [shape: f32[98], index: 0, kind: input, shape index: {}]   ;;  %s3980_s1 = inlined_call_operand.<no memory space> [shape: f32[1], index: 1, kind: input, shape index: {}]   ;;  %s3981_s2 = inlined_call_operand.hbm [shape: f32[7,256], index: 2, kind: input, shape index: {}]   ;;  %s3982_s3 = inlined_call_operand.hbm [shape: f32[8,8,256], index: 3, kind: input, shape index: {}]   ;;  %s3983_s4 = inlined_call_operand.hbm [shape: f32[8,8,256], index: 4, kind: output, shape index: {}]  }
   0x1   :  { %11 = vsyncpa [#allocation5], 0 }
   0x2   :  { %12 = vsyncpa [#allocation10], 0 }
   0x3   :  { %13 = vsyncpa [#allocation6], 0  ;;  %s20_s17 = sshll.u32 %s3979_s0, 4  ;;  %s21_s17 = int_to_ptr.vmem [resolvable:$true] %s20_s17 }
   0x4   :  { %s2593_s18 = scalar_lea.vmem %s21_s17, 16  ;;  %p2598_p1 = scmp.lt.s32.totalorder %s21_s17, %s21_s17 }
   0x5   :  { %p2594_p0 = scmp.ne.s32.totalorder %s21_s17, %s2593_s18  ;;  %p2599_p2 = scmp.lt.s32.totalorder %s2593_s18, %s2593_s18 }
   0x7   :  { %p2600_p3 = por %p2599_p2, %p2598_p1 }
   0x9   :  { %p2601_p4 = pnand %p2600_p3, %p2594_p0 }
   0xb   :  { %2604 = shalt.err (!%p2601_p4)
}
   0xc   :  { %s2679_s19 = smov [#allocation4]   ;;  %s2680_s20 = smov [#allocation8]  }
   0xd   :  { %23 = dma.vmem_to_smem %s21_s17, 16, %s2679_s19, [#allocation7]  }
   0xe   :  { %s32_s21 = sshll.u32 %s2680_s20, 4  ;;  %s2681_s22 = smov [#allocation9]   ;;  %s33_s21 = int_to_ptr.vmem [resolvable:$true] %s32_s21 }
   0xf   :  { %s41_s23 = sshll.u32 %s2681_s22, 4  ;;  %s2605_s26 = scalar_lea.hbm %s3981_s2, 256  ;;  %s42_s23 = int_to_ptr.vmem [resolvable:$true] %s41_s23 }
  0x10   :  { %p2606_p5 = scmp.ne.s32.totalorder %s3981_s2, %s2605_s26  ;;  %p2609_p6 = scmp.lt.u32.totalorder %s2605_s26, %s3981_s2 }
  0x12   :  { %p2611_p7 = pnand %p2609_p6, %p2606_p5 }
  0x14   :  { %2614 = shalt.err (!%p2611_p7)
}
  0x15   :  { %s2615_s30 = scalar_lea.vmem %s33_s21, 256  ;;  %p2620_p9 = scmp.lt.s32.totalorder %s33_s21, %s33_s21 }
  0x16   :  { %p2616_p8 = scmp.ne.s32.totalorder %s33_s21, %s2615_s30  ;;  %p2621_p10 = scmp.lt.s32.totalorder %s2615_s30, %s2615_s30 }
  0x18   :  { %p2622_p11 = por %p2621_p10, %p2620_p9 }
  0x1a   :  { %p2623_p12 = pnand %p2622_p11, %p2616_p8 }
  0x1c   :  { %2626 = shalt.err (!%p2623_p12)
}
  0x1d   :  { %35 = dma.hbm_to_vmem [thread:$0]  %s3981_s2, 256, %s33_s21, [#allocation5]  }
  0x1e   :  { %s2627_s9 = scalar_lea.hbm %s3982_s3, 2048 }
  0x1f   :  { %p2628_p13 = scmp.ne.s32.totalorder %s3982_s3, %s2627_s9  ;;  %p2631_p0 = scmp.lt.u32.totalorder %s2627_s9, %s3982_s3 }
  0x21   :  { %p2633_p1 = pnand %p2631_p0, %p2628_p13 }
  0x23   :  { %2636 = shalt.err (!%p2633_p1)
}
  0x24   :  { %s2637_s14 = scalar_lea.vmem %s42_s23, 2048  ;;  %p2642_p3 = scmp.lt.s32.totalorder %s42_s23, %s42_s23 }
  0x25   :  { %p2638_p2 = scmp.ne.s32.totalorder %s42_s23, %s2637_s14  ;;  %p2643_p4 = scmp.lt.s32.totalorder %s2637_s14, %s2637_s14 }
  0x27   :  { %p2644_p5 = por %p2643_p4, %p2642_p3 }
  0x29   :  { %p2645_p6 = pnand %p2644_p5, %p2638_p2 }
  0x2b   :  { %2648 = shalt.err (!%p2645_p6)
}
  0x2c   :  { %s2682_s2 = smov 256   ;;  %s2683_s15 = smov 16  }
  0x2d   :  { %47 = dma.hbm_to_vmem [thread:$0]  %s3982_s3, 2048, %s42_s23, [#allocation10], %s2682_s2, %s2682_s2, %s2683_s15  }
  0x2e   :  { %2671 = dma.done.wait [#allocation7], 16  }
  0x2f   :  { %2672 = vsyncadd [#allocation7], 4294967280 }
  0x30   :  { %2673 = dma.done.wait [#allocation5], 256  }
  0x31   :  { %2674 = vsyncadd [#allocation5], 4294967040 }
  0x32   :  { %2675 = dma.done.wait [#allocation10], 2048  }
  0x33   :  { %2676 = vsyncadd [#allocation10], 4294965248 }
  0x34   :  { %57 = sfence }
  0x35   :  { %v98_v0 = vlaneseq  ;;  %v2761_v1 = vld [vmem:[#allocation9 + $0x10] sm:$0xff]  ;;  %v2763_v2 = vld [vmem:[#allocation9 + $0x18] sm:$0xff]  ;;  %v64_v3 = vld [vmem:[#allocation9] sm:$0xff]  ;;  %v2684_v4 = vmov 1966171168   ;;  %s2685_s3 = smov 51  }
  0x36   :  { %v96_v5 = vunpack.c.l.s4 %v2684_v4  ;;  %v148_v6 = vrot.slane %v2761_v1, 4  ;;  %v154_v7 = vrot.slane %v2763_v2, 4  ;;  %v65_v8 = vld [vmem:[#allocation9 + $0x8] sm:$0xff]  ;;  %v66_v9 = vrot.slane %v64_v3, 4  ;;  %v225_v10 = vld [vmem:[#allocation9 + $0x20] sm:$0xff]  ;;  %v304_v48 = vld [vmem:[#allocation9 + $0x30] sm:$0xff] }
  0x37   :  { %v226_v11 = vld [vmem:[#allocation9 + $0x28] sm:$0xff]  ;;  %v2768_v12 = vshrl.u32 %v98_v0, 7  ;;  %v72_v13 = vrot.slane %v65_v8, 4  ;;  %v227_v14 = vrot.slane %v225_v10, 4  ;;  %v2779_v49 = vld [vmem:[#allocation9 + $0x38] sm:$0xff]  ;;  %v306_v60 = vrot.slane %v304_v48, 4 }
  0x38   :  { %v233_v15 = vrot.slane %v226_v11, 4  ;;  %v97_v16 = vunpack.c.0.s8 %v96_v5  ;;  %v163_v17 = vmax.f32 %v2761_v1, %v148_v6  ;;  %v169_v18 = vmax.f32 %v2763_v2, %v154_v7  ;;  %s2687_s18 = smov 1   ;;  %s2688_s19 = smov 2  }
  0x39   :  { %4007 = vst [vmem:[#allocation16_spill] sm:$0xff] %v2768_v12  ;;  %v81_v19 = vmax.f32 %v64_v3, %v66_v9  ;;  %v87_v20 = vmax.f32 %v65_v8, %v72_v13  ;;  %v242_v21 = vmax.f32 %v225_v10, %v227_v14  ;;  %v67_v23 = vadd.f32 %v66_v9, %v64_v3  ;;  %s2502_s20 = sld [smem:[#allocation4 + $0x38]]  ;;  %s2453_s21 = sld [smem:[#allocation4 + $0x7]] }
  0x3a   :  { %v248_v22 = vmax.f32 %v226_v11, %v233_v15  ;;  %v2777_v24 = vsub.s32 %v97_v16, %v2768_v12  ;;  %v164_v25 = vrot.slane %v163_v17, 2  ;;  %v170_v26 = vrot.slane %v169_v18, 2  ;;  %s2509_s22 = sld [smem:[#allocation4 + $0x3f]]  ;;  %s2460_s23 = sld [smem:[#allocation4 + $0xe]] }
  0x3b   :  { %v82_v27 = vrot.slane %v81_v19, 2  ;;  %v88_v28 = vrot.slane %v87_v20, 2  ;;  %v243_v29 = vrot.slane %v242_v21, 2  ;;  %v68_v31 = vrot.slane %v67_v23, 2  ;;  %s2516_s24 = sld [smem:[#allocation4 + $0x46]]  ;;  %s2467_s25 = sld [smem:[#allocation4 + $0x15]] }
  0x3c   :  { %v249_v30 = vrot.slane %v248_v22, 2  ;;  %v165_v32 = vmax.f32 %v163_v17, %v164_v25  ;;  %v171_v33 = vmax.f32 %v169_v18, %v170_v26  ;;  %v73_v35 = vadd.f32 %v72_v13, %v65_v8  ;;  %s2523_s26 = sld [smem:[#allocation4 + $0x4d]]  ;;  %s2474_s0 = sld [smem:[#allocation4 + $0x1c]] }
  0x3d   :  { %v83_v34 = vmax.f32 %v81_v19, %v82_v27  ;;  %v89_v36 = vmax.f32 %v87_v20, %v88_v28  ;;  %v244_v37 = vmax.f32 %v242_v21, %v243_v29  ;;  %v69_v39 = vadd.f32 %v68_v31, %v67_v23  ;;  %v2786_v20 = vld [vmem:[#allocation9 + $0x40] sm:$0xff]  ;;  %s2689_s27 = smov 112   ;;  %s2690_s28 = smov 96  }
  0x3e   :  { %v250_v38 = vmax.f32 %v248_v22, %v249_v30  ;;  %v166_v40 = vrot.slane %v165_v32, 1  ;;  %v172_v41 = vrot.slane %v171_v33, 1  ;;  %v74_v43 = vrot.slane %v73_v35, 2  ;;  %s2530_s29 = sld [smem:[#allocation4 + $0x54]]  ;;  %s2481_s30 = sld [smem:[#allocation4 + $0x23]] }
  0x3f   :  { %v84_v42 = vrot.slane %v83_v34, 1  ;;  %v90_v44 = vrot.slane %v89_v36, 1  ;;  %v245_v45 = vrot.slane %v244_v37, 1  ;;  %v70_v47 = vrot.slane %v69_v39, 1  ;;  %s2537_s5 = sld [smem:[#allocation4 + $0x5b]]  ;;  %s2488_s6 = sld [smem:[#allocation4 + $0x2a]] }
  0x40   :  { %v251_v46 = vrot.slane %v250_v38, 1  ;;  %v167_v50 = vmax.f32 %v165_v32, %v166_v40  ;;  %v173_v51 = vmax.f32 %v171_v33, %v172_v41  ;;  %v75_v53 = vadd.f32 %v74_v43, %v73_v35  ;;  %v2800_v43 = vld [vmem:[#allocation9 + $0x50] sm:$0xff]  ;;  %s2691_s7 = smov 80   ;;  %s2692_s8 = smov 64  }
  0x41   :  { %v85_v52 = vmax.f32 %v83_v34, %v84_v42  ;;  %v91_v54 = vmax.f32 %v89_v36, %v90_v44  ;;  %v246_v55 = vmax.f32 %v244_v37, %v245_v45  ;;  %v71_v57 = vadd.f32 %v70_v47, %v69_v39  ;;  %s2503_s9 = sld [smem:[#allocation4 + $0x39]]  ;;  %s2454_s10 = sld [smem:[#allocation4 + $0x8]] }
  0x42   :  { %v252_v56 = vmax.f32 %v250_v38, %v251_v46  ;;  %v201_v58 = vcombine.low %v167_v50, %v173_v51  ;;  %v76_v59 = vrot.slane %v75_v53, 1  ;;  %v312_v61 = vrot.slane %v2779_v49, 4  ;;  %s2510_s11 = sld [smem:[#allocation4 + $0x40]]  ;;  %s2461_s12 = sld [smem:[#allocation4 + $0xf]] }
  0x43   :  { %v122_v62 = vcombine.low %v85_v52, %v91_v54  ;;  %v78_v3 = vmul.f32 0.125, %v71_v57  ;;  %v228_v4 = vadd.f32 %v227_v14, %v225_v10  ;;  %v321_v9 = vmax.f32 %v304_v48, %v306_v60  ;;  %v2789_v10 = vld [vmem:[#allocation9 + $0x48] sm:$0xff]  ;;  %s2693_s13 = smov 48   ;;  %s2694_s14 = smov 32  }
  0x44   :  { %v280_v63 = vcombine.low %v246_v55, %v252_v56  ;;  %v208_v5 = vrot.slane %v201_v58, %v2777_v24  ;;  %v77_v8 = vadd.f32 %v76_v59, %v75_v53  ;;  %v327_v13 = vmax.f32 %v2779_v49, %v312_v61  ;;  %s2517_s16 = sld [smem:[#allocation4 + $0x47]]  ;;  %s2468_s17 = sld [smem:[#allocation4 + $0x16]] }
  0x45   :  { %v129_v16 = vrot.slane %v122_v62, %v2777_v24  ;;  %v229_v18 = vrot.slane %v228_v4, 2  ;;  %v234_v19 = vadd.f32 %v233_v15, %v226_v11  ;;  %v322_v23 = vrot.slane %v321_v9, 2 }
  0x46   :  { %v287_v17 = vrot.slane %v280_v63, %v2777_v24  ;;  %v215_v21 = vrot.slane %v208_v5, %v2777_v24  ;;  %v79_v22 = vmul.f32 0.125, %v77_v8  ;;  %v328_v25 = vrot.slane %v327_v13, 2 }
  0x47   :  { %v136_v14 = vrot.slane %v129_v16, %v2777_v24  ;;  %v230_v27 = vadd.f32 %v229_v18, %v228_v4  ;;  %v235_v28 = vrot.slane %v234_v19, 2  ;;  %v323_v11 = vmax.f32 %v321_v9, %v322_v23 }
  0x48   :  { %v294_v26 = vrot.slane %v287_v17, %v2777_v24  ;;  %216 = vrot.lane.b32.xlu1 %v215_v21, %s2685_s3  ;;  %v94_v29 = vcombine.low %v78_v3, %v79_v22  ;;  %v329_v15 = vmax.f32 %v327_v13, %v328_v25  ;;  %v385_v30 = vrot.slane %v2786_v20, 4 }
  0x49   :  { %137 = vrot.lane.b32.xlu0 %v136_v14, %s2685_s3  ;;  %v231_v31 = vrot.slane %v230_v27, 1  ;;  %v236_v32 = vadd.f32 %v235_v28, %v234_v19  ;;  %v391_v33 = vrot.slane %v2789_v10, 4  ;;  %v307_v34 = vadd.f32 %v306_v60, %v304_v48  ;;  %v2804_v48 = vld [vmem:[#allocation9 + $0x58] sm:$0xff] }
  0x4a   :  { %v101_v35 = vrot.slane %v94_v29, %v2777_v24  ;;  %v324_v36 = vrot.slane %v323_v11, 1  ;;  %v330_v37 = vrot.slane %v329_v15, 1  ;;  %v400_v38 = vmax.f32 %v2786_v20, %v385_v30 }
  0x4b   :  { %v232_v39 = vadd.f32 %v231_v31, %v230_v27  ;;  %v237_v40 = vrot.slane %v236_v32, 1  ;;  %v406_v41 = vmax.f32 %v2789_v10, %v391_v33  ;;  %v308_v42 = vrot.slane %v307_v34, 2 }
  0x4c   :  { %295 = vrot.lane.b32.xlu1 %v294_v26, %s2685_s3  ;;  %v108_v44 = vrot.slane %v101_v35, %v2777_v24  ;;  %v325_v45 = vmax.f32 %v323_v11, %v324_v36  ;;  %v331_v46 = vmax.f32 %v329_v15, %v330_v37  ;;  %v401_v47 = vrot.slane %v400_v38, 2 }
  0x4d   :  { %v238_v50 = vadd.f32 %v237_v40, %v236_v32  ;;  %v239_v51 = vmul.f32 0.125, %v232_v39  ;;  %v407_v52 = vrot.slane %v406_v41, 2  ;;  %v309_v53 = vadd.f32 %v308_v42, %v307_v34 }
  0x4e   :  { %109 = vrot.lane.b32.xlu0 %v108_v44, %s2685_s3  ;;  %v359_v54 = vcombine.low %v325_v45, %v331_v46  ;;  %v402_v55 = vmax.f32 %v400_v38, %v401_v47  ;;  %v313_v56 = vadd.f32 %v312_v61, %v2779_v49  ;;  %v464_v57 = vrot.slane %v2800_v43, 4 }
  0x4f   :  { %v240_v58 = vmul.f32 0.125, %v238_v50  ;;  %v408_v59 = vmax.f32 %v406_v41, %v407_v52  ;;  %v310_v60 = vrot.slane %v309_v53, 1  ;;  %v470_v62 = vrot.slane %v2804_v48, 4 }
  0x50   :  { %v366_v63 = vrot.slane %v359_v54, %v2777_v24  ;;  %v403_v3 = vrot.slane %v402_v55, 1  ;;  %v314_v4 = vrot.slane %v313_v56, 2  ;;  %v479_v5 = vmax.f32 %v2800_v43, %v464_v57 }
  0x51   :  { %v255_v8 = vcombine.low %v239_v51, %v240_v58  ;;  %v409_v9 = vrot.slane %v408_v59, 1  ;;  %v311_v13 = vadd.f32 %v310_v60, %v309_v53  ;;  %v485_v16 = vmax.f32 %v2804_v48, %v470_v62  ;;  %v541_v60 = vld [vmem:[#allocation9 + $0x60] sm:$0xff] }
  0x52   :  { %v373_v49 = vrot.slane %v366_v63, %v2777_v24  ;;  %v404_v61 = vmax.f32 %v402_v55, %v403_v3  ;;  %v315_v17 = vadd.f32 %v314_v4, %v313_v56  ;;  %v480_v18 = vrot.slane %v479_v5, 2  ;;  %v542_v63 = vld [vmem:[#allocation9 + $0x68] sm:$0xff] }
  0x53   :  { %v262_v19 = vrot.slane %v255_v8, %v2777_v24  ;;  %v410_v21 = vmax.f32 %v408_v59, %v409_v9  ;;  %v318_v22 = vmul.f32 0.125, %v311_v13  ;;  %v486_v23 = vrot.slane %v485_v16, 2  ;;  %v621_v8 = vld [vmem:[#allocation9 + $0x78] sm:$0xff] }
  0x54   :  { %374 = vrot.lane.b32.xlu1 %v373_v49, %s2685_s3  ;;  %v316_v25 = vrot.slane %v315_v17, 1  ;;  %v481_v14 = vmax.f32 %v479_v5, %v480_v18  ;;  %v386_v26 = vadd.f32 %v385_v30, %v2786_v20  ;;  %v392_v27 = vadd.f32 %v391_v33, %v2789_v10  ;;  %v620_v5 = vld [vmem:[#allocation9 + $0x70] sm:$0xff] }
  0x55   :  { %v269_v28 = vrot.slane %v262_v19, %v2777_v24  ;;  %v438_v29 = vcombine.low %v404_v61, %v410_v21  ;;  %v487_v11 = vmax.f32 %v485_v16, %v486_v23  ;;  %v149_v15 = vadd.f32 %v148_v6, %v2761_v1 }
  0x56   :  { %v317_v31 = vadd.f32 %v316_v25, %v315_v17  ;;  %v482_v32 = vrot.slane %v481_v14, 1  ;;  %v387_v34 = vrot.slane %v386_v26, 2  ;;  %v393_v35 = vrot.slane %v392_v27, 2 }
  0x57   :  { %270 = vrot.lane.b32.xlu0 %v269_v28, %s2685_s3  ;;  %v445_v36 = vrot.slane %v438_v29, %v2777_v24  ;;  %v488_v37 = vrot.slane %v487_v11, 1  ;;  %v150_v20 = vrot.slane %v149_v15, 2  ;;  %v155_v10 = vadd.f32 %v154_v7, %v2763_v2 }
  0x58   :  { %v319_v30 = vmul.f32 0.125, %v317_v31  ;;  %v483_v33 = vmax.f32 %v481_v14, %v482_v32  ;;  %v388_v38 = vadd.f32 %v387_v34, %v386_v26  ;;  %v394_v39 = vadd.f32 %v393_v35, %v392_v27 }
  0x59   :  { %v452_v1 = vrot.slane %v445_v36, %v2777_v24  ;;  %v489_v6 = vmax.f32 %v487_v11, %v488_v37  ;;  %v151_v40 = vadd.f32 %v150_v20, %v149_v15  ;;  %v156_v41 = vrot.slane %v155_v10, 2 }
  0x5a   :  { %v334_v42 = vcombine.low %v318_v22, %v319_v30  ;;  %v389_v44 = vrot.slane %v388_v38, 1  ;;  %v395_v45 = vrot.slane %v394_v39, 1  ;;  %v465_v46 = vadd.f32 %v464_v57, %v2800_v43 }
  0x5b   :  { %453 = vrot.lane.b32.xlu1 %v452_v1, %s2685_s3  ;;  %v517_v47 = vcombine.low %v483_v33, %v489_v6  ;;  %v152_v50 = vrot.slane %v151_v40, 1  ;;  %v157_v51 = vadd.f32 %v156_v41, %v155_v10  ;;  %v471_v2 = vadd.f32 %v470_v62, %v2804_v48 }
  0x5c   :  { %v341_v7 = vrot.slane %v334_v42, %v2777_v24  ;;  %v390_v52 = vadd.f32 %v389_v44, %v388_v38  ;;  %v396_v53 = vadd.f32 %v395_v45, %v394_v39  ;;  %v466_v54 = vrot.slane %v465_v46, 2 }
  0x5d   :  { %v524_v55 = vrot.slane %v517_v47, %v2777_v24  ;;  %v153_v56 = vadd.f32 %v152_v50, %v151_v40  ;;  %v158_v58 = vrot.slane %v157_v51, 1  ;;  %v472_v59 = vrot.slane %v471_v2, 2 }
  0x5e   :  { %v348_v43 = vrot.slane %v341_v7, %v2777_v24  ;;  %v397_v57 = vmul.f32 0.125, %v390_v52  ;;  %v398_v3 = vmul.f32 0.125, %v396_v53  ;;  %v467_v4 = vadd.f32 %v466_v54, %v465_v46 }
  0x5f   :  { %v531_v48 = vrot.slane %v524_v55, %v2777_v24  ;;  %v159_v62 = vadd.f32 %v158_v58, %v157_v51  ;;  %v160_v9 = vmul.f32 0.125, %v153_v56  ;;  %v473_v13 = vadd.f32 %v472_v59, %v471_v2 }
  0x60   :  { %349 = vrot.lane.b32.xlu0 %v348_v43, %s2685_s3  ;;  %v413_v16 = vcombine.low %v397_v57, %v398_v3  ;;  %v468_v49 = vrot.slane %v467_v4, 1  ;;  %v543_v61 = vrot.slane %v541_v60, 4  ;;  %v549_v17 = vrot.slane %v542_v63, 4 }
  0x61   :  { %532 = vrot.lane.b32.xlu1 %v531_v48, %s2685_s3  ;;  %v161_v18 = vmul.f32 0.125, %v159_v62  ;;  %v474_v19 = vrot.slane %v473_v13, 1  ;;  %v622_v21 = vrot.slane %v620_v5, 4  ;;  %v628_v22 = vrot.slane %v621_v8, 4 }
  0x62   :  { %v420_v23 = vrot.slane %v413_v16, %v2777_v24  ;;  %v469_v25 = vadd.f32 %v468_v49, %v467_v4  ;;  %v558_v14 = vmax.f32 %v541_v60, %v543_v61  ;;  %v564_v26 = vmax.f32 %v542_v63, %v549_v17 }
  0x63   :  { %v176_v27 = vcombine.low %v160_v9, %v161_v18  ;;  %v475_v28 = vadd.f32 %v474_v19, %v473_v13  ;;  %v544_v29 = vadd.f32 %v543_v61, %v541_v60  ;;  %v550_v11 = vadd.f32 %v549_v17, %v542_v63 }
  0x64   :  { %v427_v15 = vrot.slane %v420_v23, %v2777_v24  ;;  %v476_v31 = vmul.f32 0.125, %v469_v25  ;;  %v559_v32 = vrot.slane %v558_v14, 2  ;;  %v565_v34 = vrot.slane %v564_v26, 2 }
  0x65   :  { %v183_v35 = vrot.slane %v176_v27, %v2777_v24  ;;  %v477_v36 = vmul.f32 0.125, %v475_v28  ;;  %v545_v37 = vrot.slane %v544_v29, 2  ;;  %v551_v20 = vrot.slane %v550_v11, 2  ;;  %v705_v28 = vld [vmem:[#allocation8 + $0x8] sm:$0x7f] }
  0x66   :  { %428 = vrot.lane.b32.xlu0 %v427_v15, %s2685_s3  ;;  %v560_v10 = vmax.f32 %v558_v14, %v559_v32  ;;  %v566_v30 = vmax.f32 %v564_v26, %v565_v34  ;;  %v637_v33 = vmax.f32 %v620_v5, %v622_v21  ;;  %v643_v38 = vmax.f32 %v621_v8, %v628_v22  ;;  %v704_v32 = vld [vmem:[#allocation8] sm:$0x7f] }
  0x67   :  { %v190_v39 = vrot.slane %v183_v35, %v2777_v24  ;;  %v492_v1 = vcombine.low %v476_v31, %v477_v36  ;;  %v546_v6 = vadd.f32 %v545_v37, %v544_v29  ;;  %v552_v40 = vadd.f32 %v551_v20, %v550_v11 }
  0x68   :  { %v561_v41 = vrot.slane %v560_v10, 1  ;;  %v567_v42 = vrot.slane %v566_v30, 1  ;;  %v638_v44 = vrot.slane %v637_v33, 2  ;;  %v644_v45 = vrot.slane %v643_v38, 2 }
  0x69   :  { %191 = vrot.lane.b32.xlu1 %v190_v39, %s2685_s3  ;;  %v499_v46 = vrot.slane %v492_v1, %v2777_v24  ;;  %v547_v47 = vrot.slane %v546_v6, 1  ;;  %v553_v50 = vrot.slane %v552_v40, 1  ;;  %v623_v51 = vadd.f32 %v622_v21, %v620_v5 }
  0x6a   :  { %v562_v2 = vmax.f32 %v560_v10, %v561_v41  ;;  %v568_v7 = vmax.f32 %v566_v30, %v567_v42  ;;  %v639_v52 = vmax.f32 %v637_v33, %v638_v44  ;;  %v645_v53 = vmax.f32 %v643_v38, %v644_v45 }
  0x6b   :  { %v506_v54 = vrot.slane %v499_v46, %v2777_v24  ;;  %v548_v55 = vadd.f32 %v547_v47, %v546_v6  ;;  %v554_v56 = vadd.f32 %v553_v50, %v552_v40  ;;  %v624_v58 = vrot.slane %v623_v51, 2 }
  0x6c   :  { %v596_v59 = vcombine.low %v562_v2, %v568_v7  ;;  %v640_v60 = vrot.slane %v639_v52, 1  ;;  %v646_v63 = vrot.slane %v645_v53, 1  ;;  %v629_v43 = vadd.f32 %v628_v22, %v621_v8 }
  0x6d   :  { %507 = vrot.lane.b32.xlu0 %v506_v54, %s2685_s3  ;;  %v555_v57 = vmul.f32 0.125, %v548_v55  ;;  %v556_v3 = vmul.f32 0.125, %v554_v56  ;;  %v625_v4 = vadd.f32 %v624_v58, %v623_v51  ;;  %vm58_vm0 = vcmask 416768  }
  0x6e   :  { %v603_v5 = vrot.slane %v596_v59, %v2777_v24  ;;  %v641_v48 = vmax.f32 %v639_v52, %v640_v60  ;;  %v647_v62 = vmax.f32 %v645_v53, %v646_v63  ;;  %v630_v9 = vrot.slane %v629_v43, 2 }
  0x6f   :  { %v571_v13 = vcombine.low %v555_v57, %v556_v3  ;;  %v626_v16 = vrot.slane %v625_v4, 1  ;;  %v2686_v19 = vmov 0.0   ;;  %vm61_vm1 = vcmask 834968  }
  0x70   :  { %v610_v49 = vrot.slane %v603_v5, %v2777_v24  ;;  %v675_v61 = vcombine.low %v641_v48, %v647_v62  ;;  %v631_v17 = vadd.f32 %v630_v9, %v629_v43  ;;  %60 = vst.msk [vmem:[#allocation2 + $0x18] sm:$0xff] %vm58_vm0, %v2686_v19  ;;  %59 = vst.msk [vmem:[#allocation2] sm:$0xff] %vm58_vm0, %v2686_v19  ;;  %v2856_v27 = vsub.s32 1, %v2768_v12 }
  0x71   :  { %v578_v18 = vrot.slane %v571_v13, %v2777_v24  ;;  %v627_v8 = vadd.f32 %v626_v16, %v625_v4  ;;  %63 = vst.msk [vmem:[#allocation2 + $0x28] sm:$0xff] %vm61_vm1, %v2686_v19  ;;  %62 = vst.msk [vmem:[#allocation2 + $0x10] sm:$0xff] %vm61_vm1, %v2686_v19  ;;  %v2862_v31 = vsub.s32 2, %v2768_v12  ;;  %vm115_vm2 = vcmp.ge.s32.totalorder %v98_v0, 51 }
  0x72   :  { %611 = vrot.lane.b32.xlu1 %v610_v49, %s2685_s3  ;;  %v682_v21 = vrot.slane %v675_v61, %v2777_v24  ;;  %v632_v22 = vrot.slane %v631_v17, 1  ;;  %4008 = vst [vmem:[#allocation17_spill] sm:$0xff] %v2856_v27  ;;  %v1174_v11 = vrot.slane %v705_v28, %v2856_v27  ;;  %v1170_v37 = vrot.slane %v704_v32, %v2856_v27 }
  0x73   :  { %v585_v23 = vrot.slane %v578_v18, %v2777_v24  ;;  %v634_v26 = vmul.f32 0.125, %v627_v8  ;;  %4009 = vst [vmem:[#allocation18_spill] sm:$0xff] %v2862_v31  ;;  %v1387_v35 = vrot.slane %v704_v32, %v2862_v31  ;;  %v1391_v20 = vrot.slane %v705_v28, %v2862_v31 }
  0x74   :  { %v689_v25 = vrot.slane %v682_v21, %v2777_v24  ;;  %v633_v14 = vadd.f32 %v632_v22, %v631_v17  ;;  %vm116_vm3 = vcmp.lt.s32.totalorder %v98_v0, 307  ;;  %v818_v28 = vstv %s2502_s20  ;;  %s2531_s20 = sld [smem:[#allocation4 + $0x55]] }
  0x75   :  { %586 = vrot.lane.b32.xlu0 %v585_v23, %s2685_s3  ;;  %vm2872_vm4 = vmand %vm115_vm2, %vm116_vm3  ;;  %vm834_vm5 = vcmask 916480   ;;  %vm861_vm6 = vcmask 785408   ;;  %vm888_vm7 = vcmask 654336   ;;  %vm915_vm8 = vcmask 523264  }
  0x76   :  { %690 = vrot.lane.b32.xlu1 %v689_v25, %s2685_s3  ;;  %v635_v29 = vmul.f32 0.125, %v633_v14  ;;  %vm942_vm9 = vcmask 392192   ;;  %vm969_vm10 = vcmask 261120   ;;  %vm1181_vm11 = vcmask 7168  }
  0x77   :  { %vm1398_vm12 = vcmask 15360   ;;  %vm1615_vm13 = vcmask 23552   ;;  %vm1198_vm14 = vcmask 1039360   ;;  %vm1415_vm15 = vcmask 1031168  }
  0x78   :  { %v650_v15 = vcombine.low %v634_v26, %v635_v29  ;;  %v814_v29 = vstv %s2453_s21  ;;  %s2489_s21 = sld [smem:[#allocation4 + $0x2b]]  ;;  %vm2049_vm1 = vcmask 39936   ;;  %vm2266_vm2 = vcmask 48128  }
  0x79   :  { %vm1632_vm3 = vcmask 1022976  }
  0x7a   :  { %v657_v34 = vrot.slane %v650_v15, %v2777_v24  ;;  %1179 = vrot.lane.b32.xlu1 %v1174_v11, %s2687_s18 }
  0x7c   :  { %v664_v36 = vrot.slane %v657_v34, %v2777_v24  ;;  %v845_v34 = vstv %s2509_s22  ;;  %s2538_s22 = sld [smem:[#allocation4 + $0x5c]] }
  0x7e   :  { %665 = vrot.lane.b32.xlu0 %v664_v36, %s2685_s3  ;;  %1394 = vrot.lane.b32.xlu1 %v1387_v35, %s2688_s19  ;;  %s2524_s3 = sld [smem:[#allocation4 + $0x4e]] }
  0x82   :  { %1177 = vrot.lane.b32.xlu0 %v1170_v37, %s2687_s18  ;;  %s2475_s18 = sld [smem:[#allocation4 + $0x1d]] }
  0x86   :  { %1396 = vrot.lane.b32.xlu0 %v1391_v20, %s2688_s19  ;;  %v841_v20 = vstv %s2460_s23  ;;  %s2482_s19 = sld [smem:[#allocation4 + $0x24]]  ;;  %s2455_s23 = sld [smem:[#allocation4 + $0x9]] }
  0xba   :  { %v217_v10 = vpop.permute.xlu1 %216 }
  0xbb   :  { %v218_v24 = vrot.slane %v217_v10, 7  ;;  %v138_v33 = vpop.permute.xlu0 %137 }
  0xbc   :  { %v139_v38 = vrot.slane %v138_v33, 7 }
  0xbd   :  { %v219_v39 = vsel %vm58_vm0, %v218_v24, %v217_v10 }
  0xbe   :  { %222 = vst.msk [vmem:[#allocation2 + $0x19] ss:$8 sm:$0x7] %vm2872_vm4, %v219_v39  ;;  %v140_v1 = vsel %vm58_vm0, %v139_v38, %v138_v33  ;;  %v296_v6 = vpop.permute.xlu1 %295 }
  0xbf   :  { %143 = vst.msk [vmem:[#allocation2 + $0x18] ss:$8 sm:$0x7] %vm2872_vm4, %v140_v1  ;;  %v297_v0 = vrot.slane %v296_v6, 7 }
  0xc0   :  { %v110_v40 = vpop.permute.xlu0 %109 }
  0xc1   :  { %v298_v41 = vsel %vm58_vm0, %v297_v0, %v296_v6  ;;  %v111_v42 = vrot.slane %v110_v40, 7 }
  0xc2   :  { %301 = vst.msk [vmem:[#allocation2 + $0x1a] ss:$8 sm:$0x7] %vm2872_vm4, %v298_v41  ;;  %v872_v41 = vstv %s2516_s24  ;;  %s2504_s24 = sld [smem:[#allocation4 + $0x3a]] }
  0xc3   :  { %v112_v44 = vsel %vm58_vm0, %v111_v42, %v110_v40 }
  0xc4   :  { %118 = vst.msk [vmem:[#allocation2] ss:$8 sm:$0x7] %vm2872_vm4, %v112_v44 }
  0xc6   :  { %v375_v45 = vpop.permute.xlu1 %374 }
  0xc7   :  { %v376_v46 = vrot.slane %v375_v45, 7 }
  0xc9   :  { %v377_v47 = vsel %vm58_vm0, %v376_v46, %v375_v45  ;;  %v271_v50 = vpop.permute.xlu0 %270 }
  0xca   :  { %380 = vst.msk [vmem:[#allocation2 + $0x1b] ss:$8 sm:$0x7] %vm2872_vm4, %v377_v47  ;;  %v272_v51 = vrot.slane %v271_v50, 7  ;;  %v868_v47 = vstv %s2467_s25  ;;  %s2462_s25 = sld [smem:[#allocation4 + $0x10]] }
  0xcc   :  { %v273_v2 = vsel %vm58_vm0, %v272_v51, %v271_v50 }
  0xcd   :  { %276 = vst.msk [vmem:[#allocation2 + $0x2] ss:$8 sm:$0x7] %vm2872_vm4, %v273_v2  ;;  %v454_v7 = vpop.permute.xlu1 %453  ;;  %v899_v2 = vstv %s2523_s26  ;;  %s2511_s26 = sld [smem:[#allocation4 + $0x41]] }
  0xce   :  { %v455_v52 = vrot.slane %v454_v7, 7 }
  0xd0   :  { %v456_v53 = vsel %vm58_vm0, %v455_v52, %v454_v7 }
  0xd1   :  { %459 = vst.msk [vmem:[#allocation2 + $0x1c] ss:$8 sm:$0x7] %vm2872_vm4, %v456_v53 }
  0xd2   :  { %v350_v54 = vpop.permute.xlu0 %349 }
  0xd3   :  { %v351_v55 = vrot.slane %v350_v54, 7  ;;  %v533_v56 = vpop.permute.xlu1 %532 }
  0xd4   :  { %v534_v58 = vrot.slane %v533_v56, 7 }
  0xd5   :  { %v352_v59 = vsel %vm58_vm0, %v351_v55, %v350_v54  ;;  %v895_v55 = vstv %s2474_s0  ;;  %s2469_s0 = sld [smem:[#allocation4 + $0x17]] }
  0xd6   :  { %355 = vst.msk [vmem:[#allocation2 + $0x3] ss:$8 sm:$0x7] %vm2872_vm4, %v352_v59  ;;  %v535_v60 = vsel %vm58_vm0, %v534_v58, %v533_v56 }
  0xd7   :  { %538 = vst.msk [vmem:[#allocation2 + $0x1d] ss:$8 sm:$0x7] %vm2872_vm4, %v535_v60 }
  0xd8   :  { %v429_v63 = vpop.permute.xlu0 %428 }
  0xd9   :  { %v430_v43 = vrot.slane %v429_v63, 7 }
  0xdb   :  { %v431_v57 = vsel %vm58_vm0, %v430_v43, %v429_v63  ;;  %v192_v3 = vpop.permute.xlu1 %191 }
  0xdc   :  { %434 = vst.msk [vmem:[#allocation2 + $0x4] ss:$8 sm:$0x7] %vm2872_vm4, %v431_v57  ;;  %v193_v4 = vrot.slane %v192_v3, 7 }
  0xde   :  { %v194_v5 = vsel %vm58_vm0, %v193_v4, %v192_v3  ;;  %v926_v4 = vstv %s2530_s29  ;;  %s2518_s29 = sld [smem:[#allocation4 + $0x48]] }
  0xdf   :  { %197 = vst.msk [vmem:[#allocation2 + $0x1] ss:$8 sm:$0x7] %vm2872_vm4, %v194_v5  ;;  %v508_v48 = vpop.permute.xlu0 %507 }
  0xe0   :  { %v509_v62 = vrot.slane %v508_v48, 7 }
  0xe2   :  { %v510_v9 = vsel %vm58_vm0, %v509_v62, %v508_v48 }
  0xe3   :  { %513 = vst.msk [vmem:[#allocation2 + $0x5] ss:$8 sm:$0x7] %vm2872_vm4, %v510_v9 }
  0xe4   :  { %v612_v13 = vpop.permute.xlu1 %611 }
  0xe5   :  { %v613_v16 = vrot.slane %v612_v13, 7 }
  0xe7   :  { %v614_v49 = vsel %vm58_vm0, %v613_v16, %v612_v13  ;;  %v587_v61 = vpop.permute.xlu0 %586  ;;  %v922_v13 = vstv %s2481_s30  ;;  %s2476_s30 = sld [smem:[#allocation4 + $0x1e]] }
  0xe8   :  { %617 = vst.msk [vmem:[#allocation2 + $0x1e] ss:$8 sm:$0x7] %vm2872_vm4, %v614_v49  ;;  %v588_v17 = vrot.slane %v587_v61, 7  ;;  %v691_v18 = vpop.permute.xlu1 %690 }
  0xe9   :  { %v692_v8 = vrot.slane %v691_v18, 7 }
  0xea   :  { %v589_v19 = vsel %vm58_vm0, %v588_v17, %v587_v61  ;;  %v953_v61 = vstv %s2537_s5  ;;  %s2525_s5 = sld [smem:[#allocation4 + $0x4f]] }
  0xeb   :  { %592 = vst.msk [vmem:[#allocation2 + $0x6] ss:$8 sm:$0x7] %vm2872_vm4, %v589_v19  ;;  %v693_v21 = vsel %vm58_vm0, %v692_v8, %v691_v18 }
  0xec   :  { %696 = vst.msk [vmem:[#allocation2 + $0x1f] ss:$8 sm:$0x7] %vm2872_vm4, %v693_v21  ;;  %v949_v21 = vstv %s2488_s6  ;;  %s2483_s6 = sld [smem:[#allocation4 + $0x25]] }
  0xf0   :  { %v666_v22 = vpop.permute.xlu0 %665 }
  0xf1   :  { %v667_v23 = vrot.slane %v666_v22, 7 }
  0xf3   :  { %v668_v25 = vsel %vm58_vm0, %v667_v23, %v666_v22  ;;  %v2924_v14 = vld [vmem:[#allocation2 + $0x18] sm:$0xff]  ;;  %v2926_v26 = vld [vmem:[#allocation2 + $0x20] sm:$0xff]  ;;  %v2928_v11 = vld [vmem:[#allocation2 + $0x28] sm:$0xff]  ;;  %vm1832_vm0 = vcmask 31744  }
  0xf4   :  { %671 = vst.msk [vmem:[#allocation2 + $0x7] ss:$8 sm:$0x7] %vm2872_vm4, %v668_v25  ;;  %v820_v15 = vmul.f32 %v818_v28, %v2926_v26  ;;  %v819_v32 = vmul.f32 %v818_v28, %v2924_v14  ;;  %v846_v24 = vmul.f32 %v845_v34, %v2924_v14  ;;  %v821_v33 = vmul.f32 %v818_v28, %v2928_v11 }
  0xf5   :  { %v848_v0 = vmul.f32 %v845_v34, %v2928_v11  ;;  %v847_v40 = vmul.f32 %v845_v34, %v2926_v26  ;;  %v874_v50 = vmul.f32 %v872_v41, %v2926_v26  ;;  %v873_v51 = vmul.f32 %v872_v41, %v2924_v14 }
  0xf6   :  { %v900_v56 = vmul.f32 %v899_v2, %v2924_v14  ;;  %v875_v58 = vmul.f32 %v872_v41, %v2928_v11  ;;  %v902_v57 = vmul.f32 %v899_v2, %v2928_v11  ;;  %v901_v3 = vmul.f32 %v899_v2, %v2926_v26 }
  0xf7   :  { %v928_v16 = vmul.f32 %v926_v4, %v2926_v26  ;;  %v927_v49 = vmul.f32 %v926_v4, %v2924_v14  ;;  %v954_v22 = vmul.f32 %v953_v61, %v2924_v14  ;;  %v929_v23 = vmul.f32 %v926_v4, %v2928_v11 }
  0xf8   :  { %v955_v34 = vmul.f32 %v953_v61, %v2926_v26  ;;  %vm1849_vm4 = vcmask 1014784  }
  0xfb   :  { %v2932_v35 = vld [vmem:[#allocation2] sm:$0xff]  ;;  %v2934_v36 = vld [vmem:[#allocation2 + $0x8] sm:$0xff]  ;;  %v2936_v37 = vld [vmem:[#allocation2 + $0x10] sm:$0xff] }
  0xfc   :  { %v816_v10 = vmul.f32 %v814_v29, %v2934_v36  ;;  %v815_v30 = vmul.f32 %v814_v29, %v2932_v35  ;;  %v842_v1 = vmul.f32 %v841_v20, %v2932_v35  ;;  %v817_v6 = vmul.f32 %v814_v29, %v2936_v37 }
  0xfd   :  { %v844_v45 = vmul.f32 %v841_v20, %v2936_v37  ;;  %v843_v46 = vmul.f32 %v841_v20, %v2934_v36  ;;  %v870_v53 = vmul.f32 %v868_v47, %v2934_v36  ;;  %v869_v54 = vmul.f32 %v868_v47, %v2932_v35 }
  0xfe   :  { %v823_v38 = vadd.f32 %v820_v15, %v816_v10  ;;  %v822_v39 = vadd.f32 %v819_v32, %v815_v30  ;;  %v849_v42 = vadd.f32 %v846_v24, %v842_v1  ;;  %v824_v44 = vadd.f32 %v821_v33, %v817_v6 }
  0xff   :  { %v851_v7 = vadd.f32 %v848_v0, %v844_v45  ;;  %v850_v52 = vadd.f32 %v847_v40, %v843_v46  ;;  %v877_v59 = vadd.f32 %v874_v50, %v870_v53  ;;  %v876_v60 = vadd.f32 %v873_v51, %v869_v54 }
 0x100   :  { %830 = vrot.lane.b32.xlu1 %v823_v38, %s2689_s27  ;;  %828 = vrot.lane.b32.xlu0 %v822_v39, %s2689_s27  ;;  %v896_v63 = vmul.f32 %v895_v55, %v2932_v35  ;;  %v871_v43 = vmul.f32 %v868_v47, %v2936_v37  ;;  %v898_v62 = vmul.f32 %v895_v55, %v2936_v37  ;;  %v1003_v20 = vstv %s2503_s9  ;;  %s2532_s9 = sld [smem:[#allocation4 + $0x56]] }
 0x101   :  { %v897_v9 = vmul.f32 %v895_v55, %v2934_v36  ;;  %v924_v8 = vmul.f32 %v922_v13, %v2934_v36  ;;  %v923_v19 = vmul.f32 %v922_v13, %v2932_v35  ;;  %v950_v29 = vmul.f32 %v949_v21, %v2932_v35 }
 0x102   :  { %v903_v5 = vadd.f32 %v900_v56, %v896_v63  ;;  %v878_v48 = vadd.f32 %v875_v58, %v871_v43  ;;  %v905_v17 = vadd.f32 %v902_v57, %v898_v62  ;;  %v925_v15 = vmul.f32 %v922_v13, %v2936_v37 }
 0x103   :  { %v904_v18 = vadd.f32 %v901_v3, %v897_v9  ;;  %v931_v25 = vadd.f32 %v928_v16, %v924_v8  ;;  %v930_v28 = vadd.f32 %v927_v49, %v923_v19  ;;  %v956_v32 = vmul.f32 %v953_v61, %v2928_v11 }
 0x104   :  { %855 = vrot.lane.b32.xlu1 %v849_v42, %s2690_s28  ;;  %832 = vrot.lane.b32.xlu0 %v824_v44, %s2689_s27  ;;  %v957_v10 = vadd.f32 %v954_v22, %v950_v29  ;;  %v932_v30 = vadd.f32 %v929_v23, %v925_v15  ;;  %v952_v24 = vmul.f32 %v949_v21, %v2936_v37  ;;  %v999_v38 = vstv %s2454_s10  ;;  %s2490_s10 = sld [smem:[#allocation4 + $0x2c]] }
 0x105   :  { %v951_v33 = vmul.f32 %v949_v21, %v2934_v36  ;;  %v1005_v39 = vmul.f32 %v1003_v20, %v2926_v26  ;;  %v1004_v1 = vmul.f32 %v1003_v20, %v2924_v14  ;;  %v1031_v6 = vstv %s2510_s11  ;;  %s2539_s11 = sld [smem:[#allocation4 + $0x5d]] }
 0x106   :  { %v959_v0 = vadd.f32 %v956_v32, %v952_v24  ;;  %v1001_v41 = vmul.f32 %v999_v38, %v2934_v36  ;;  %v1000_v42 = vmul.f32 %v999_v38, %v2932_v35  ;;  %v1027_v44 = vstv %s2461_s12  ;;  %s2456_s12 = sld [smem:[#allocation4 + $0xa]] }
 0x107   :  { %v958_v40 = vadd.f32 %v955_v34, %v951_v33  ;;  %v1032_v45 = vmul.f32 %v1031_v6, %v2924_v14  ;;  %v1006_v46 = vmul.f32 %v1003_v20, %v2928_v11  ;;  %v1028_v51 = vmul.f32 %v1027_v44, %v2932_v35 }
 0x108   :  { %859 = vrot.lane.b32.xlu1 %v851_v7, %s2690_s28  ;;  %857 = vrot.lane.b32.xlu0 %v850_v52, %s2690_s28  ;;  %v1008_v47 = vadd.f32 %v1005_v39, %v1001_v41  ;;  %v1007_v50 = vadd.f32 %v1004_v1, %v1000_v42  ;;  %v1002_v2 = vmul.f32 %v999_v38, %v2936_v37  ;;  %v1059_v53 = vstv %s2517_s16  ;;  %s2505_s16 = sld [smem:[#allocation4 + $0x3b]] }
 0x109   :  { %v1034_v7 = vmul.f32 %v1031_v6, %v2928_v11  ;;  %v1033_v52 = vmul.f32 %v1031_v6, %v2926_v26  ;;  %v1035_v54 = vadd.f32 %v1032_v45, %v1028_v51  ;;  %v1030_v56 = vmul.f32 %v1027_v44, %v2936_v37 }
 0x10a   :  { %v1009_v55 = vadd.f32 %v1006_v46, %v1002_v2  ;;  %v1029_v58 = vmul.f32 %v1027_v44, %v2934_v36  ;;  %v1060_v63 = vmul.f32 %v1059_v53, %v2924_v14  ;;  %v1087_v43 = vstv %s2524_s3  ;;  %s2512_s3 = sld [smem:[#allocation4 + $0x42]] }
 0x10b   :  { %v1037_v57 = vadd.f32 %v1034_v7, %v1030_v56  ;;  %v1088_v62 = vmul.f32 %v1087_v43, %v2924_v14  ;;  %v1062_v9 = vmul.f32 %v1059_v53, %v2928_v11  ;;  %v1111_v8 = vstv %s2482_s19  ;;  %s2519_s19 = sld [smem:[#allocation4 + $0x49]] }
 0x10c   :  { %884 = vrot.lane.b32.xlu1 %v877_v59, %s2691_s7  ;;  %882 = vrot.lane.b32.xlu0 %v876_v60, %s2691_s7  ;;  %v1055_v59 = vstv %s2468_s17  ;;  %v1061_v60 = vmul.f32 %v1059_v53, %v2926_v26  ;;  %v1036_v3 = vadd.f32 %v1033_v52, %v1029_v58  ;;  %v1115_v19 = vstv %s2531_s20  ;;  %s2463_s17 = sld [smem:[#allocation4 + $0x11]]  ;;  %s2457_s20 = sld [smem:[#allocation4 + $0xb]] }
 0x10d   :  { %v1057_v4 = vmul.f32 %v1055_v59, %v2934_v36  ;;  %v1058_v61 = vmul.f32 %v1055_v59, %v2936_v37  ;;  %v1117_v29 = vmul.f32 %v1115_v19, %v2926_v26  ;;  %v1112_v15 = vmul.f32 %v1111_v8, %v2932_v35 }
 0x10e   :  { %v1116_v32 = vmul.f32 %v1115_v19, %v2924_v14  ;;  %v1114_v1 = vmul.f32 %v1111_v8, %v2936_v37  ;;  %v1118_v6 = vmul.f32 %v1115_v19, %v2928_v11  ;;  %v1216_v41 = vstv %s2455_s23  ;;  %s2513_s23 = sld [smem:[#allocation4 + $0x43]] }
 0x10f   :  { %v1064_v13 = vadd.f32 %v1061_v60, %v1057_v4  ;;  %v1065_v22 = vadd.f32 %v1062_v9, %v1058_v61  ;;  %v1220_v42 = vstv %s2504_s24  ;;  %v1218_v52 = vmul.f32 %v1216_v41, %v2934_v36  ;;  %s2458_s24 = sld [smem:[#allocation4 + $0xc]] }
 0x110   :  { %909 = vrot.lane.b32.xlu1 %v903_v5, %s2692_s8  ;;  %886 = vrot.lane.b32.xlu0 %v878_v48, %s2691_s7  ;;  %v1056_v5 = vmul.f32 %v1055_v59, %v2932_v35  ;;  %v1083_v48 = vstv %s2475_s18  ;;  %v1119_v33 = vadd.f32 %v1116_v32, %v1112_v15  ;;  %v1121_v45 = vadd.f32 %v1118_v6, %v1114_v1  ;;  %s2470_s18 = sld [smem:[#allocation4 + $0x18]] }
 0x111   :  { %v1084_v49 = vmul.f32 %v1083_v48, %v2932_v35  ;;  %v1086_v23 = vmul.f32 %v1083_v48, %v2936_v37  ;;  %v1221_v51 = vmul.f32 %v1220_v42, %v2924_v14  ;;  %v1222_v53 = vmul.f32 %v1220_v42, %v2926_v26 }
 0x112   :  { %v1063_v16 = vadd.f32 %v1060_v63, %v1056_v5  ;;  %v1219_v58 = vmul.f32 %v1216_v41, %v2936_v37  ;;  %v1223_v60 = vmul.f32 %v1220_v42, %v2928_v11  ;;  %v1272_v4 = vstv %s2469_s0  ;;  %s2526_s0 = sld [smem:[#allocation4 + $0x50]] }
 0x113   :  { %v1091_v21 = vadd.f32 %v1088_v62, %v1084_v49  ;;  %v1225_v59 = vadd.f32 %v1222_v53, %v1218_v52  ;;  %v1273_v49 = vmul.f32 %v1272_v4, %v2932_v35  ;;  %v1300_v19 = vstv %s2476_s30  ;;  %s2520_s30 = sld [smem:[#allocation4 + $0x4a]] }
 0x114   :  { %913 = vrot.lane.b32.xlu1 %v905_v17, %s2692_s8  ;;  %911 = vrot.lane.b32.xlu0 %v904_v18, %s2692_s8  ;;  %v1090_v17 = vmul.f32 %v1087_v43, %v2928_v11  ;;  %v1089_v18 = vmul.f32 %v1087_v43, %v2926_v26  ;;  %v1226_v5 = vadd.f32 %v1223_v60, %v1219_v58  ;;  %v1356_v42 = vstv %s2490_s10  ;;  %s2508_s10 = sld [smem:[#allocation4 + $0x3e]] }
 0x115   :  { %v1302_v32 = vmul.f32 %v1300_v19, %v2934_v36  ;;  %v1358_v52 = vmul.f32 %v1356_v42, %v2934_v36  ;;  %v1433_v53 = vstv %s2456_s12  ;;  %v1359_v58 = vmul.f32 %v1356_v42, %v2936_v37  ;;  %s2533_s12 = sld [smem:[#allocation4 + $0x57]] }
 0x116   :  { %v1093_v34 = vadd.f32 %v1090_v17, %v1086_v23  ;;  %v1435_v60 = vmul.f32 %v1433_v53, %v2934_v36 }
 0x118   :  { %938 = vrot.lane.b32.xlu1 %v931_v25, %s2693_s13  ;;  %936 = vrot.lane.b32.xlu0 %v930_v28, %s2693_s13  ;;  %v1085_v25 = vmul.f32 %v1083_v48, %v2934_v36  ;;  %v1113_v28 = vmul.f32 %v1111_v8, %v2934_v36 }
 0x11a   :  { %v1092_v20 = vadd.f32 %v1089_v18, %v1085_v25  ;;  %v1120_v24 = vadd.f32 %v1117_v29, %v1113_v28  ;;  %v1274_v18 = vmul.f32 %v1272_v4, %v2934_v36  ;;  %v1301_v29 = vmul.f32 %v1300_v19, %v2932_v35 }
 0x11c   :  { %963 = vrot.lane.b32.xlu1 %v957_v10, %s2694_s14  ;;  %940 = vrot.lane.b32.xlu0 %v932_v30, %s2693_s13  ;;  %v1139_v10 = vstv %s2489_s21  ;;  %v1143_v30 = vstv %s2538_s22  ;;  %s2506_s21 = sld [smem:[#allocation4 + $0x3c]]  ;;  %s2464_s22 = sld [smem:[#allocation4 + $0x12]] }
 0x11d   :  { %v1140_v38 = vmul.f32 %v1139_v10, %v2932_v35  ;;  %v1144_v39 = vmul.f32 %v1143_v30, %v2924_v14  ;;  %v1141_v46 = vmul.f32 %v1139_v10, %v2934_v36 }
 0x11f   :  { %v1147_v44 = vadd.f32 %v1144_v39, %v1140_v38  ;;  %v1332_v38 = vstv %s2532_s9  ;;  %s2459_s9 = sld [smem:[#allocation4 + $0xd]] }
 0x120   :  { %967 = vrot.lane.b32.xlu1 %v959_v0, %s2694_s14  ;;  %965 = vrot.lane.b32.xlu0 %v958_v40, %s2694_s14  ;;  %v1142_v0 = vmul.f32 %v1139_v10, %v2936_v37  ;;  %v1146_v40 = vmul.f32 %v1143_v30, %v2928_v11 }
 0x122   :  { %v1149_v2 = vadd.f32 %v1146_v40, %v1142_v0  ;;  %v1333_v0 = vmul.f32 %v1332_v38, %v2924_v14 }
 0x124   :  { %1015 = vrot.lane.b32.xlu1 %v1008_v47, %s2689_s27  ;;  %1013 = vrot.lane.b32.xlu0 %v1007_v50, %s2689_s27  ;;  %v1145_v47 = vmul.f32 %v1143_v30, %v2926_v26  ;;  %v1217_v50 = vmul.f32 %v1216_v41, %v2932_v35  ;;  %v1334_v41 = vmul.f32 %v1332_v38, %v2926_v26 }
 0x126   :  { %v1148_v7 = vadd.f32 %v1145_v47, %v1141_v46  ;;  %v1224_v56 = vadd.f32 %v1221_v51, %v1217_v50  ;;  %v1335_v46 = vmul.f32 %v1332_v38, %v2928_v11  ;;  %v1357_v51 = vmul.f32 %v1356_v42, %v2932_v35 }
 0x128   :  { %1041 = vrot.lane.b32.xlu1 %v1035_v54, %s2690_s28  ;;  %1017 = vrot.lane.b32.xlu0 %v1009_v55, %s2689_s27  ;;  %v1244_v54 = vstv %s2462_s25  ;;  %v1248_v55 = vstv %s2511_s26  ;;  %s2507_s25 = sld [smem:[#allocation4 + $0x3d]]  ;;  %s2477_s26 = sld [smem:[#allocation4 + $0x1f]] }
 0x129   :  { %v1245_v63 = vmul.f32 %v1244_v54, %v2932_v35  ;;  %v1249_v43 = vmul.f32 %v1248_v55, %v2924_v14  ;;  %v1247_v62 = vmul.f32 %v1244_v54, %v2936_v37  ;;  %v1251_v9 = vmul.f32 %v1248_v55, %v2928_v11 }
 0x12b   :  { %v1252_v48 = vadd.f32 %v1249_v43, %v1245_v63  ;;  %v1254_v61 = vadd.f32 %v1251_v9, %v1247_v62  ;;  %v1461_v43 = vstv %s2463_s17  ;;  %v1465_v9 = vstv %s2512_s3  ;;  %s2527_s17 = sld [smem:[#allocation4 + $0x51]]  ;;  %s2472_s3 = sld [smem:[#allocation4 + $0x1a]] }
 0x12c   :  { %1045 = vrot.lane.b32.xlu1 %v1037_v57, %s2690_s28  ;;  %1043 = vrot.lane.b32.xlu0 %v1036_v3, %s2690_s28  ;;  %v1246_v57 = vmul.f32 %v1244_v54, %v2934_v36  ;;  %v1250_v3 = vmul.f32 %v1248_v55, %v2926_v26  ;;  %v1437_v54 = vstv %s2505_s16  ;;  %s2478_s16 = sld [smem:[#allocation4 + $0x20]] }
 0x12d   :  { %v1439_v63 = vmul.f32 %v1437_v54, %v2926_v26  ;;  %v1438_v62 = vmul.f32 %v1437_v54, %v2924_v14 }
 0x130   :  { %1071 = vrot.lane.b32.xlu1 %v1064_v13, %s2691_s7  ;;  %1069 = vrot.lane.b32.xlu0 %v1063_v16, %s2691_s7  ;;  %v1276_v13 = vstv %s2518_s29  ;;  %v1253_v16 = vadd.f32 %v1250_v3, %v1246_v57  ;;  %s2471_s29 = sld [smem:[#allocation4 + $0x19]] }
 0x131   :  { %v1277_v17 = vmul.f32 %v1276_v13, %v2924_v14  ;;  %v1278_v8 = vmul.f32 %v1276_v13, %v2926_v26  ;;  %v1279_v23 = vmul.f32 %v1276_v13, %v2928_v11  ;;  %v1442_v13 = vadd.f32 %v1439_v63, %v1435_v60 }
 0x132   :  { %v1867_v63 = vstv %s2458_s24  ;;  %s3312_s24 = sld [smem:[#allocation4 + $0x1]] }
 0x133   :  { %v1280_v25 = vadd.f32 %v1277_v17, %v1273_v49  ;;  %v1281_v28 = vadd.f32 %v1278_v8, %v1274_v18  ;;  %v1436_v17 = vmul.f32 %v1433_v53, %v2936_v37  ;;  %v1440_v18 = vmul.f32 %v1437_v54, %v2928_v11 }
 0x134   :  { %1097 = vrot.lane.b32.xlu1 %v1091_v21, %s2692_s8  ;;  %1073 = vrot.lane.b32.xlu0 %v1065_v22, %s2691_s7  ;;  %v1304_v21 = vstv %s2525_s5  ;;  %v1275_v22 = vmul.f32 %v1272_v4, %v2936_v37  ;;  %v3098_v4 = vpop.permute.xlu1 %1179  ;;  %s2465_s5 = sld [smem:[#allocation4 + $0x13]] }
 0x135   :  { %v1305_v15 = vmul.f32 %v1304_v21, %v2924_v14  ;;  %4012 = vst [vmem:[#allocation19_spill] sm:$0xff] %v3098_v4 }
 0x136   :  { %v1282_v10 = vadd.f32 %v1279_v23, %v1275_v22  ;;  %v1468_v22 = vmul.f32 %v1465_v9, %v2928_v11  ;;  %v1463_v23 = vmul.f32 %v1461_v43, %v2934_v36 }
 0x137   :  { %v1308_v30 = vadd.f32 %v1305_v15, %v1301_v29  ;;  %v1443_v29 = vadd.f32 %v1440_v18, %v1436_v17  ;;  %v1489_v15 = vstv %s2470_s18  ;;  %s2521_s18 = sld [smem:[#allocation4 + $0x4b]] }
 0x138   :  { %1101 = vrot.lane.b32.xlu1 %v1093_v34, %s2692_s8  ;;  %1099 = vrot.lane.b32.xlu0 %v1092_v20, %s2692_s8  ;;  %v1306_v34 = vmul.f32 %v1304_v21, %v2926_v26  ;;  %v1328_v20 = vstv %s2483_s6  ;;  %v3112_v8 = vpop.permute.xlu1 %1394  ;;  %v1491_v38 = vmul.f32 %v1489_v15, %v2934_v36  ;;  %s2514_s6 = sld [smem:[#allocation4 + $0x44]]  ;;  %v988_v27 = vstv %s3312_s24  ;;  %s3686_s24 = sld [smem:[#allocation4 + $0x5a]] }
 0x139   :  { %v1329_v1 = vmul.f32 %v1328_v20, %v2932_v35  ;;  %v1330_v40 = vmul.f32 %v1328_v20, %v2934_v36  ;;  %4014 = vst [vmem:[#allocation21_spill] sm:$0xff] %v3112_v8 }
 0x13a   :  { %v1309_v39 = vadd.f32 %v1306_v34, %v1302_v32  ;;  %v1493_v32 = vstv %s2519_s19  ;;  %s2466_s19 = sld [smem:[#allocation4 + $0x14]] }
 0x13b   :  { %v1336_v47 = vadd.f32 %v1333_v0, %v1329_v1  ;;  %v1337_v50 = vadd.f32 %v1334_v41, %v1330_v40  ;;  %v1490_v1 = vmul.f32 %v1489_v15, %v2932_v35 }
 0x13c   :  { %1127 = vrot.lane.b32.xlu1 %v1120_v24, %s2693_s13  ;;  %1125 = vrot.lane.b32.xlu0 %v1119_v33, %s2693_s13  ;;  %v1303_v24 = vmul.f32 %v1300_v19, %v2936_v37  ;;  %v1307_v33 = vmul.f32 %v1304_v21, %v2928_v11  ;;  %v1464_v21 = vmul.f32 %v1461_v43, %v2936_v37 }
 0x13e   :  { %v1310_v6 = vadd.f32 %v1307_v33, %v1303_v24  ;;  %v1471_v34 = vadd.f32 %v1468_v22, %v1464_v21 }
 0x140   :  { %1153 = vrot.lane.b32.xlu1 %v1147_v44, %s2694_s14  ;;  %1129 = vrot.lane.b32.xlu0 %v1121_v45, %s2693_s13  ;;  %v1360_v44 = vstv %s2539_s11  ;;  %v1331_v45 = vmul.f32 %v1328_v20, %v2936_v37  ;;  %s2484_s11 = sld [smem:[#allocation4 + $0x26]] }
 0x144   :  { %1157 = vrot.lane.b32.xlu1 %v1149_v2, %s2694_s14  ;;  %1155 = vrot.lane.b32.xlu0 %v1148_v7, %s2694_s14  ;;  %v1361_v2 = vmul.f32 %v1360_v44, %v2924_v14  ;;  %v1338_v7 = vadd.f32 %v1335_v46, %v1331_v45 }
 0x146   :  { %v1364_v55 = vadd.f32 %v1361_v2, %v1357_v51  ;;  %v1496_v51 = vmul.f32 %v1493_v32, %v2928_v11  ;;  %v1678_v2 = vstv %s2464_s22  ;;  %s3295_s22 = sld [smem:[#allocation4 + $0x27]] }
 0x147   :  { %v1680_v60 = vmul.f32 %v1678_v2, %v2934_v36  ;;  %v1681_v22 = vmul.f32 %v1678_v2, %v2936_v37 }
 0x148   :  { %1230 = vrot.lane.b32.xlu1 %v1224_v56, %s2689_s27  ;;  %1232 = vrot.lane.b32.xlu0 %v1225_v59, %s2689_s27  ;;  %v1362_v56 = vmul.f32 %v1360_v44, %v2926_v26  ;;  %v1363_v59 = vmul.f32 %v1360_v44, %v2928_v11 }
 0x14a   :  { %v1365_v57 = vadd.f32 %v1362_v56, %v1358_v52  ;;  %v1366_v3 = vadd.f32 %v1363_v59, %v1359_v58  ;;  %v1682_v58 = vstv %s2513_s23  ;;  %s3308_s23 = sld [smem:[#allocation4 + $0x58]] }
 0x14c   :  { %1234 = vrot.lane.b32.xlu1 %v1226_v5, %s2689_s27  ;;  %1258 = vrot.lane.b32.xlu0 %v1252_v48, %s2690_s28  ;;  %v3100_v5 = vpop.permute.xlu0 %1177  ;;  %v1434_v48 = vmul.f32 %v1433_v53, %v2932_v35 }
 0x14d   :  { %4013 = vst [vmem:[#allocation20_spill] sm:$0xff] %v3100_v5 }
 0x14e   :  { %v1441_v49 = vadd.f32 %v1438_v62, %v1434_v48  ;;  %v1684_v62 = vmul.f32 %v1682_v58, %v2926_v26 }
 0x150   :  { %1260 = vrot.lane.b32.xlu1 %v1253_v16, %s2690_s28  ;;  %1262 = vrot.lane.b32.xlu0 %v1254_v61, %s2690_s28  ;;  %v1462_v16 = vmul.f32 %v1461_v43, %v2932_v35  ;;  %v1466_v61 = vmul.f32 %v1465_v9, %v2924_v14  ;;  %v3114_v19 = vpop.permute.xlu0 %1396  ;;  %v1871_v43 = vstv %s2507_s25  ;;  %v1687_v18 = vadd.f32 %v1684_v62, %v1680_v60  ;;  %s3314_s25 = sld [smem:[#allocation4 + $0x32]] }
 0x151   :  { %4015 = vst [vmem:[#allocation22_spill] sm:$0xff] %v3114_v19  ;;  %v1766_v31 = vstv %s3308_s23  ;;  %s3677_s23 = sld [smem:[#allocation4 + $0x29]] }
 0x154   :  { %1286 = vrot.lane.b32.xlu1 %v1280_v25, %s2691_s7  ;;  %1288 = vrot.lane.b32.xlu0 %v1281_v28, %s2691_s7  ;;  %v1467_v25 = vmul.f32 %v1465_v9, %v2926_v26  ;;  %v1469_v28 = vadd.f32 %v1466_v61, %v1462_v16  ;;  %v1679_v9 = vmul.f32 %v1678_v2, %v2932_v35 }
 0x155   :  { %v1868_v16 = vmul.f32 %v1867_v63, %v2932_v35 }
 0x156   :  { %v1470_v20 = vadd.f32 %v1467_v25, %v1463_v23  ;;  %v1685_v23 = vmul.f32 %v1682_v58, %v2928_v11 }
 0x158   :  { %1290 = vrot.lane.b32.xlu1 %v1282_v10, %s2691_s7  ;;  %1314 = vrot.lane.b32.xlu0 %v1308_v30, %s2692_s8  ;;  %v1650_v10 = vstv %s2457_s20  ;;  %v1654_v30 = vstv %s2506_s21  ;;  %s2515_s20 = sld [smem:[#allocation4 + $0x45]]  ;;  %s3280_s21 = sld [smem:[#allocation4 + $0x5e]] }
 0x159   :  { %v1652_v0 = vmul.f32 %v1650_v10, %v2934_v36  ;;  %v1656_v40 = vmul.f32 %v1654_v30, %v2926_v26  ;;  %v1651_v46 = vmul.f32 %v1650_v10, %v2932_v35  ;;  %v1657_v56 = vmul.f32 %v1654_v30, %v2928_v11 }
 0x15b   :  { %v1659_v53 = vadd.f32 %v1656_v40, %v1652_v0 }
 0x15c   :  { %1316 = vrot.lane.b32.xlu1 %v1309_v39, %s2692_s8  ;;  %1318 = vrot.lane.b32.xlu0 %v1310_v6, %s2692_s8  ;;  %v1495_v39 = vmul.f32 %v1493_v32, %v2926_v26  ;;  %v1494_v6 = vmul.f32 %v1493_v32, %v2924_v14 }
 0x15e   :  { %v1498_v44 = vadd.f32 %v1495_v39, %v1491_v38  ;;  %v1497_v45 = vadd.f32 %v1494_v6, %v1490_v1  ;;  %v1873_v38 = vmul.f32 %v1871_v43, %v2926_v26 }
 0x160   :  { %1342 = vrot.lane.b32.xlu1 %v1336_v47, %s2693_s13  ;;  %1344 = vrot.lane.b32.xlu0 %v1337_v50, %s2693_s13  ;;  %v1655_v47 = vmul.f32 %v1654_v30, %v2924_v14  ;;  %v1492_v50 = vmul.f32 %v1489_v15, %v2936_v37  ;;  %v1521_v15 = vstv %s2526_s0  ;;  %v1869_v30 = vmul.f32 %v1867_v63, %v2934_v36  ;;  %s3326_s0 = sld [smem:[#allocation4 + $0x33]] }
 0x161   :  { %v1523_v1 = vmul.f32 %v1521_v15, %v2926_v26  ;;  %v1522_v0 = vmul.f32 %v1521_v15, %v2924_v14 }
 0x162   :  { %v1658_v54 = vadd.f32 %v1655_v47, %v1651_v46  ;;  %v1499_v59 = vadd.f32 %v1496_v51, %v1492_v50  ;;  %v1876_v46 = vadd.f32 %v1873_v38, %v1869_v30  ;;  %v1706_v47 = vstv %s2471_s29  ;;  %s3330_s29 = sld [smem:[#allocation4 + $0x21]] }
 0x163   :  { %v1710_v50 = vstv %s2520_s30  ;;  %v1709_v60 = vmul.f32 %v1706_v47, %v2936_v37  ;;  %s3332_s30 = sld [smem:[#allocation4 + $0x52]] }
 0x164   :  { %1346 = vrot.lane.b32.xlu1 %v1338_v7, %s2693_s13  ;;  %1370 = vrot.lane.b32.xlu0 %v1364_v55, %s2694_s14  ;;  %v1653_v55 = vmul.f32 %v1650_v10, %v2936_v37  ;;  %v1874_v10 = vmul.f32 %v1871_v43, %v2928_v11 }
 0x166   :  { %v1660_v48 = vadd.f32 %v1657_v56, %v1653_v55  ;;  %v1707_v55 = vmul.f32 %v1706_v47, %v2932_v35  ;;  %v1711_v56 = vmul.f32 %v1710_v50, %v2924_v14 }
 0x168   :  { %1372 = vrot.lane.b32.xlu1 %v1365_v57, %s2694_s14  ;;  %1374 = vrot.lane.b32.xlu0 %v1366_v3, %s2694_s14 }
 0x16c   :  { %1449 = vrot.lane.b32.xlu1 %v1442_v13, %s2689_s27  ;;  %1447 = vrot.lane.b32.xlu0 %v1441_v49, %s2689_s27  ;;  %v1683_v13 = vmul.f32 %v1682_v58, %v2924_v14  ;;  %v1872_v49 = vmul.f32 %v1871_v43, %v2924_v14  ;;  %v1708_v43 = vmul.f32 %v1706_v47, %v2934_v36 }
 0x16e   :  { %v1686_v21 = vadd.f32 %v1683_v13, %v1679_v9  ;;  %v1875_v25 = vadd.f32 %v1872_v49, %v1868_v16  ;;  %v1714_v13 = vadd.f32 %v1711_v56, %v1707_v55  ;;  %v1895_v49 = vstv %s2465_s5  ;;  %s3336_s5 = sld [smem:[#allocation4 + $0x1b]] }
 0x16f   :  { %v1549_v55 = vstv %s2533_s12  ;;  %s3361_s12 = sld [smem:[#allocation4 + $0x34]] }
 0x170   :  { %1475 = vrot.lane.b32.xlu1 %v1469_v28, %s2690_s28  ;;  %1451 = vrot.lane.b32.xlu0 %v1443_v29, %s2689_s27  ;;  %v1870_v28 = vmul.f32 %v1867_v63, %v2936_v37  ;;  %v1517_v29 = vstv %s2477_s26  ;;  %v1713_v63 = vmul.f32 %v1710_v50, %v2928_v11  ;;  %s3324_s26 = sld [smem:[#allocation4 + $0x2]] }
 0x171   :  { %v1519_v39 = vmul.f32 %v1517_v29, %v2934_v36  ;;  %v1518_v6 = vmul.f32 %v1517_v29, %v2932_v35  ;;  %v1520_v58 = vmul.f32 %v1517_v29, %v2936_v37 }
 0x172   :  { %v3122_v24 = vpop.permute.xlu1 %830  ;;  %v3124_v33 = vpop.permute.xlu0 %828 }
 0x173   :  { %4016 = vst [vmem:[#allocation23_spill] sm:$0xff] %v3122_v24  ;;  %4017 = vst [vmem:[#allocation24_spill] sm:$0xff] %v3124_v33  ;;  %v1526_v51 = vadd.f32 %v1523_v1, %v1519_v39  ;;  %v1525_v2 = vadd.f32 %v1522_v0, %v1518_v6 }
 0x174   :  { %1479 = vrot.lane.b32.xlu1 %v1471_v34, %s2690_s28  ;;  %1477 = vrot.lane.b32.xlu0 %v1470_v20, %s2690_s28  ;;  %v1688_v20 = vadd.f32 %v1685_v23, %v1681_v22  ;;  %v2084_v23 = vstv %s2459_s9  ;;  %s3352_s9 = sld [smem:[#allocation4 + $0x2e]] }
 0x175   :  { %v2085_v38 = vmul.f32 %v2084_v23, %v2932_v35 }
 0x176   :  { %v3134_v41 = vpop.permute.xlu1 %855  ;;  %v3136_v42 = vpop.permute.xlu0 %832 }
 0x177   :  { %4018 = vst [vmem:[#allocation25_spill] sm:$0xff] %v3134_v41  ;;  %4019 = vst [vmem:[#allocation26_spill] sm:$0xff] %v3136_v42 }
 0x178   :  { %1505 = vrot.lane.b32.xlu1 %v1498_v44, %s2691_s7  ;;  %1503 = vrot.lane.b32.xlu0 %v1497_v45, %s2691_s7  ;;  %v1877_v45 = vadd.f32 %v1874_v10, %v1870_v28  ;;  %v1896_v10 = vmul.f32 %v1895_v49, %v2932_v35 }
 0x17a   :  { %v3144_v7 = vpop.permute.xlu1 %859  ;;  %v3146_v52 = vpop.permute.xlu0 %857  ;;  %v1790_v42 = vstv %s3352_s9  ;;  %s2495_s9 = sld [smem:[#allocation4 + $0x31]] }
 0x17b   :  { %4020 = vst [vmem:[#allocation27_spill] sm:$0xff] %v3144_v7  ;;  %4021 = vst [vmem:[#allocation28_spill] sm:$0xff] %v3146_v52 }
 0x17c   :  { %1666 = vrot.lane.b32.xlu1 %v1659_v53, %s2689_s27  ;;  %1664 = vrot.lane.b32.xlu0 %v1658_v54, %s2689_s27 }
 0x17e   :  { %v3153_v57 = vpop.permute.xlu1 %884  ;;  %v3155_v3 = vpop.permute.xlu0 %882 }
 0x17f   :  { %4022 = vst [vmem:[#allocation29_spill] sm:$0xff] %v3153_v57  ;;  %4023 = vst [vmem:[#allocation30_spill] sm:$0xff] %v3155_v3 }
 0x180   :  { %1507 = vrot.lane.b32.xlu1 %v1499_v59, %s2691_s7  ;;  %1668 = vrot.lane.b32.xlu0 %v1660_v48, %s2689_s27  ;;  %v1524_v59 = vmul.f32 %v1521_v15, %v2928_v11  ;;  %v1712_v48 = vmul.f32 %v1710_v50, %v2926_v26  ;;  %v1897_v15 = vmul.f32 %v1895_v49, %v2934_v36 }
 0x182   :  { %v3164_v61 = vpop.permute.xlu1 %909  ;;  %v3166_v17 = vpop.permute.xlu0 %886  ;;  %v1527_v16 = vadd.f32 %v1524_v59, %v1520_v58  ;;  %v1715_v22 = vadd.f32 %v1712_v48, %v1708_v43 }
 0x183   :  { %4024 = vst [vmem:[#allocation31_spill] sm:$0xff] %v3164_v61  ;;  %4025 = vst [vmem:[#allocation32_spill] sm:$0xff] %v3166_v17 }
 0x184   :  { %1694 = vrot.lane.b32.xlu1 %v1687_v18, %s2690_s28  ;;  %1692 = vrot.lane.b32.xlu0 %v1686_v21, %s2690_s28  ;;  %v1899_v18 = vstv %s2514_s6  ;;  %v1716_v21 = vadd.f32 %v1713_v63, %v1709_v60  ;;  %v2086_v63 = vmul.f32 %v2084_v23, %v2934_v36  ;;  %s3338_s6 = sld [smem:[#allocation4 + $0x4c]] }
 0x185   :  { %v1900_v30 = vmul.f32 %v1899_v18, %v2924_v14  ;;  %v1902_v47 = vmul.f32 %v1899_v18, %v2928_v11 }
 0x186   :  { %v3173_v32 = vpop.permute.xlu1 %913  ;;  %v3175_v34 = vpop.permute.xlu0 %911 }
 0x187   :  { %4026 = vst [vmem:[#allocation33_spill] sm:$0xff] %v3173_v32  ;;  %4027 = vst [vmem:[#allocation34_spill] sm:$0xff] %v3175_v34 }
 0x188   :  { %1881 = vrot.lane.b32.xlu1 %v1875_v25, %s2689_s27  ;;  %1696 = vrot.lane.b32.xlu0 %v1688_v20, %s2690_s28  ;;  %v2088_v25 = vstv %s2508_s10  ;;  %v1901_v20 = vmul.f32 %v1899_v18, %v2926_v26  ;;  %s3354_s10 = sld [smem:[#allocation4 + $0x5f]] }
 0x189   :  { %v2089_v39 = vmul.f32 %v2088_v25, %v2924_v14  ;;  %v2091_v60 = vmul.f32 %v2088_v25, %v2928_v11  ;;  %v2090_v43 = vmul.f32 %v2088_v25, %v2926_v26  ;;  %v1550_v25 = vmul.f32 %v1549_v55, %v2924_v14 }
 0x18a   :  { %v3186_v40 = vpop.permute.xlu1 %938  ;;  %v3188_v44 = vpop.permute.xlu0 %936  ;;  %v1904_v0 = vadd.f32 %v1901_v20, %v1897_v15  ;;  %v1738_v15 = vstv %s2527_s17  ;;  %v2144_v32 = vstv %s3338_s6  ;;  %s3516_s17 = sld [smem:[#allocation4 + $0x4]]  ;;  %s706_s6 = sld [smem:[#allocation4]] }
 0x18b   :  { %4028 = vst [vmem:[#allocation35_spill] sm:$0xff] %v3186_v40  ;;  %4029 = vst [vmem:[#allocation36_spill] sm:$0xff] %v3188_v44  ;;  %v2092_v50 = vadd.f32 %v2089_v39, %v2085_v38  ;;  %v1739_v39 = vmul.f32 %v1738_v15, %v2924_v14  ;;  %v1955_v44 = vstv %s3332_s30  ;;  %v2140_v40 = vstv %s3336_s5  ;;  %s2699_s30 = smov 5   ;;  %s2501_s5 = sld [smem:[#allocation4 + $0x37]] }
 0x18c   :  { %1885 = vrot.lane.b32.xlu1 %v1877_v45, %s2689_s27  ;;  %1883 = vrot.lane.b32.xlu0 %v1876_v46, %s2689_s27  ;;  %v1903_v45 = vadd.f32 %v1900_v30, %v1896_v10  ;;  %v1898_v46 = vmul.f32 %v1895_v49, %v2936_v37 }
 0x18e   :  { %v3192_v53 = vpop.permute.xlu1 %963  ;;  %v3194_v54 = vpop.permute.xlu0 %940  ;;  %v1905_v59 = vadd.f32 %v1902_v47, %v1898_v46  ;;  %v1923_v47 = vstv %s2472_s3  ;;  %s3604_s3 = sld [smem:[#allocation4 + $0x35]] }
 0x18f   :  { %4030 = vst [vmem:[#allocation37_spill] sm:$0xff] %v3192_v53  ;;  %4031 = vst [vmem:[#allocation38_spill] sm:$0xff] %v3194_v54  ;;  %v1951_v54 = vstv %s3330_s29  ;;  %s2500_s29 = sld [smem:[#allocation4 + $0x36]] }
 0x190   :  { %1533 = vrot.lane.b32.xlu1 %v1526_v51, %s2692_s8  ;;  %1531 = vrot.lane.b32.xlu0 %v1525_v2, %s2692_s8  ;;  %v2087_v51 = vmul.f32 %v2084_v23, %v2936_v37  ;;  %v1545_v2 = vstv %s2484_s11  ;;  %s3359_s11 = sld [smem:[#allocation4 + $0x3]] }
 0x191   :  { %v1547_v48 = vmul.f32 %v1545_v2, %v2934_v36  ;;  %v1546_v23 = vmul.f32 %v1545_v2, %v2932_v35 }
 0x192   :  { %v3206_v62 = vpop.permute.xlu1 %967  ;;  %v3208_v9 = vpop.permute.xlu0 %965 }
 0x193   :  { %4032 = vst [vmem:[#allocation39_spill] sm:$0xff] %v3206_v62  ;;  %4033 = vst [vmem:[#allocation40_spill] sm:$0xff] %v3208_v9  ;;  %v1553_v38 = vadd.f32 %v1550_v25, %v1546_v23  ;;  %v3289_v25 = vld [vmem:[#allocation2 + $0x18] sm:$0xff] }
 0x194   :  { %1720 = vrot.lane.b32.xlu1 %v1714_v13, %s2691_s7  ;;  %1535 = vrot.lane.b32.xlu0 %v1527_v16, %s2692_s8  ;;  %v1551_v13 = vmul.f32 %v1549_v55, %v2926_v26  ;;  %v1734_v16 = vstv %s2478_s16  ;;  %v1767_v62 = vmul.f32 %v3289_v25, %v1766_v31  ;;  %s3380_s16 = sld [smem:[#allocation4 + $0x59]]  ;;  %v1956_v33 = vmul.f32 %v3289_v25, %v1955_v44 }
 0x195   :  { %v1735_v26 = vmul.f32 %v1734_v16, %v2932_v35  ;;  %v1737_v46 = vmul.f32 %v1734_v16, %v2936_v37  ;;  %v1741_v35 = vmul.f32 %v1738_v15, %v2928_v11 }
 0x196   :  { %v3212_v28 = vpop.permute.xlu1 %1015  ;;  %v3214_v29 = vpop.permute.xlu0 %1013  ;;  %v1554_v20 = vadd.f32 %v1551_v13, %v1547_v48  ;;  %v2112_v48 = vstv %s2466_s19  ;;  %s3614_s19 = sld [smem:[#allocation4 + $0x53]] }
 0x197   :  { %v1742_v14 = vadd.f32 %v1739_v39, %v1735_v26 }
 0x198   :  { %1724 = vrot.lane.b32.xlu1 %v1716_v21, %s2691_s7  ;;  %1722 = vrot.lane.b32.xlu0 %v1715_v22, %s2691_s7  ;;  %v2094_v21 = vadd.f32 %v2091_v60, %v2087_v51  ;;  %v2093_v22 = vadd.f32 %v2090_v43, %v2086_v63 }
 0x19a   :  { %v3224_v1 = vpop.permute.xlu1 %1041  ;;  %v3226_v6 = vpop.permute.xlu0 %1017 }
 0x19c   :  { %1911 = vrot.lane.b32.xlu1 %v1904_v0, %s2690_s28  ;;  %1909 = vrot.lane.b32.xlu0 %v1903_v45, %s2690_s28  ;;  %v1548_v0 = vmul.f32 %v1545_v2, %v2936_v37  ;;  %v1552_v45 = vmul.f32 %v1549_v55, %v2928_v11  ;;  %v1736_v2 = vmul.f32 %v1734_v16, %v2934_v36  ;;  %v3269_v55 = vld [vmem:[#allocation2 + $0x20] sm:$0xff]  ;;  %v3274_v37 = vld [vmem:[#allocation2 + $0x8] sm:$0xff] }
 0x19d   :  { %v1740_v63 = vmul.f32 %v3269_v55, %v1738_v15  ;;  %v1925_v11 = vmul.f32 %v3274_v37, %v1923_v47  ;;  %v1744_v16 = vadd.f32 %v1741_v35, %v1737_v46  ;;  %v3302_v35 = vld [vmem:[#allocation2 + $0x10] sm:$0xff]  ;;  %v1768_v3 = vmul.f32 %v3269_v55, %v1766_v31 }
 0x19e   :  { %v3233_v56 = vpop.permute.xlu1 %1045  ;;  %v3235_v58 = vpop.permute.xlu0 %1043  ;;  %v1555_v60 = vadd.f32 %v1552_v45, %v1548_v0  ;;  %v990_v57 = vmul.f32 %v3274_v37, %v988_v27  ;;  %v991_v7 = vmul.f32 %v3302_v35, %v988_v27 }
 0x1a0   :  { %2098 = vrot.lane.b32.xlu1 %v2092_v50, %s2689_s27  ;;  %1913 = vrot.lane.b32.xlu0 %v1905_v59, %s2690_s28  ;;  %v1927_v50 = vstv %s2521_s18  ;;  %s3612_s18 = sld [smem:[#allocation4 + $0x22]] }
 0x1a1   :  { %v1929_v43 = vmul.f32 %v3269_v55, %v1927_v50  ;;  %v1928_v15 = vmul.f32 %v3289_v25, %v1927_v50 }
 0x1a2   :  { %v3244_v49 = vpop.permute.xlu1 %1071  ;;  %v3246_v18 = vpop.permute.xlu0 %1069 }
 0x1a3   :  { %v1932_v26 = vadd.f32 %v1929_v43, %v1925_v11 }
 0x1a4   :  { %2102 = vrot.lane.b32.xlu1 %v2094_v21, %s2689_s27  ;;  %2100 = vrot.lane.b32.xlu0 %v2093_v22, %s2689_s27  ;;  %s3278_s27 = sld [smem:[#allocation4 + $0x2d]]  ;;  %v1743_v21 = vadd.f32 %v1740_v63, %v1736_v2  ;;  %v3286_v22 = vld [vmem:[#allocation2] sm:$0xff]  ;;  %v2115_v63 = vmul.f32 %v3302_v35, %v2112_v48 }
 0x1a5   :  { %v1924_v23 = vmul.f32 %v3286_v22, %v1923_v47 }
 0x1a6   :  { %v3253_v10 = vpop.permute.xlu1 %1097  ;;  %v3255_v30 = vpop.permute.xlu0 %1073 }
 0x1a7   :  { %v1931_v45 = vadd.f32 %v1928_v15, %v1924_v23  ;;  %v2114_v15 = vmul.f32 %v3274_v37, %v2112_v48 }
 0x1a8   :  { %1561 = vrot.lane.b32.xlu1 %v1554_v20, %s2693_s13  ;;  %1559 = vrot.lane.b32.xlu0 %v1553_v38, %s2693_s13  ;;  %v2116_v20 = vstv %s2515_s20  ;;  %v2113_v38 = vmul.f32 %v3286_v22, %v2112_v48  ;;  %s2696_s20 = smov 127  }
 0x1a9   :  { %v2117_v46 = vmul.f32 %v3289_v25, %v2116_v20 }
 0x1aa   :  { %v3264_v51 = vpop.permute.xlu1 %1101  ;;  %v3266_v59 = vpop.permute.xlu0 %1099  ;;  %v1573_v43 = vstv %s3278_s27  ;;  %s2697_s27 = smov 126  }
 0x1ab   :  { %v1576_v53 = vmul.f32 %v3302_v35, %v1573_v43 }
 0x1ac   :  { %1748 = vrot.lane.b32.xlu1 %v1742_v14, %s2692_s8  ;;  %1563 = vrot.lane.b32.xlu0 %v1555_v60, %s2693_s13  ;;  %v1926_v14 = vmul.f32 %v3302_v35, %v1923_v47  ;;  %v3305_v60 = vld [vmem:[#allocation2 + $0x28] sm:$0xff]  ;;  %v1577_v47 = vstv %s3280_s21  ;;  %s3645_s21 = sld [smem:[#allocation4 + $0x2f]] }
 0x1ad   :  { %v1930_v2 = vmul.f32 %v3305_v60, %v1927_v50  ;;  %v2119_v11 = vmul.f32 %v3305_v60, %v2116_v20  ;;  %v1579_v48 = vmul.f32 %v3269_v55, %v1577_v47  ;;  %v1580_v9 = vmul.f32 %v3305_v60, %v1577_v47 }
 0x1ae   :  { %v3282_v36 = vpop.permute.xlu1 %1127  ;;  %v3284_v13 = vpop.permute.xlu0 %1125 }
 0x1af   :  { %v1933_v23 = vadd.f32 %v1930_v2, %v1926_v14  ;;  %v2122_v14 = vadd.f32 %v2119_v11, %v2115_v63  ;;  %v992_v63 = vstv %s3314_s25  ;;  %v1583_v34 = vadd.f32 %v1580_v9, %v1576_v53  ;;  %s2698_s25 = smov 4  }
 0x1b0   :  { %1752 = vrot.lane.b32.xlu1 %v1744_v16, %s2692_s8  ;;  %1750 = vrot.lane.b32.xlu0 %v1743_v21, %s2692_s8  ;;  %v2120_v21 = vadd.f32 %v2117_v46, %v2113_v38  ;;  %v1575_v38 = vmul.f32 %v3274_v37, %v1573_v43  ;;  %v994_v41 = vmul.f32 %v3269_v55, %v992_v63 }
 0x1b1   :  { %v995_v52 = vmul.f32 %v3305_v60, %v992_v63  ;;  %v1953_v53 = vmul.f32 %v3274_v37, %v1951_v54  ;;  %v1957_v9 = vmul.f32 %v3269_v55, %v1955_v44 }
 0x1b2   :  { %v3297_v39 = vpop.permute.xlu1 %1153  ;;  %v3299_v0 = vpop.permute.xlu0 %1129  ;;  %v1582_v11 = vadd.f32 %v1579_v48, %v1575_v38  ;;  %v1205_v38 = vstv %s3324_s26  ;;  %v1209_v48 = vstv %s3326_s0  ;;  %v3416_v8 = vadd.f32 %v994_v41, %v990_v57  ;;  %s2543_s26 = sld [smem:[#allocation4 + $0x61]]  ;;  %s2451_s0 = sld [smem:[#allocation4 + $0x5]] }
 0x1b3   :  { %4034 = vst [vmem:[#allocation41_spill] sm:$0xff] %v3297_v39  ;;  %4035 = vst [vmem:[#allocation42_spill] sm:$0xff] %v3299_v0  ;;  %v3418_v5 = vadd.f32 %v995_v52, %v991_v7  ;;  %v1206_v4 = vmul.f32 %v3286_v22, %v1205_v38  ;;  %v1210_v39 = vmul.f32 %v3289_v25, %v1209_v48 }
 0x1b4   :  { %1939 = vrot.lane.b32.xlu1 %v1932_v26, %s2691_s7  ;;  %1937 = vrot.lane.b32.xlu0 %v1931_v45, %s2691_s7  ;;  %v2118_v26 = vmul.f32 %v3269_v55, %v2116_v20  ;;  %v1762_v20 = vstv %s3295_s22  ;;  %v1208_v41 = vmul.f32 %v3302_v35, %v1205_v38  ;;  %v1211_v7 = vmul.f32 %v3269_v55, %v1209_v48  ;;  %s2542_s22 = sld [smem:[#allocation4 + $0x60]] }
 0x1b5   :  { %v1764_v17 = vmul.f32 %v3274_v37, %v1762_v20  ;;  %v1960_v52 = vadd.f32 %v1957_v9, %v1953_v53  ;;  %v2141_v57 = vmul.f32 %v3286_v22, %v2140_v40  ;;  %v2142_v53 = vmul.f32 %v3274_v37, %v2140_v40 }
 0x1b6   :  { %v3320_v16 = vpop.permute.xlu1 %1157  ;;  %v3322_v50 = vpop.permute.xlu0 %1155  ;;  %v2121_v2 = vadd.f32 %v2118_v26, %v2114_v15  ;;  %v1763_v15 = vmul.f32 %v3286_v22, %v1762_v20  ;;  %v1792_v9 = vmul.f32 %v3274_v37, %v1790_v42  ;;  %v3464_v0 = vadd.f32 %v1210_v39, %v1206_v4 }
 0x1b7   :  { %4036 = vst [vmem:[#allocation43_spill] sm:$0xff] %v3320_v16  ;;  %4037 = vst [vmem:[#allocation44_spill] sm:$0xff] %v3322_v50  ;;  %v1207_v50 = vmul.f32 %v3274_v37, %v1205_v38  ;;  %v2143_v38 = vmul.f32 %v3302_v35, %v2140_v40  ;;  %v2147_v16 = vmul.f32 %v3305_v60, %v2144_v32 }
 0x1b8   :  { %2126 = vrot.lane.b32.xlu1 %v2120_v21, %s2690_s28  ;;  %1941 = vrot.lane.b32.xlu0 %v1933_v23, %s2691_s7  ;;  %v1574_v21 = vmul.f32 %v3286_v22, %v1573_v43  ;;  %v1578_v23 = vmul.f32 %v3289_v25, %v1577_v47  ;;  %v993_v43 = vmul.f32 %v3289_v25, %v992_v63 }
 0x1b9   :  { %v1765_v47 = vmul.f32 %v3302_v35, %v1762_v20  ;;  %v3406_v20 = vstv %s3361_s12 }
 0x1ba   :  { %v3343_v45 = vpop.permute.xlu1 %1230  ;;  %v3345_v46 = vpop.permute.xlu0 %1232  ;;  %v1427_v40 = vmul.f32 %v3289_v25, %v3406_v20 }
 0x1bc   :  { %2130 = vrot.lane.b32.xlu1 %v2122_v14, %s2690_s28  ;;  %2128 = vrot.lane.b32.xlu0 %v2121_v2, %s2690_s28  ;;  %v1581_v2 = vadd.f32 %v1578_v23, %v1574_v21  ;;  %s3374_s28 = sld [smem:[#allocation4 + $0x28]]  ;;  %v989_v21 = vmul.f32 %v3286_v22, %v988_v27  ;;  %v1769_v23 = vmul.f32 %v3305_v60, %v1766_v31  ;;  %v3403_v31 = vstv %s3359_s11 }
 0x1be   :  { %v3363_v26 = vpop.permute.xlu1 %1234  ;;  %v3365_v14 = vpop.permute.xlu0 %1258  ;;  %v1772_v63 = vadd.f32 %v1769_v23, %v1765_v47  ;;  %v3414_v24 = vadd.f32 %v993_v43, %v989_v21  ;;  %v2145_v47 = vmul.f32 %v3289_v25, %v2144_v32  ;;  %v1954_v23 = vmul.f32 %v3302_v35, %v1951_v54 }
 0x1bf   :  { %4038 = vst [vmem:[#allocation45_spill] sm:$0xff] %v3365_v14  ;;  %v1793_v14 = vmul.f32 %v3302_v35, %v1790_v42 }
 0x1c0   :  { %1589 = vrot.lane.b32.xlu1 %v1582_v11, %s2694_s14  ;;  %1587 = vrot.lane.b32.xlu0 %v1581_v2, %s2694_s14  ;;  %v1770_v2 = vadd.f32 %v1767_v62, %v1763_v15  ;;  %v1794_v62 = vstv %s3354_s10  ;;  %s2701_s10 = smov 125  }
 0x1c2   :  { %v3386_v61 = vpop.permute.xlu1 %1260  ;;  %v3388_v11 = vpop.permute.xlu0 %1262  ;;  %v3421_v19 = vstv %s3374_s28  ;;  %s2703_s28 = smov 123  }
 0x1c3   :  { %4039 = vst [vmem:[#allocation46_spill] sm:$0xff] %v3386_v61  ;;  %v1797_v61 = vmul.f32 %v3305_v60, %v1794_v62 }
 0x1c4   :  { %1776 = vrot.lane.b32.xlu1 %v1770_v2, %s2693_s13  ;;  %1591 = vrot.lane.b32.xlu0 %v1583_v34, %s2694_s14  ;;  %v1771_v2 = vadd.f32 %v1768_v3, %v1764_v17  ;;  %v1952_v34 = vmul.f32 %v3286_v22, %v1951_v54  ;;  %v3429_v3 = vstv %s3380_s16  ;;  %v1796_v54 = vmul.f32 %v3269_v55, %v1794_v62  ;;  %s2704_s16 = smov 122  }
 0x1c6   :  { %v3408_v27 = vpop.permute.xlu1 %1286  ;;  %v3410_v15 = vpop.permute.xlu0 %1288  ;;  %v1959_v43 = vadd.f32 %v1956_v33, %v1952_v34  ;;  %v2146_v33 = vmul.f32 %v3269_v55, %v2144_v32  ;;  %v1423_v34 = vmul.f32 %v3286_v22, %v3403_v31 }
 0x1c7   :  { %4040 = vst [vmem:[#allocation47_spill] sm:$0xff] %v3408_v27  ;;  %4041 = vst [vmem:[#allocation48_spill] sm:$0xff] %v3410_v15  ;;  %v1980_v27 = vmul.f32 %v3286_v22, %v3421_v19  ;;  %v1984_v15 = vmul.f32 %v3289_v25, %v3429_v3 }
 0x1c8   :  { %1780 = vrot.lane.b32.xlu1 %v1772_v63, %s2693_s13  ;;  %1778 = vrot.lane.b32.xlu0 %v1771_v2, %s2693_s13  ;;  %v1958_v63 = vmul.f32 %v3305_v60, %v1955_v44  ;;  %v1212_v2 = vmul.f32 %v3305_v60, %v1209_v48  ;;  %v1791_v44 = vmul.f32 %v3286_v22, %v1790_v42 }
 0x1c9   :  { %v1795_v48 = vmul.f32 %v3289_v25, %v1794_v62  ;;  %v3475_v39 = vadd.f32 %v1427_v40, %v1423_v34  ;;  %v1019_v42 = vsel %vm834_vm5, %v3214_v29, %v3212_v28  ;;  %v3498_v29 = vmul.f32 %v3302_v35, %v3403_v31 }
 0x1ca   :  { %v3434_v17 = vpop.permute.xlu1 %1290  ;;  %v3436_v21 = vpop.permute.xlu0 %1314  ;;  %v1961_v32 = vadd.f32 %v1958_v63, %v1954_v23  ;;  %v2149_v23 = vadd.f32 %v2146_v33, %v2142_v53  ;;  %v1799_v63 = vadd.f32 %v1796_v54, %v1792_v9  ;;  %v1047_v53 = vsel %vm861_vm6, %v3224_v1, %v3235_v58 }
 0x1cb   :  { %4042 = vst [vmem:[#allocation49_spill] sm:$0xff] %v3434_v17  ;;  %4043 = vst [vmem:[#allocation50_spill] sm:$0xff] %v3436_v21  ;;  %v3467_v17 = vsub.s32 3, %v2768_v12  ;;  %v1798_v4 = vadd.f32 %v1795_v48, %v1791_v44  ;;  %v1986_v1 = vmul.f32 %v3305_v60, %v3429_v3  ;;  %v1048_v33 = vsel %vm861_vm6, %v3235_v58, %v3233_v56 }
 0x1cc   :  { %1967 = vrot.lane.b32.xlu1 %v1960_v52, %s2692_s8  ;;  %1965 = vrot.lane.b32.xlu0 %v1959_v43, %s2692_s8  ;;  %v2148_v43 = vadd.f32 %v2145_v47, %v2141_v57  ;;  %v1215_v57 = vadd.f32 %v1212_v2, %v1208_v41  ;;  %v2150_v47 = vadd.f32 %v2147_v16, %v2143_v38 }
 0x1cd   :  { %v1424_v41 = vmul.f32 %v3274_v37, %v3403_v31  ;;  %v1428_v16 = vmul.f32 %v3269_v55, %v3406_v20  ;;  %v3494_v38 = vadd.f32 %v1797_v61, %v1793_v14  ;;  %v3512_v61 = vld [vmem:[#allocation8] sm:$0x7f]  ;;  %v1024_v31 = vadd.f32 %v1019_v42, %v3414_v24 }
 0x1ce   :  { %v3456_v21 = vpop.permute.xlu1 %1316  ;;  %v3458_v52 = vpop.permute.xlu0 %1318  ;;  %v1604_v14 = vrot.slane %v3512_v61, %v3467_v17  ;;  %v1075_v9 = vsel %vm888_vm7, %v3246_v18, %v3244_v49  ;;  %v1985_v58 = vmul.f32 %v3269_v55, %v3429_v3  ;;  %v1076_v18 = vsel %vm888_vm7, %v3244_v49, %v3255_v30 }
 0x1cf   :  { %4044 = vst [vmem:[#allocation51_spill] sm:$0xff] %v3456_v21  ;;  %v3471_v21 = vadd.f32 %v1211_v7, %v1207_v50  ;;  %v3484_v50 = vadd.f32 %v1984_v15, %v1980_v27  ;;  %v3490_v7 = vld [vmem:[#allocation8 + $0x8] sm:$0x7f]  ;;  %v3502_v27 = vmul.f32 %v3305_v60, %v3406_v20  ;;  %v1020_v15 = vsel %vm834_vm5, %v3212_v28, %v3226_v6 }
 0x1d0   :  { %2154 = vrot.lane.b32.xlu1 %v2148_v43, %s2691_s7  ;;  %1969 = vrot.lane.b32.xlu0 %v1961_v32, %s2692_s8  ;;  %v1608_v2 = vrot.slane %v3490_v7, %v3467_v17  ;;  %v1026_v28 = vadd.f32 %v3226_v6, %v3418_v5  ;;  %v1982_v20 = vmul.f32 %v3302_v35, %v3421_v19 }
 0x1d1   :  { %v3535_v44 = vadd.f32 %v1428_v16, %v1424_v41  ;;  %v1981_v5 = vmul.f32 %v3274_v37, %v3421_v19  ;;  %v1025_v6 = vadd.f32 %v1020_v15, %v3416_v8  ;;  %v1052_v34 = vadd.f32 %v1047_v53, %v1024_v31 }
 0x1d2   :  { %v3480_v12 = vpop.permute.xlu1 %1342  ;;  %v3482_v62 = vpop.permute.xlu0 %1344  ;;  %v1054_v48 = vadd.f32 %v3233_v56, %v1026_v28  ;;  %v1103_v40 = vsel %vm915_vm8, %v3253_v10, %v3266_v59  ;;  %v1243_v43 = vadd.f32 %v3363_v26, %v1215_v57  ;;  %v1989_v32 = vadd.f32 %v1986_v1, %v1982_v20  ;;  %v4048_v28 = vld [vmem:[#allocation42_spill] sm:$0xff] }
 0x1d3   :  { %v1053_v8 = vadd.f32 %v1048_v33, %v1025_v6  ;;  %v1080_v19 = vadd.f32 %v1075_v9, %v1052_v34  ;;  %v1104_v3 = vsel %vm915_vm8, %v3266_v59, %v3264_v51  ;;  %v1131_v49 = vsel %vm942_vm9, %v3284_v13, %v3282_v36  ;;  %v4045_v13 = vld [vmem:[#allocation46_spill] sm:$0xff]  ;;  %v4049_v33 = vld [vmem:[#allocation48_spill] sm:$0xff] }
 0x1d4   :  { %2158 = vrot.lane.b32.xlu1 %v2150_v47, %s2691_s7  ;;  %2156 = vrot.lane.b32.xlu0 %v2149_v23, %s2691_s7  ;;  %s2695_s7 = smov 3   ;;  %v1082_v56 = vadd.f32 %v3255_v30, %v1054_v48  ;;  %v1236_v10 = vsel %vm834_vm5, %v3343_v45, %v3345_v46  ;;  %v1271_v57 = vadd.f32 %v3388_v11, %v1243_v43  ;;  %v4047_v45 = vld [vmem:[#allocation49_spill] sm:$0xff]  ;;  %v4051_v48 = vld [vmem:[#allocation43_spill] sm:$0xff] }
 0x1d5   :  { %v1081_v30 = vadd.f32 %v1076_v18, %v1053_v8  ;;  %v1108_v41 = vadd.f32 %v1103_v40, %v1080_v19  ;;  %v1988_v16 = vadd.f32 %v1985_v58, %v1981_v5  ;;  %v1237_v59 = vsel %vm834_vm5, %v3345_v46, %v3363_v26  ;;  %v4053_v40 = vld [vmem:[#allocation50_spill] sm:$0xff]  ;;  %v4055_v19 = vld [vmem:[#allocation41_spill] sm:$0xff] }
 0x1d6   :  { %v3531_v54 = vpop.permute.xlu1 %1346  ;;  %v3533_v24 = vpop.permute.xlu0 %1370  ;;  %v1110_v42 = vadd.f32 %v3264_v51, %v1082_v56  ;;  %v1299_v53 = vadd.f32 %v4047_v45, %v1271_v57  ;;  %v1241_v1 = vadd.f32 %v1236_v10, %v3464_v0  ;;  %v1132_v46 = vsel %vm942_vm9, %v3282_v36, %v4048_v28 }
 0x1d7   :  { %v1109_v31 = vadd.f32 %v1104_v3, %v1081_v30  ;;  %v1136_v51 = vadd.f32 %v1131_v49, %v1108_v41  ;;  %v1265_v26 = vsel %vm861_vm6, %v4045_v13, %v3388_v11  ;;  %v1242_v0 = vadd.f32 %v1237_v59, %v3471_v21  ;;  %v4052_v11 = vld [vmem:[#allocation51_spill] sm:$0xff]  ;;  %v4054_v21 = vld [vmem:[#allocation44_spill] sm:$0xff] }
 0x1d8   :  { %1613 = vrot.lane.b32.xlu1 %v1608_v2, %s2695_s7  ;;  %1611 = vrot.lane.b32.xlu0 %v1604_v14, %s2695_s7  ;;  %v4046_v2 = vld [vmem:[#allocation45_spill] sm:$0xff]  ;;  %v3576_v14 = vstv %s3516_s17  ;;  %v1138_v20 = vadd.f32 %v4048_v28, %v1110_v42  ;;  %v1327_v9 = vadd.f32 %v3458_v52, %v1299_v53  ;;  %v1293_v36 = vsel %vm888_vm7, %v4049_v33, %v4047_v45  ;;  %v4056_v45 = vld [vmem:[#allocation19_spill] sm:$0xff]  ;;  %s2705_s17 = smov [#allocation11]  }
 0x1d9   :  { %v1264_v15 = vsel %vm861_vm6, %v4046_v2, %v4045_v13  ;;  %v1320_v43 = vsel %vm915_vm8, %v4053_v40, %v4052_v11  ;;  %v1159_v56 = vsel %vm969_vm10, %v4055_v19, %v4054_v21  ;;  %v1160_v3 = vsel %vm969_vm10, %v4054_v21, %v4051_v48  ;;  %s2426_s7 = sshll.u32 %s2705_s17, 4  ;;  %s2427_s7 = int_to_ptr.vmem [resolvable:$true] %s2426_s7 }
 0x1da   :  { %v3561_v47 = vpop.permute.xlu1 %1372  ;;  %v3563_v23 = vpop.permute.xlu0 %1374  ;;  %v1166_v34 = vadd.f32 %v4051_v48, %v1138_v20  ;;  %v1269_v58 = vadd.f32 %v1264_v15, %v1241_v1  ;;  %v1355_v8 = vadd.f32 %v3531_v54, %v1327_v9  ;;  %v1270_v49 = vadd.f32 %v1265_v26, %v1242_v0  ;;  %p2654_p8 = scmp.lt.s32.totalorder %s2427_s7, %s2427_s7 }
 0x1db   :  { %v1348_v57 = vsel %vm942_vm9, %v3480_v12, %v3482_v62  ;;  %v1432_v2 = vadd.f32 %v3502_v27, %v3498_v29  ;;  %v1349_v20 = vsel %vm942_vm9, %v3482_v62, %v3531_v54  ;;  %v1376_v29 = vsel %vm969_vm10, %v3533_v24, %v3561_v47  ;;  %v4057_v27 = vld [vmem:[#allocation22_spill] sm:$0xff] }
 0x1dc   :  { %1806 = vrot.lane.b32.xlu1 %v1799_v63, %s2694_s14  ;;  %1804 = vrot.lane.b32.xlu0 %v1798_v4, %s2694_s14  ;;  %v4050_v63 = vld [vmem:[#allocation47_spill] sm:$0xff]  ;;  %v1383_v30 = vadd.f32 %v3563_v23, %v1355_v8  ;;  %v1298_v59 = vadd.f32 %v1293_v36, %v1270_v49  ;;  %v1188_v53 = vmul.f32 %v4056_v45, %v1166_v34 }
 0x1dd   :  { %v1292_v4 = vsel %vm888_vm7, %v4050_v63, %v4049_v33  ;;  %v1377_v33 = vsel %vm969_vm10, %v3561_v47, %v3563_v23  ;;  %v2168_v23 = vstv %s3612_s18  ;;  %v1640_v8 = vmul.f32 %v3286_v22, %v3576_v14 }
 0x1de   :  { %v1450_v5 = vpop.permute.xlu1 %1449  ;;  %v1448_v6 = vpop.permute.xlu0 %1447  ;;  %v1297_v10 = vadd.f32 %v1292_v4, %v1269_v58  ;;  %v2170_v19 = vmul.f32 %v3274_v37, %v2168_v23 }
 0x1df   :  { %v1453_v18 = vsel %vm834_vm5, %v1448_v6, %v1450_v5 }
 0x1e0   :  { %1993 = vrot.lane.b32.xlu1 %v3484_v50, %s2693_s13  ;;  %1808 = vrot.lane.b32.xlu0 %v3494_v38, %s2694_s14  ;;  %v1137_v50 = vadd.f32 %v1132_v46, %v1109_v31  ;;  %v1321_v38 = vsel %vm915_vm8, %v4052_v11, %v3458_v52  ;;  %v1325_v13 = vadd.f32 %v1320_v43, %v1297_v10  ;;  %v4059_v11 = vld [vmem:[#allocation21_spill] sm:$0xff] }
 0x1e1   :  { %v1164_v31 = vadd.f32 %v1159_v56, %v1136_v51  ;;  %v1326_v12 = vadd.f32 %v1321_v38, %v1298_v59  ;;  %v1405_v46 = vmul.f32 %v4057_v27, %v1383_v30  ;;  %v1458_v51 = vadd.f32 %v1453_v18, %v3475_v39 }
 0x1e2   :  { %v1476_v42 = vpop.permute.xlu1 %1475  ;;  %v1452_v41 = vpop.permute.xlu0 %1451  ;;  %v1165_v52 = vadd.f32 %v1160_v3, %v1137_v50  ;;  %v1353_v28 = vadd.f32 %v1348_v57, %v1325_v13  ;;  %v1643_v39 = vstv %s3604_s3  ;;  %v1399_v40 = vsel %vm1398_vm12, %v4059_v11, %v4057_v27  ;;  %s2649_s3 = scalar_lea.vmem %s2427_s7, 2048 }
 0x1e3   :  { %v1454_v15 = vsel %vm834_vm5, %v1450_v5, %v1452_v41  ;;  %v1460_v1 = vadd.f32 %v1452_v41, %v1432_v2  ;;  %v1354_v63 = vadd.f32 %v1349_v20, %v1326_v12  ;;  %v2172_v5 = vstv %s3614_s19  ;;  %p2650_p7 = scmp.ne.s32.totalorder %s2427_s7, %s2649_s3  ;;  %p2655_p9 = scmp.lt.s32.totalorder %s2649_s3, %s2649_s3 }
 0x1e4   :  { %1997 = vrot.lane.b32.xlu1 %v1989_v32, %s2693_s13  ;;  %1995 = vrot.lane.b32.xlu0 %v1988_v16, %s2693_s13  ;;  %v1459_v32 = vadd.f32 %v1454_v15, %v3535_v44  ;;  %v4058_v44 = vld [vmem:[#allocation20_spill] sm:$0xff]  ;;  %v1381_v34 = vadd.f32 %v1376_v29, %v1353_v28  ;;  %v1644_v21 = vmul.f32 %v3289_v25, %v1643_v39  ;;  %v2007_v59 = vstv %s3645_s21 }
 0x1e5   :  { %v1182_v47 = vsel %vm1181_vm11, %v4058_v44, %v4056_v45  ;;  %v1186_v6 = vmul.f32 %v4058_v44, %v1164_v31  ;;  %v1382_v0 = vadd.f32 %v1377_v33, %v1354_v63  ;;  %v2174_v56 = vmul.f32 %v3269_v55, %v2172_v5  ;;  %p2656_p10 = por %p2655_p9, %p2654_p8 }
 0x1e6   :  { %v1480_v26 = vpop.permute.xlu1 %1479  ;;  %v1478_v16 = vpop.permute.xlu0 %1477  ;;  %v1187_v48 = vmul.f32 %v1182_v47, %v1165_v52  ;;  %v1403_v3 = vmul.f32 %v4059_v11, %v1381_v34  ;;  %v2169_v38 = vmul.f32 %v3286_v22, %v2168_v23  ;;  %v2173_v57 = vmul.f32 %v3289_v25, %v2172_v5 }
 0x1e7   :  { %v1488_v62 = vadd.f32 %v1480_v26, %v1460_v1  ;;  %v1481_v54 = vsel %vm861_vm6, %v1476_v42, %v1478_v16  ;;  %v1482_v24 = vsel %vm861_vm6, %v1478_v16, %v1480_v26  ;;  %v1404_v49 = vmul.f32 %v1399_v40, %v1382_v0  ;;  %v4060_v42 = vld [vmem:[#allocation16_spill] sm:$0xff]  ;;  %p2657_p11 = pnand %p2656_p10, %p2650_p7 }
 0x1e8   :  { %v1486_v4 = vadd.f32 %v1481_v54, %v1458_v51  ;;  %v1487_v9 = vadd.f32 %v1482_v24, %v1459_v32  ;;  %1196 = vrot.lane.b32.xlu0 %v1188_v53, %s2696_s20  ;;  %1413 = vrot.lane.b32.xlu1 %v1405_v46, %s2697_s27  ;;  %v3670_v41 = vsub.s32 4, %v4060_v42  ;;  %v1647_v13 = vadd.f32 %v1644_v21, %v1640_v8 }
 0x1e9   :  { %v1641_v2 = vmul.f32 %v3274_v37, %v3576_v14  ;;  %v1642_v15 = vmul.f32 %v3302_v35, %v3576_v14  ;;  %v2011_v45 = vstv %s2542_s22  ;;  %v2177_v52 = vadd.f32 %v2174_v56, %v2170_v19 }
 0x1ea   :  { %v1506_v58 = vpop.permute.xlu1 %1505  ;;  %v1504_v18 = vpop.permute.xlu0 %1503  ;;  %v2176_v12 = vadd.f32 %v2173_v57, %v2169_v38  ;;  %v2171_v28 = vmul.f32 %v3302_v35, %v2168_v23  ;;  %v2175_v20 = vmul.f32 %v3305_v60, %v2172_v5  ;;  %v1646_v27 = vmul.f32 %v3305_v60, %v1643_v39 }
 0x1eb   :  { %v1509_v36 = vsel %vm888_vm7, %v1504_v18, %v1506_v58  ;;  %v1645_v51 = vmul.f32 %v3269_v55, %v1643_v39  ;;  %v1821_v32 = vrot.slane %v3512_v61, %v3670_v41  ;;  %v2008_v54 = vmul.f32 %v3286_v22, %v2007_v59 }
 0x1ec   :  { %v3656_v43 = vadd.f32 %v1509_v36, %v1486_v4  ;;  %1192 = vrot.lane.b32.xlu0 %v1186_v6, %s2696_s20  ;;  %1194 = vrot.lane.b32.xlu1 %v1187_v48, %s2696_s20  ;;  %v2012_v24 = vmul.f32 %v3289_v25, %v2011_v45  ;;  %v1649_v63 = vadd.f32 %v1646_v27, %v1642_v15  ;;  %v2196_v6 = vstv %s3677_s23 }
 0x1ed   :  { %v1825_v44 = vrot.slane %v3490_v7, %v3670_v41  ;;  %v2010_v23 = vmul.f32 %v3302_v35, %v2007_v59  ;;  %v2014_v5 = vmul.f32 %v3305_v60, %v2011_v45  ;;  %v2009_v18 = vmul.f32 %v3274_v37, %v2007_v59 }
 0x1ee   :  { %v1667_v10 = vpop.permute.xlu1 %1666  ;;  %v1665_v50 = vpop.permute.xlu0 %1664  ;;  %v2013_v36 = vmul.f32 %v3269_v55, %v2011_v45  ;;  %v2200_v8 = vstv %s3686_s24  ;;  %v2198_v56 = vmul.f32 %v3274_v37, %v2196_v6  ;;  %v2197_v38 = vmul.f32 %v3286_v22, %v2196_v6 }
 0x1ef   :  { %v1670_v30 = vsel %vm834_vm5, %v1665_v50, %v1667_v10  ;;  %v2017_v19 = vadd.f32 %v2014_v5, %v2010_v23  ;;  %v2202_v50 = vmul.f32 %v3269_v55, %v2200_v8  ;;  %v2201_v57 = vmul.f32 %v3289_v25, %v2200_v8 }
 0x1f0   :  { %1409 = vrot.lane.b32.xlu1 %v1403_v3, %s2697_s27  ;;  %1411 = vrot.lane.b32.xlu0 %v1404_v49, %s2697_s27  ;;  %v1675_v26 = vadd.f32 %v1670_v30, %v1647_v13  ;;  %v3727_v13 = vsub.s32 5, %v4060_v42 }
 0x1f1   :  { %v2205_v45 = vadd.f32 %v2202_v50, %v2198_v56 }
 0x1f2   :  { %v1508_v53 = vpop.permute.xlu1 %1507  ;;  %v1669_v31 = vpop.permute.xlu0 %1668 }
 0x1f3   :  { %v1510_v1 = vsel %vm888_vm7, %v1506_v58, %v1508_v53  ;;  %v3682_v29 = vadd.f32 %v1508_v53, %v1488_v62  ;;  %v1671_v46 = vsel %vm834_vm5, %v1667_v10, %v1669_v31  ;;  %v2178_v62 = vadd.f32 %v2175_v20, %v2171_v28 }
 0x1f4   :  { %v3688_v14 = vadd.f32 %v1510_v1, %v1487_v9  ;;  %2184 = vrot.lane.b32.xlu1 %v2177_v52, %s2692_s8  ;;  %2182 = vrot.lane.b32.xlu0 %v2176_v12, %s2692_s8  ;;  %v1648_v9 = vadd.f32 %v1645_v51, %v1641_v2  ;;  %v1677_v47 = vadd.f32 %v1669_v31, %v1649_v63  ;;  %v2228_v20 = vstv %s2543_s26 }
 0x1f5   :  { %v2015_v58 = vadd.f32 %v2012_v24, %v2008_v54  ;;  %v2016_v10 = vadd.f32 %v2013_v36, %v2009_v18  ;;  %v2204_v53 = vadd.f32 %v2201_v57, %v2197_v38  ;;  %v2199_v31 = vmul.f32 %v3302_v35, %v2196_v6 }
 0x1f6   :  { %v1695_v16 = vpop.permute.xlu1 %1694  ;;  %v1693_v33 = vpop.permute.xlu0 %1692  ;;  %v1676_v48 = vadd.f32 %v1671_v46, %v1648_v9  ;;  %v2203_v52 = vmul.f32 %v3305_v60, %v2200_v8  ;;  %v1856_v1 = vstv %s2451_s0  ;;  %v2038_v46 = vrot.slane %v3512_v61, %v3727_v13 }
 0x1f7   :  { %v1698_v4 = vsel %vm861_vm6, %v1693_v33, %v1695_v16  ;;  %v1860_v51 = vstv %s2500_s29  ;;  %v1857_v54 = vmul.f32 %v3286_v22, %v1856_v1  ;;  %v2042_v9 = vrot.slane %v3490_v7, %v3727_v13 }
 0x1f8   :  { %v3698_v39 = vadd.f32 %v1698_v4, %v1675_v26  ;;  %1828 = vrot.lane.b32.xlu1 %v1821_v32, %s2698_s25  ;;  %2186 = vrot.lane.b32.xlu0 %v2178_v62, %s2692_s8  ;;  %s2494_s8 = sld [smem:[#allocation4 + $0x30]]  ;;  %v2229_v62 = vmul.f32 %v3289_v25, %v2228_v20  ;;  %v1861_v63 = vmul.f32 %v3289_v25, %v1860_v51 }
 0x1f9   :  { %v1858_v23 = vmul.f32 %v3274_v37, %v1856_v1 }
 0x1fa   :  { %v1882_v34 = vpop.permute.xlu1 %1881  ;;  %v1697_v0 = vpop.permute.xlu0 %1696  ;;  %v1864_v8 = vadd.f32 %v1861_v63, %v1857_v54 }
 0x1fb   :  { %v1699_v11 = vsel %vm861_vm6, %v1695_v16, %v1697_v0  ;;  %v1705_v40 = vadd.f32 %v1697_v0, %v1677_v47  ;;  %v2206_v16 = vadd.f32 %v2203_v52, %v2199_v31  ;;  %v1863_v47 = vmul.f32 %v3305_v60, %v1860_v51 }
 0x1fc   :  { %v3710_v21 = vadd.f32 %v1699_v11, %v1676_v48  ;;  %2021 = vrot.lane.b32.xlu1 %v2015_v58, %s2694_s14  ;;  %1830 = vrot.lane.b32.xlu0 %v1825_v44, %s2698_s25  ;;  %v1859_v44 = vmul.f32 %v3302_v35, %v1856_v1  ;;  %v2230_v0 = vmul.f32 %v3269_v55, %v2228_v20 }
 0x1fd   :  { %v1862_v58 = vmul.f32 %v3269_v55, %v1860_v51 }
 0x1fe   :  { %v3714_v3 = vpop.permute.xlu1 %1885  ;;  %v1884_v49 = vpop.permute.xlu0 %1883  ;;  %v2224_v28 = vstv %s2494_s8 }
 0x1ff   :  { %v1887_v30 = vsel %vm834_vm5, %v1882_v34, %v1884_v49  ;;  %v3722_v59 = vsel %vm834_vm5, %v1884_v49, %v3714_v3  ;;  %v2225_v33 = vmul.f32 %v3286_v22, %v2224_v28  ;;  %v2226_v34 = vmul.f32 %v3274_v37, %v2224_v28 }
 0x200   :  { %2025 = vrot.lane.b32.xlu1 %v2017_v19, %s2694_s14  ;;  %2023 = vrot.lane.b32.xlu0 %v2016_v10, %s2694_s14  ;;  %v3767_v49 = vsub.s32 6, %v4060_v42  ;;  %v1892_v10 = vadd.f32 %v1887_v30, %v1864_v8 }
 0x201   :  { %v2232_v48 = vadd.f32 %v2229_v62, %v2225_v33 }
 0x202   :  { %v1534_v2 = vpop.permute.xlu1 %1533  ;;  %v1532_v15 = vpop.permute.xlu0 %1531 }
 0x203   :  { %v1537_v12 = vsel %vm915_vm8, %v1532_v15, %v1534_v2  ;;  %v1865_v15 = vadd.f32 %v1862_v58, %v1858_v23 }
 0x204   :  { %v3733_v27 = vadd.f32 %v1537_v12, %v3656_v43  ;;  %2212 = vrot.lane.b32.xlu1 %v2205_v45, %s2693_s13  ;;  %2210 = vrot.lane.b32.xlu0 %v2204_v53, %s2693_s13 }
 0x205   :  { %v1893_v31 = vadd.f32 %v3722_v59, %v1865_v15 }
 0x206   :  { %v1721_v32 = vpop.permute.xlu1 %1720  ;;  %v1536_v26 = vpop.permute.xlu0 %1535 }
 0x207   :  { %v1538_v43 = vsel %vm915_vm8, %v1534_v2, %v1536_v26  ;;  %v3744_v24 = vadd.f32 %v1536_v26, %v3682_v29  ;;  %v2227_v29 = vmul.f32 %v3302_v35, %v2224_v28  ;;  %v1866_v2 = vadd.f32 %v1863_v47, %v1859_v44 }
 0x208   :  { %v3748_v4 = vadd.f32 %v1538_v43, %v3688_v14  ;;  %2045 = vrot.lane.b32.xlu1 %v2038_v46, %s2699_s30  ;;  %2214 = vrot.lane.b32.xlu0 %v2206_v16, %s2693_s13  ;;  %v2231_v14 = vmul.f32 %v3305_v60, %v2228_v20  ;;  %s2700_s13 = smov 6   ;;  %v2077_v47 = vstv %s2501_s5 }
 0x209   :  { %v1894_v30 = vadd.f32 %v3714_v3, %v1866_v2 }
 0x20a   :  { %v1725_v5 = vpop.permute.xlu1 %1724  ;;  %v1723_v6 = vpop.permute.xlu0 %1722  ;;  %v2234_v57 = vadd.f32 %v2231_v14, %v2227_v29  ;;  %v2080_v14 = vmul.f32 %v3305_v60, %v2077_v47 }
 0x20b   :  { %v1733_v18 = vadd.f32 %v1725_v5, %v1705_v40  ;;  %v1726_v36 = vsel %vm888_vm7, %v1721_v32, %v1723_v6  ;;  %v1727_v11 = vsel %vm888_vm7, %v1723_v6, %v1725_v5  ;;  %v2233_v40 = vadd.f32 %v2230_v0, %v2226_v34 }
 0x20c   :  { %v1731_v19 = vadd.f32 %v1726_v36, %v3698_v39  ;;  %v1732_v56 = vadd.f32 %v1727_v11, %v3710_v21  ;;  %2238 = vrot.lane.b32.xlu1 %v2232_v48, %s2694_s14  ;;  %2047 = vrot.lane.b32.xlu0 %v2042_v9, %s2699_s30  ;;  %v2259_v39 = vrot.slane %v3490_v7, %v3767_v49 }
 0x20d   :  { %v2255_v21 = vrot.slane %v3512_v61, %v3767_v49  ;;  %v2079_v36 = vmul.f32 %v3269_v55, %v2077_v47 }
 0x20e   :  { %v1912_v50 = vpop.permute.xlu1 %1911  ;;  %v1910_v38 = vpop.permute.xlu0 %1909 }
 0x20f   :  { %v1915_v45 = vsel %vm861_vm6, %v1910_v38, %v1912_v50 }
 0x210   :  { %v1920_v53 = vadd.f32 %v1915_v45, %v1892_v10  ;;  %2242 = vrot.lane.b32.xlu1 %v2234_v57, %s2694_s14  ;;  %2240 = vrot.lane.b32.xlu0 %v2233_v40, %s2694_s14  ;;  %s2452_s14 = sld [smem:[#allocation4 + $0x6]] }
 0x212   :  { %v2099_v52 = vpop.permute.xlu1 %2098  ;;  %v1914_v12 = vpop.permute.xlu0 %1913 }
 0x213   :  { %v1916_v28 = vsel %vm861_vm6, %v1912_v50, %v1914_v12  ;;  %v1922_v20 = vadd.f32 %v1914_v12, %v1894_v30 }
 0x214   :  { %v1921_v1 = vadd.f32 %v1916_v28, %v1893_v31  ;;  %2264 = vrot.lane.b32.xlu1 %v2259_v39, %s2700_s13  ;;  %2262 = vrot.lane.b32.xlu0 %v2255_v21, %s2700_s13 }
 0x216   :  { %v2103_v46 = vpop.permute.xlu1 %2102  ;;  %v2101_v51 = vpop.permute.xlu0 %2100  ;;  %v2073_v44 = vstv %s2452_s14 }
 0x217   :  { %v2104_v32 = vsel %vm834_vm5, %v2099_v52, %v2101_v51  ;;  %v2105_v26 = vsel %vm834_vm5, %v2101_v51, %v2103_v46  ;;  %v2076_v48 = vmul.f32 %v3302_v35, %v2073_v44  ;;  %v2074_v34 = vmul.f32 %v3286_v22, %v2073_v44 }
 0x218   :  { %v2075_v58 = vmul.f32 %v3274_v37, %v2073_v44  ;;  %v806_v51 = vstv %s706_s6 }
 0x21a   :  { %v1562_v16 = vpop.permute.xlu1 %1561  ;;  %v1560_v33 = vpop.permute.xlu0 %1559  ;;  %v2082_v50 = vadd.f32 %v2079_v36, %v2075_v58  ;;  %v4062_v36 = vld [vmem:[#allocation24_spill] sm:$0xff] }
 0x21c   :  { %v2110_v37 = vadd.f32 %v2105_v26, %v2082_v50  ;;  %v1565_v26 = vsel %vm942_vm9, %v1560_v33, %v1562_v16  ;;  %v2592_v33 = vld [vmem:[#allocation2 + $0x20] sm:$0xff] }
 0x21e   :  { %v1749_v3 = vpop.permute.xlu1 %1748  ;;  %v3781_v59 = vpop.permute.xlu0 %1563 }
 0x21f   :  { %v1572_v50 = vadd.f32 %v3781_v59, %v3744_v24 }
 0x222   :  { %v1753_v62 = vpop.permute.xlu1 %1752  ;;  %v1751_v54 = vpop.permute.xlu0 %1750 }
 0x223   :  { %v3783_v43 = vadd.f32 %v1753_v62, %v1733_v18  ;;  %v1754_v63 = vsel %vm915_vm8, %v1749_v3, %v1751_v54  ;;  %v1755_v9 = vsel %vm915_vm8, %v1751_v54, %v1753_v62  ;;  %v2078_v18 = vmul.f32 %v3289_v25, %v2077_v47  ;;  %v2590_v47 = vld [vmem:[#allocation2] sm:$0xff] }
 0x224   :  { %v3787_v23 = vadd.f32 %v1754_v63, %v1731_v19  ;;  %v3789_v29 = vadd.f32 %v1755_v9, %v1732_v56  ;;  %v2083_v56 = vadd.f32 %v2080_v14, %v2076_v48  ;;  %v1566_v3 = vsel %vm942_vm9, %v1562_v16, %v3781_v59  ;;  %v2589_v9 = vld [vmem:[#allocation2 + $0x18] sm:$0xff]  ;;  %v2591_v14 = vld [vmem:[#allocation2 + $0x8] sm:$0xff] }
 0x225   :  { %v2081_v60 = vadd.f32 %v2078_v18, %v2074_v34  ;;  %v808_v34 = vmul.f32 %v2591_v14, %v806_v51  ;;  %v1571_v16 = vadd.f32 %v1566_v3, %v3748_v4  ;;  %v4061_v18 = vld [vmem:[#allocation23_spill] sm:$0xff]  ;;  %v4067_v59 = vld [vmem:[#allocation29_spill] sm:$0xff]  ;;  %v4070_v14 = vld [vmem:[#allocation34_spill] sm:$0xff] }
 0x226   :  { %v1940_v5 = vpop.permute.xlu1 %1939  ;;  %v1938_v6 = vpop.permute.xlu0 %1937  ;;  %v2111_v38 = vadd.f32 %v2103_v46, %v2083_v56 }
 0x227   :  { %v1943_v0 = vsel %vm888_vm7, %v1938_v6, %v1940_v5  ;;  %v2109_v57 = vadd.f32 %v2104_v32, %v2081_v60  ;;  %v809_v32 = vstv %s2495_s9  ;;  %v1570_v6 = vadd.f32 %v1565_v26, %v3733_v27  ;;  %v4063_v60 = vld [vmem:[#allocation26_spill] sm:$0xff] }
 0x228   :  { %v3798_v11 = vadd.f32 %v1943_v0, %v1920_v53  ;;  %v810_v44 = vmul.f32 %v2589_v9, %v809_v32  ;;  %v811_v0 = vmul.f32 %v2592_v33, %v809_v32  ;;  %v836_v27 = vsel %vm834_vm5, %v4061_v18, %v4063_v60  ;;  %v4072_v33 = vld [vmem:[#allocation33_spill] sm:$0xff] }
 0x22a   :  { %v2127_v8 = vpop.permute.xlu1 %2126  ;;  %v1942_v19 = vpop.permute.xlu0 %1941  ;;  %v813_v4 = vadd.f32 %v811_v0, %v808_v34  ;;  %v917_v0 = vsel %vm915_vm8, %v4070_v14, %v4072_v33 }
 0x22b   :  { %v1944_v10 = vsel %vm888_vm7, %v1940_v5, %v1942_v19  ;;  %v3801_v35 = vadd.f32 %v1942_v19, %v1922_v20  ;;  %v807_v5 = vmul.f32 %v2590_v47, %v806_v51 }
 0x22c   :  { %v3803_v22 = vadd.f32 %v1944_v10, %v1921_v1  ;;  %v840_v26 = vadd.f32 %v836_v27, %v813_v4 }
 0x22e   :  { %v2131_v40 = vpop.permute.xlu1 %2130  ;;  %v2129_v25 = vpop.permute.xlu0 %2128 }
 0x22f   :  { %v3805_v2 = vadd.f32 %v2131_v40, %v2111_v38  ;;  %v2132_v55 = vsel %vm861_vm6, %v2127_v8, %v2129_v25  ;;  %v2133_v15 = vsel %vm861_vm6, %v2129_v25, %v2131_v40  ;;  %v835_v8 = vsel %vm834_vm5, %v4062_v36, %v4061_v18  ;;  %v4064_v25 = vld [vmem:[#allocation28_spill] sm:$0xff] }
 0x230   :  { %v3809_v45 = vadd.f32 %v2132_v55, %v2109_v57  ;;  %v3811_v53 = vadd.f32 %v2133_v15, %v2110_v37  ;;  %v812_v37 = vadd.f32 %v810_v44, %v807_v5  ;;  %v4065_v55 = vld [vmem:[#allocation25_spill] sm:$0xff]  ;;  %v4069_v44 = vld [vmem:[#allocation32_spill] sm:$0xff]  ;;  %vm2066_vm5 = vcmask 1006592  }
 0x231   :  { %v862_v15 = vsel %vm861_vm6, %v4065_v55, %v4064_v25  ;;  %v890_v47 = vsel %vm888_vm7, %v4067_v59, %v4069_v44 }
 0x232   :  { %v1590_v39 = vpop.permute.xlu1 %1589  ;;  %v1588_v21 = vpop.permute.xlu0 %1587  ;;  %v839_v32 = vadd.f32 %v835_v8, %v812_v37  ;;  %v4073_v8 = vld [vmem:[#allocation35_spill] sm:$0xff]  ;;  %v4077_v37 = vld [vmem:[#allocation37_spill] sm:$0xff] }
 0x233   :  { %v1593_v62 = vsel %vm969_vm10, %v1588_v21, %v1590_v39 }
 0x234   :  { %v1598_v58 = vadd.f32 %v1593_v62, %v1570_v6  ;;  %v4068_v62 = vld [vmem:[#allocation30_spill] sm:$0xff]  ;;  %v866_v6 = vadd.f32 %v862_v15, %v839_v32 }
 0x235   :  { %v889_v9 = vsel %vm888_vm7, %v4068_v62, %v4067_v59 }
 0x236   :  { %v3813_v30 = vpop.permute.xlu1 %1776  ;;  %v1592_v31 = vpop.permute.xlu0 %1591 }
 0x237   :  { %v1594_v48 = vsel %vm969_vm10, %v1590_v39, %v1592_v31  ;;  %v4066_v39 = vld [vmem:[#allocation27_spill] sm:$0xff]  ;;  %v1600_v51 = vadd.f32 %v1592_v31, %v1572_v50 }
 0x238   :  { %v1599_v19 = vadd.f32 %v1594_v48, %v1571_v16  ;;  %v863_v21 = vsel %vm861_vm6, %v4064_v25, %v4066_v39  ;;  %v4071_v31 = vld [vmem:[#allocation31_spill] sm:$0xff]  ;;  %v893_v16 = vadd.f32 %v889_v9, %v866_v6  ;;  %vm2283_vm6 = vcmask 998400  }
 0x239   :  { %v867_v48 = vadd.f32 %v863_v21, %v840_v26  ;;  %v916_v34 = vsel %vm915_vm8, %v4071_v31, %v4070_v14 }
 0x23a   :  { %v3815_v52 = vpop.permute.xlu1 %1780  ;;  %v3817_v12 = vpop.permute.xlu0 %1778  ;;  %v920_v27 = vadd.f32 %v916_v34, %v893_v16 }
 0x23e   :  { %v3819_v28 = vpop.permute.xlu1 %1967  ;;  %v3821_v20 = vpop.permute.xlu0 %1965 }
 0x242   :  { %v3823_v1 = vpop.permute.xlu1 %2154  ;;  %v3825_v46 = vpop.permute.xlu0 %1969 }
 0x246   :  { %v3831_v54 = vpop.permute.xlu1 %2158  ;;  %v3833_v63 = vpop.permute.xlu0 %2156 }
 0x24a   :  { %v1614_v56 = vpop.permute.xlu1 %1613  ;;  %v1612_v10 = vpop.permute.xlu0 %1611 }
 0x24b   :  { %v1616_v38 = vsel %vm1615_vm13, %v1612_v10, %v1614_v56  ;;  %v1620_v57 = vmul.f32 %v1612_v10, %v1598_v58  ;;  %v1622_v5 = vmul.f32 %v1614_v56, %v1600_v51  ;;  %v894_v58 = vadd.f32 %v890_v47, %v867_v48  ;;  %v4075_v10 = vld [vmem:[#allocation38_spill] sm:$0xff] }
 0x24c   :  { %v1621_v40 = vmul.f32 %v1616_v38, %v1599_v19  ;;  %v4074_v19 = vld [vmem:[#allocation36_spill] sm:$0xff]  ;;  %v944_v60 = vsel %vm942_vm9, %v4073_v8, %v4075_v10  ;;  %v3873_v38 = vsub.s32 0, %v4060_v42 }
 0x24d   :  { %1626 = vrot.lane.b32.xlu0 %v1620_v57, %s2701_s10  ;;  %v943_v56 = vsel %vm942_vm9, %v4074_v19, %v4073_v8  ;;  %v921_v50 = vadd.f32 %v917_v0, %v894_v58  ;;  %v4076_v57 = vld [vmem:[#allocation40_spill] sm:$0xff]  ;;  %v1782_v19 = vsel %vm942_vm9, %v3813_v30, %v3817_v12  ;;  %v1789_v30 = vadd.f32 %v3815_v52, %v3783_v43 }
 0x24e   :  { %v1807_v3 = vpop.permute.xlu1 %1806  ;;  %1628 = vrot.lane.b32.xlu1 %v1621_v40, %s2701_s10  ;;  %v1805_v24 = vpop.permute.xlu0 %1804  ;;  %v970_v4 = vsel %vm969_vm10, %v4077_v37, %v4076_v57  ;;  %v4078_v40 = vld [vmem:[#allocation39_spill] sm:$0xff]  ;;  %v947_v55 = vadd.f32 %v943_v56, %v920_v27  ;;  %v979_v51 = vrot.slane %v3512_v61, %v3873_v38  ;;  %v983_v32 = vrot.slane %v3490_v7, %v3873_v38 }
 0x24f   :  { %v971_v25 = vsel %vm969_vm10, %v4076_v57, %v4078_v40  ;;  %v948_v15 = vadd.f32 %v944_v60, %v921_v50  ;;  %v1810_v60 = vsel %vm969_vm10, %v1805_v24, %v1807_v3  ;;  %v1787_v57 = vadd.f32 %v1782_v19, %v3787_v23 }
 0x250   :  { %v974_v26 = vadd.f32 %v970_v4, %v947_v55  ;;  %v1783_v37 = vsel %vm942_vm9, %v3817_v12, %v3815_v52  ;;  %v1971_v43 = vsel %vm915_vm8, %v3821_v20, %v3819_v28  ;;  %v1978_v20 = vadd.f32 %v3825_v46, %v3801_v35 }
 0x251   :  { %1630 = vrot.lane.b32.xlu0 %v1622_v5, %s2701_s10  ;;  %v975_v59 = vadd.f32 %v971_v25, %v948_v15  ;;  %v805_v5 = vstv %s3980_s1  ;;  %v1815_v4 = vadd.f32 %v1810_v60, %v1787_v57  ;;  %v1788_v24 = vadd.f32 %v1783_v37, %v3789_v29  ;;  %s2702_s1 = smov 124  }
 0x252   :  { %v3864_v18 = vpop.permute.xlu1 %1993  ;;  %v1809_v36 = vpop.permute.xlu0 %1808  ;;  %v984_v44 = vmul.f32 %v979_v51, %v974_v26  ;;  %v2161_v35 = vsel %vm888_vm7, %v3833_v63, %v3831_v54 }
 0x253   :  { %v985_v47 = vmul.f32 %v983_v32, %v975_v59  ;;  %v1811_v55 = vsel %vm969_vm10, %v1807_v3, %v1809_v36  ;;  %v1817_v51 = vadd.f32 %v1809_v36, %v1789_v30  ;;  %v1976_v36 = vadd.f32 %v1971_v43, %v3798_v11 }
 0x254   :  { %v986_v61 = vadd.f32 %v984_v44, %v805_v5  ;;  %v1816_v23 = vadd.f32 %v1811_v55, %v1788_v24  ;;  %v2166_v60 = vadd.f32 %v2161_v35, %v3811_v53  ;;  %v2167_v30 = vadd.f32 %v3831_v54, %v3805_v2 }
 0x255   :  { %v987_v34 = vadd.f32 %v985_v47, %v805_v5  ;;  %v1972_v5 = vsel %vm915_vm8, %v3819_v28, %v3825_v46 }
 0x256   :  { %v3881_v39 = vpop.permute.xlu1 %1997  ;;  %v3883_v21 = vpop.permute.xlu0 %1995 }
 0x257   :  { %v1999_v29 = vsel %vm942_vm9, %v3864_v18, %v3883_v21  ;;  %v1977_v18 = vadd.f32 %v1972_v5, %v3803_v22 }
 0x25a   :  { %v1414_v62 = vpop.permute.xlu1 %1413  ;;  %v1197_v9 = vpop.permute.xlu0 %1196 }
 0x25e   :  { %v1195_v6 = vpop.permute.xlu1 %1194  ;;  %v1193_v48 = vpop.permute.xlu0 %1192 }
 0x25f   :  { %v1200_v14 = vsel %vm1198_vm14, %v1195_v6, %v1197_v9  ;;  %v1199_v31 = vsel %vm1198_vm14, %v1193_v48, %v1195_v6  ;;  %v2004_v6 = vadd.f32 %v1999_v29, %v1976_v36  ;;  %v2000_v48 = vsel %vm942_vm9, %v3883_v21, %v3881_v39 }
 0x260   :  { %v1204_v33 = vadd.f32 %v1200_v14, %v987_v34  ;;  %v1203_v7 = vadd.f32 %v1199_v31, %v986_v61  ;;  %v2160_v34 = vsel %vm888_vm7, %v3823_v1, %v3833_v63  ;;  %v2006_v61 = vadd.f32 %v3881_v39, %v1978_v20 }
 0x261   :  { %v2165_v21 = vadd.f32 %v2160_v34, %v3809_v45 }
 0x262   :  { %v1410_v0 = vpop.permute.xlu1 %1409  ;;  %v1412_v16 = vpop.permute.xlu0 %1411 }
 0x263   :  { %v1416_v58 = vsel %vm1415_vm15, %v1410_v0, %v1412_v16  ;;  %v1417_v8 = vsel %vm1415_vm15, %v1412_v16, %v1414_v62 }
 0x264   :  { %v3895_v56 = vadd.f32 %v1416_v58, %v1203_v7  ;;  %v3897_v10 = vadd.f32 %v1417_v8, %v1204_v33  ;;  %v2005_v7 = vadd.f32 %v2000_v48, %v1977_v18 }
 0x266   :  { %v2185_v27 = vpop.permute.xlu1 %2184  ;;  %v2183_v50 = vpop.permute.xlu0 %2182 }
 0x267   :  { %v2188_v46 = vsel %vm915_vm8, %v2183_v50, %v2185_v27 }
 0x268   :  { %v2193_v63 = vadd.f32 %v2188_v46, %v2165_v21 }
 0x26a   :  { %v1829_v40 = vpop.permute.xlu1 %1828  ;;  %v3904_v25 = vpop.permute.xlu0 %2186 }
 0x26b   :  { %v1837_v15 = vmul.f32 %v1829_v40, %v1815_v4  ;;  %v2189_v39 = vsel %vm915_vm8, %v2185_v27, %v3904_v25  ;;  %v2195_v53 = vadd.f32 %v3904_v25, %v2167_v30  ;;  %v4080_v30 = vld [vmem:[#allocation18_spill] sm:$0xff] }
 0x26c   :  { %v2194_v37 = vadd.f32 %v2189_v39, %v2166_v60  ;;  %v2302_v60 = vld [vmem:[#allocation9] sm:$0xff] }
 0x26d   :  { %1843 = vrot.lane.b32.xlu1 %v1837_v15, %s2702_s1 }
 0x26e   :  { %v2022_v32 = vpop.permute.xlu1 %2021  ;;  %v1831_v26 = vpop.permute.xlu0 %1830 }
 0x26f   :  { %v1833_v12 = vsel %vm1832_vm0, %v1829_v40, %v1831_v26  ;;  %v1839_v59 = vmul.f32 %v1831_v26, %v1817_v51 }
 0x270   :  { %v1838_v62 = vmul.f32 %v1833_v12, %v1816_v23 }
 0x271   :  { %1847 = vrot.lane.b32.xlu1 %v1839_v59, %s2702_s1 }
 0x272   :  { %v2026_v52 = vpop.permute.xlu1 %2025  ;;  %1845 = vrot.lane.b32.xlu0 %v1838_v62, %s2702_s1  ;;  %v2024_v3 = vpop.permute.xlu0 %2023 }
 0x273   :  { %v2027_v9 = vsel %vm969_vm10, %v2022_v32, %v2024_v3  ;;  %v2028_v28 = vsel %vm969_vm10, %v2024_v3, %v2026_v52  ;;  %v2034_v22 = vadd.f32 %v2026_v52, %v2006_v61 }
 0x274   :  { %v2032_v14 = vadd.f32 %v2027_v9, %v2004_v6  ;;  %v2033_v0 = vadd.f32 %v2028_v28, %v2005_v7 }
 0x276   :  { %v2213_v44 = vpop.permute.xlu1 %2212  ;;  %v2211_v47 = vpop.permute.xlu0 %2210 }
 0x277   :  { %v2216_v58 = vsel %vm942_vm9, %v2211_v47, %v2213_v44 }
 0x278   :  { %v2221_v4 = vadd.f32 %v2216_v58, %v2193_v63 }
 0x27a   :  { %v2046_v11 = vpop.permute.xlu1 %2045  ;;  %v2215_v31 = vpop.permute.xlu0 %2214 }
 0x27b   :  { %v2054_v33 = vmul.f32 %v2046_v11, %v2032_v14  ;;  %v2217_v50 = vsel %vm942_vm9, %v2213_v44, %v2215_v31  ;;  %v2223_v26 = vadd.f32 %v2215_v31, %v2195_v53 }
 0x27c   :  { %v2222_v15 = vadd.f32 %v2217_v50, %v2194_v37  ;;  %v2331_v50 = vld [vmem:[#allocation9 + $0x20] sm:$0xff]  ;;  %v2346_v37 = vld [vmem:[#allocation9 + $0x30] sm:$0xff] }
 0x27d   :  { %2060 = vrot.lane.b32.xlu0 %v2054_v33, %s2703_s28 }
 0x27e   :  { %v2239_v1 = vpop.permute.xlu1 %2238  ;;  %v2048_v16 = vpop.permute.xlu0 %2047 }
 0x27f   :  { %v2050_v8 = vsel %vm2049_vm1, %v2046_v11, %v2048_v16  ;;  %v2056_v19 = vmul.f32 %v2048_v16, %v2034_v22 }
 0x280   :  { %v2055_v57 = vmul.f32 %v2050_v8, %v2033_v0 }
 0x281   :  { %2064 = vrot.lane.b32.xlu0 %v2056_v19, %s2703_s28  ;;  %v2410_v19 = vsub.s32 7, %v4060_v42 }
 0x282   :  { %v2243_v45 = vpop.permute.xlu1 %2242  ;;  %2062 = vrot.lane.b32.xlu1 %v2055_v57, %s2703_s28  ;;  %v2241_v40 = vpop.permute.xlu0 %2240  ;;  %v2316_v57 = vld [vmem:[#allocation9 + $0x10] sm:$0xff] }
 0x283   :  { %v2244_v27 = vsel %vm969_vm10, %v2239_v1, %v2241_v40  ;;  %v2245_v55 = vsel %vm969_vm10, %v2241_v40, %v2243_v45  ;;  %v2251_v43 = vadd.f32 %v2243_v45, %v2223_v26  ;;  %v4079_v45 = vld [vmem:[#allocation17_spill] sm:$0xff] }
 0x284   :  { %v2249_v24 = vadd.f32 %v2244_v27, %v2221_v4  ;;  %v2250_v51 = vadd.f32 %v2245_v55, %v2222_v15  ;;  %v2303_v15 = vld [vmem:[#allocation9 + $0x8] sm:$0xff] }
 0x286   :  { %v2265_v23 = vpop.permute.xlu1 %2264  ;;  %v2263_v32 = vpop.permute.xlu0 %2262 }
 0x287   :  { %v2267_v12 = vsel %vm2266_vm2, %v2263_v32, %v2265_v23  ;;  %v2271_v59 = vmul.f32 %v2263_v32, %v2249_v24  ;;  %v2273_v2 = vmul.f32 %v2265_v23, %v2251_v43  ;;  %v2361_v24 = vld [vmem:[#allocation9 + $0x40] sm:$0xff]  ;;  %v2332_v43 = vld [vmem:[#allocation9 + $0x28] sm:$0xff] }
 0x288   :  { %v2272_v62 = vmul.f32 %v2267_v12, %v2250_v51  ;;  %v2376_v51 = vld [vmem:[#allocation9 + $0x50] sm:$0xff] }
 0x289   :  { %2277 = vrot.lane.b32.xlu1 %v2271_v59, %s2704_s16  ;;  %v2317_v59 = vld [vmem:[#allocation9 + $0x18] sm:$0xff] }
 0x28a   :  { %2279 = vrot.lane.b32.xlu0 %v2272_v62, %s2704_s16 }
 0x28d   :  { %2281 = vrot.lane.b32.xlu1 %v2273_v2, %s2704_s16 }
 0x2bf   :  { %v1627_v54 = vpop.permute.xlu0 %1626 }
 0x2c0   :  { %v1629_v52 = vpop.permute.xlu1 %1628 }
 0x2c1   :  { %v1633_v44 = vsel %vm1632_vm3, %v1627_v54, %v1629_v52  ;;  %v2347_v54 = vld [vmem:[#allocation9 + $0x38] sm:$0xff] }
 0x2c2   :  { %v1637_v6 = vadd.f32 %v1633_v44, %v3895_v56  ;;  %v2377_v44 = vld [vmem:[#allocation9 + $0x58] sm:$0xff] }
 0x2c3   :  { %v1631_v3 = vpop.permute.xlu0 %1630 }
 0x2c4   :  { %v1634_v20 = vsel %vm1632_vm3, %v1629_v52, %v1631_v3 }
 0x2c5   :  { %v1638_v31 = vadd.f32 %v1634_v20, %v3897_v10 }
 0x2df   :  { %v1844_v29 = vpop.permute.xlu1 %1843 }
 0x2e3   :  { %v1848_v25 = vpop.permute.xlu1 %1847 }
 0x2e4   :  { %v1846_v36 = vpop.permute.xlu0 %1845 }
 0x2e5   :  { %v1850_v5 = vsel %vm1849_vm4, %v1844_v29, %v1846_v36  ;;  %v1851_v18 = vsel %vm1849_vm4, %v1846_v36, %v1848_v25 }
 0x2e6   :  { %v1854_v11 = vadd.f32 %v1850_v5, %v1637_v6  ;;  %v1855_v7 = vadd.f32 %v1851_v18, %v1638_v31 }
 0x2ef   :  { %v2061_v9 = vpop.permute.xlu0 %2060 }
 0x2f3   :  { %v2065_v48 = vpop.permute.xlu0 %2064 }
 0x2f4   :  { %v2063_v47 = vpop.permute.xlu1 %2062 }
 0x2f5   :  { %v2067_v14 = vsel %vm2066_vm5, %v2061_v9, %v2063_v47  ;;  %v2068_v61 = vsel %vm2066_vm5, %v2063_v47, %v2065_v48  ;;  %v2362_v9 = vld [vmem:[#allocation9 + $0x48] sm:$0xff]  ;;  %v2391_v47 = vld [vmem:[#allocation9 + $0x60] sm:$0xff] }
 0x2f6   :  { %v2071_v28 = vadd.f32 %v2067_v14, %v1854_v11  ;;  %v2072_v22 = vadd.f32 %v2068_v61, %v1855_v7  ;;  %v2407_v7 = vld [vmem:[#allocation9 + $0x78] sm:$0xff] }
 0x2fb   :  { %v2278_v34 = vpop.permute.xlu1 %2277 }
 0x2fc   :  { %v2280_v33 = vpop.permute.xlu0 %2279 }
 0x2fd   :  { %v2284_v35 = vsel %vm2283_vm6, %v2278_v34, %v2280_v33  ;;  %v2392_v34 = vld [vmem:[#allocation9 + $0x68] sm:$0xff] }
 0x2fe   :  { %v2288_v46 = vadd.f32 %v2284_v35, %v2071_v28 }
 0x2ff   :  { %v2282_v21 = vpop.permute.xlu1 %2281 }
 0x300   :  { %v2544_v0 = vmul.f32 -1.442695, %v2288_v46  ;;  %v2285_v1 = vsel %vm2283_vm6, %v2280_v33, %v2282_v21 }
 0x301   :  { %v2289_v56 = vadd.f32 %v2285_v1, %v2072_v22 }
 0x302   :  { %2573 = vpow2.f32 %v2544_v0 }
 0x303   :  { %v2545_v16 = vmul.f32 -1.442695, %v2289_v56 }
 0x305   :  { %2575 = vpow2.f32 %v2545_v16 }
 0x30c   :  { %v2574_v39 = vpop.eup %2573 }
 0x30d   :  { %v2296_v58 = vadd.f32 1.0, %v2574_v39 }
 0x30f   :  { %v2576_v8 = vpop.eup %2575  ;;  %2577 = vrcp.f32 %v2296_v58 }
 0x310   :  { %v2297_v10 = vadd.f32 1.0, %v2576_v8 }
 0x312   :  { %2579 = vrcp.f32 %v2297_v10 }
 0x319   :  { %v2578_v63 = vpop.eup %2577 }
 0x31a   :  { %v2307_v4 = vrot.slane %v2578_v63, %v3873_v38  ;;  %v2321_v40 = vrot.slane %v2578_v63, %v4079_v45  ;;  %v2336_v27 = vrot.slane %v2578_v63, %v4080_v30  ;;  %v2351_v55 = vrot.slane %v2578_v63, %v3467_v17 }
 0x31b   :  { %v2366_v53 = vrot.slane %v2578_v63, %v3670_v41  ;;  %v2381_v42 = vrot.slane %v2578_v63, %v3727_v13  ;;  %v2396_v23 = vrot.slane %v2578_v63, %v3767_v49  ;;  %v2411_v32 = vrot.slane %v2578_v63, %v2410_v19 }
 0x31c   :  { %v2580_v26 = vpop.eup %2579  ;;  %v2312_v12 = vmul.f32 %v2307_v4, %v2302_v60  ;;  %v2326_v62 = vmul.f32 %v2321_v40, %v2316_v57  ;;  %v2341_v2 = vmul.f32 %v2336_v27, %v2331_v50  ;;  %v2356_v52 = vmul.f32 %v2351_v55, %v2346_v37 }
 0x31d   :  { %v2311_v3 = vrot.slane %v2580_v26, %v3873_v38  ;;  %v2325_v29 = vrot.slane %v2580_v26, %v4079_v45  ;;  %v2340_v36 = vrot.slane %v2580_v26, %v4080_v30  ;;  %v2355_v25 = vrot.slane %v2580_v26, %v3467_v17  ;;  %v2406_v38 = vld [vmem:[#allocation9 + $0x70] sm:$0xff] }
 0x31e   :  { %2314 = vst [vmem:[#allocation11] sm:$0xff] %v2312_v12  ;;  %2329 = vst [vmem:[#allocation11 + $0x10] sm:$0xff] %v2326_v62  ;;  %v2370_v5 = vrot.slane %v2580_v26, %v3670_v41  ;;  %v2371_v6 = vmul.f32 %v2366_v53, %v2361_v24  ;;  %v2385_v20 = vrot.slane %v2580_v26, %v3727_v13 }
 0x31f   :  { %2344 = vst [vmem:[#allocation11 + $0x20] sm:$0xff] %v2341_v2  ;;  %2359 = vst [vmem:[#allocation11 + $0x30] sm:$0xff] %v2356_v52  ;;  %v2386_v48 = vmul.f32 %v2381_v42, %v2376_v51  ;;  %v2313_v14 = vmul.f32 %v2311_v3, %v2303_v15  ;;  %v2327_v18 = vmul.f32 %v2325_v29, %v2317_v59 }
 0x320   :  { %v2342_v11 = vmul.f32 %v2340_v36, %v2332_v43  ;;  %v2357_v31 = vmul.f32 %v2355_v25, %v2347_v54  ;;  %v2372_v17 = vmul.f32 %v2370_v5, %v2362_v9  ;;  %2374 = vst [vmem:[#allocation11 + $0x40] sm:$0xff] %v2371_v6  ;;  %v2387_v61 = vmul.f32 %v2385_v20, %v2377_v44 }
 0x321   :  { %2389 = vst [vmem:[#allocation11 + $0x50] sm:$0xff] %v2386_v48  ;;  %v2400_v28 = vrot.slane %v2580_v26, %v3767_v49  ;;  %v2401_v33 = vmul.f32 %v2396_v23, %v2391_v47  ;;  %2315 = vst [vmem:[#allocation11 + $0x8] sm:$0xff] %v2313_v14  ;;  %v2415_v41 = vrot.slane %v2580_v26, %v2410_v19 }
 0x322   :  { %2330 = vst [vmem:[#allocation11 + $0x18] sm:$0xff] %v2327_v18  ;;  %2345 = vst [vmem:[#allocation11 + $0x28] sm:$0xff] %v2342_v11  ;;  %v2416_v13 = vmul.f32 %v2411_v32, %v2406_v38 }
 0x323   :  { %2360 = vst [vmem:[#allocation11 + $0x38] sm:$0xff] %v2357_v31  ;;  %2375 = vst [vmem:[#allocation11 + $0x48] sm:$0xff] %v2372_v17  ;;  %v2402_v35 = vmul.f32 %v2400_v28, %v2392_v34  ;;  %v2417_v46 = vmul.f32 %v2415_v41, %v2407_v7 }
 0x324   :  { %2390 = vst [vmem:[#allocation11 + $0x58] sm:$0xff] %v2387_v61  ;;  %2404 = vst [vmem:[#allocation11 + $0x60] sm:$0xff] %v2401_v33 }
 0x325   :  { %2419 = vst [vmem:[#allocation11 + $0x70] sm:$0xff] %v2416_v13  ;;  %2405 = vst [vmem:[#allocation11 + $0x68] sm:$0xff] %v2402_v35 }
 0x326   :  { %2420 = vst [vmem:[#allocation11 + $0x78] sm:$0xff] %v2417_v46 }
 0x327   :  { %2660 = shalt.err (!%p2657_p11)
}
 0x328   :  { %s2661_s20 = scalar_lea.hbm %s3983_s4, 2048 }
 0x329   :  { %p2662_p12 = scmp.ne.s32.totalorder %s3983_s4, %s2661_s20  ;;  %p2665_p13 = scmp.lt.u32.totalorder %s2661_s20, %s3983_s4 }
 0x32b   :  { %p2667_p0 = pnand %p2665_p13, %p2662_p12 }
 0x32d   :  { %2670 = shalt.err (!%p2667_p0)
}
 0x32e   :  { %2432 = dma.vmem_to_hbm [thread:$0]  %s2427_s7, 2048, %s3983_s4, [#allocation6], %s2682_s2, %s2682_s2, %s2683_s15  }
 0x32f   :  { %2677 = dma.done.wait [#allocation6], 2048  }
 0x330   :  { %2678 = vsyncadd [#allocation6], 4294965248 }
 0x331   :  { %2436 = vsyncpa [#allocation5], 1 }
 0x332   :  { %2437 = vsyncpa [#allocation10], 1 }
 0x333   :  { %2438 = vsyncpa [#allocation6], 1 }
 0x334   :  { %2439 = vsyncpa [#allocation7], 1 }

</bundles_post_ra>
